<compile_context>
chip_gen: v7x
topology: tpu7x:2x2x1
jax: 0.10.0
libtpu: 0.0.40
codegen_flags: <defaults>
</compile_context>

<pallas_src>
import numpy as np
import jax
import jax.numpy as jnp
from jax.experimental import pallas as pl
from jax.experimental.pallas import tpu as pltpu

EPS = 1e-5          # PyTorch BatchNorm1d default eps
KERNEL = 4
STRIDE = 2
PAD = 1
NEG_SLOPE = 0.2
NUM_LAYERS = 6
NUM_BN = 5          # layers 1..5 have BatchNorm + LeakyReLU, layer 6 has Sigmoid


# ----------------------------- fused Pallas kernel --------------------------

def _discriminator_kernel(*refs):
    """refs = (x, [S, W, gamma, beta] x5, S6, W6, bias6, out)."""
    x_ref = refs[0]
    o_ref = refs[-1]
    p = refs[1:-1]

    h = x_ref[...]                              # (N*L, Cin) f32, channel-last
    pos = 0
    for layer in range(NUM_LAYERS):
        s_ref = p[pos]                          # (4, N*Lo, N*Li) bf16 0/1 tap gather
        w_ref = p[pos + 1]                      # (4, Ci, Co)     bf16
        pos += 2

        hb = h.astype(jnp.bfloat16)             # bf16 MXU operands, f32 accumulation
        y = None
        for k in range(KERNEL):
            # stride-2, zero-padded row gather for tap k (runs on the MXU)
            tap = jnp.dot(s_ref[k], hb, preferred_element_type=jnp.float32)
            # tap-k contribution of the conv
            c_k = jnp.dot(tap.astype(jnp.bfloat16), w_ref[k],
                          preferred_element_type=jnp.float32)
            y = c_k if y is None else y + c_k   # (N*Lo, Co) f32

        if layer < NUM_BN:
            g_ref = p[pos]
            b_ref = p[pos + 1]
            pos += 2
            # conv bias omitted: it cancels exactly in the mean subtraction below.
            mean = jnp.mean(y, axis=0, keepdims=True)           # (1, Co)
            c = y - mean                                        # single centered temp
            var = jnp.mean(c * c, axis=0, keepdims=True)        # biased var (PyTorch)
            yn = c * jax.lax.rsqrt(var + EPS)
            yn = g_ref[...] * yn + b_ref[...]
            h = jnp.where(yn > 0, yn, NEG_SLOPE * yn)           # LeakyReLU(0.2)
        else:
            bias_ref = p[pos]
            pos += 1
            o_ref[...] = jax.nn.sigmoid(y + bias_ref[...])


# ----------------------------- host-side helpers ----------------------------

def _full_spec(shape):
    # full-array block, single grid point
    return pl.BlockSpec(shape, lambda i: (0,) * len(shape))


def _tap_selection_matrices(n, li):
    """(4, N*Lo, N*Li) 0/1 matrices: tap k of output (b, i) gathers input row 2i+k-1.

    Rows falling outside [0, Li) stay all-zero, which implements the conv zero padding.
    Block-diagonal over the batch so shifts never cross batch boundaries.
    """
    lo = li // STRIDE
    s = np.zeros((KERNEL, n * lo, n * li), np.float32)
    for k in range(KERNEL):
        for b in range(n):
            for i in range(lo):
                src = STRIDE * i + k - PAD
                if 0 <= src < li:
                    s[k, b * lo + i, b * li + src] = 1.0
    return s


def discriminator_forward(x, params):
    """params: 5x (w, b, gamma, beta) then (w, b); x: (N, Cin, L) NCL like PyTorch."""
    assert len(params) == NUM_LAYERS
    n, cin, length = x.shape

    # channel-last once at the input boundary
    inputs = [jnp.transpose(x, (0, 2, 1)).reshape(n * length, cin).astype(jnp.float32)]
    flops = 0
    transcendentals = 0

    li, ci = length, cin
    for idx, layer_params in enumerate(params):
        w = layer_params[0]                              # (Co, Ci, K)
        co = w.shape[0]
        lo = li // STRIDE
        m_in, m_out = n * li, n * lo

        inputs.append(jnp.asarray(_tap_selection_matrices(n, li), dtype=jnp.bfloat16))
        inputs.append(jnp.transpose(w, (2, 1, 0)).astype(jnp.bfloat16))  # (K, Ci, Co)
        flops += 2 * KERNEL * m_out * (m_in * ci + ci * co)

        if idx < NUM_BN:
            gamma, beta = layer_params[2], layer_params[3]
            inputs.append(gamma.reshape(1, co).astype(jnp.float32))
            inputs.append(beta.reshape(1, co).astype(jnp.float32))
            transcendentals += co                        # rsqrt per channel
        else:
            bias = layer_params[1]
            inputs.append(bias.reshape(1, co).astype(jnp.float32))
            transcendentals += m_out                     # sigmoid
        li, ci = lo, co

    out_shape_2d = (n * li, 1)                           # li == length // 2**6 here
    bytes_accessed = int(sum(int(np.prod(a.shape)) * a.dtype.itemsize for a in inputs)
                         + int(np.prod(out_shape_2d)) * 4)

    out = pl.pallas_call(
        _discriminator_kernel,
        out_shape=jax.ShapeDtypeStruct(out_shape_2d, jnp.float32),
        grid=(1,),
        in_specs=[_full_spec(tuple(a.shape)) for a in inputs],
        out_specs=_full_spec(out_shape_2d),
        compiler_params=pltpu.CompilerParams(
            dimension_semantics=("arbitrary",),
            vmem_limit_bytes=16 * 1024 * 1024,
        ),
        cost_estimate=pl.CostEstimate(
            flops=int(flops),
            transcendentals=int(transcendentals),
            bytes_accessed=bytes_accessed,
        ),
    )(*inputs)

    # back to PyTorch's NCL layout: (N, 1, L // 64)
    return out.reshape(n, li, 1).transpose(0, 2, 1)


# ----------------------------- plain-JAX reference --------------------------

def _reference_forward(x, params):
    h = x
    for idx, layer_params in enumerate(params):
        w, b = layer_params[0], layer_params[1]
        y = jax.lax.conv_general_dilated(
            h, w, window_strides=(STRIDE,), padding=[(PAD, PAD)],
            dimension_numbers=("NCH", "OIH", "NCH"))
        y = y + b[None, :, None]
        if idx < NUM_BN:
            gamma, beta = layer_params[2], layer_params[3]
            mean = jnp.mean(y, axis=(0, 2), keepdims=True)
            var = jnp.mean((y - mean) ** 2, axis=(0, 2), keepdims=True)
            yn = (y - mean) * jax.lax.rsqrt(var + EPS)
            yn = gamma[None, :, None] * yn + beta[None, :, None]
            h = jnp.where(yn > 0, yn, NEG_SLOPE * yn)
        else:
            h = jax.nn.sigmoid(y)
    return h


# ----------------------------- main ------------------------------------------

if __name__ == "__main__":
    key = jax.random.PRNGKey(0)
    N, Cin, L = 2, 11, 128                      # small but divisible by 2**6
    channels = [11, 256, 128, 64, 32, 32, 1]

    params = []
    for i in range(6):
        ci, co = channels[i], channels[i + 1]
        key, k1, k2, k3, k4 = jax.random.split(key, 5)
        w = 0.05 * jax.random.normal(k1, (co, ci, KERNEL), jnp.float32)
        b = 0.05 * jax.random.normal(k2, (co,), jnp.float32)
        if i < 5:
            gamma = 1.0 + 0.1 * jax.random.normal(k3, (co,), jnp.float32)
            beta = 0.1 * jax.random.normal(k4, (co,), jnp.float32)
            params.append((w, b, gamma, beta))
        else:
            params.append((w, b))

    key, kx = jax.random.split(key)
    x = jax.random.normal(kx, (N, Cin, L), jnp.float32)

    fwd = jax.jit(discriminator_forward)
    y = jax.block_until_ready(fwd(x, params))

    assert y.shape == (N, 1, L // 64), y.shape
    assert jnp.all(jnp.isfinite(y))
    assert jnp.all((y >= 0.0) & (y <= 1.0))     # sigmoid output

    # cross-check against a plain-JAX reference (loose tol: bf16 MXU operands)
    y_ref = _reference_forward(x, params)
    assert float(jnp.max(jnp.abs(y - y_ref))) < 0.1

    print("KERNEL_OK")
</pallas_src>

<mosaic_0001>
module attributes {stable_mosaic.version = 11 : i64} {
  func.func @_discriminator_kernel(%arg0: i32, %arg1: memref<256x11xf32, #tpu.memory_space<vmem>>, %arg2: memref<4x128x256xbf16, #tpu.memory_space<vmem>>, %arg3: memref<4x11x256xbf16, #tpu.memory_space<vmem>>, %arg4: memref<1x256xf32, #tpu.memory_space<vmem>>, %arg5: memref<1x256xf32, #tpu.memory_space<vmem>>, %arg6: memref<4x64x128xbf16, #tpu.memory_space<vmem>>, %arg7: memref<4x256x128xbf16, #tpu.memory_space<vmem>>, %arg8: memref<1x128xf32, #tpu.memory_space<vmem>>, %arg9: memref<1x128xf32, #tpu.memory_space<vmem>>, %arg10: memref<4x32x64xbf16, #tpu.memory_space<vmem>>, %arg11: memref<4x128x64xbf16, #tpu.memory_space<vmem>>, %arg12: memref<1x64xf32, #tpu.memory_space<vmem>>, %arg13: memref<1x64xf32, #tpu.memory_space<vmem>>, %arg14: memref<4x16x32xbf16, #tpu.memory_space<vmem>>, %arg15: memref<4x64x32xbf16, #tpu.memory_space<vmem>>, %arg16: memref<1x32xf32, #tpu.memory_space<vmem>>, %arg17: memref<1x32xf32, #tpu.memory_space<vmem>>, %arg18: memref<4x8x16xbf16, #tpu.memory_space<vmem>>, %arg19: memref<4x32x32xbf16, #tpu.memory_space<vmem>>, %arg20: memref<1x32xf32, #tpu.memory_space<vmem>>, %arg21: memref<1x32xf32, #tpu.memory_space<vmem>>, %arg22: memref<4x4x8xbf16, #tpu.memory_space<vmem>>, %arg23: memref<4x32x1xbf16, #tpu.memory_space<vmem>>, %arg24: memref<1x1xf32, #tpu.memory_space<vmem>>, %arg25: memref<4x1xf32, #tpu.memory_space<vmem>>) attributes {dimension_semantics = [#tpu.dimension_semantics<arbitrary>], iteration_bounds = array<i64: 1>, scalar_prefetch = 0 : i64, scratch_operands = 0 : i64, tpu.core_type = #tpu.core_type<tc>, window_params = [{pipeline_mode = #tpu.pipeline_mode<synchronous>, transform_indices = @transform_0, window_bounds = array<i64: 256, 11>}, {pipeline_mode = #tpu.pipeline_mode<synchronous>, transform_indices = @transform_1, window_bounds = array<i64: 4, 128, 256>}, {pipeline_mode = #tpu.pipeline_mode<synchronous>, transform_indices = @transform_2, window_bounds = array<i64: 4, 11, 256>}, {pipeline_mode = #tpu.pipeline_mode<synchronous>, transform_indices = @transform_3, window_bounds = array<i64: 1, 256>}, {pipeline_mode = #tpu.pipeline_mode<synchronous>, transform_indices = @transform_4, window_bounds = array<i64: 1, 256>}, {pipeline_mode = #tpu.pipeline_mode<synchronous>, transform_indices = @transform_5, window_bounds = array<i64: 4, 64, 128>}, {pipeline_mode = #tpu.pipeline_mode<synchronous>, transform_indices = @transform_6, window_bounds = array<i64: 4, 256, 128>}, {pipeline_mode = #tpu.pipeline_mode<synchronous>, transform_indices = @transform_7, window_bounds = array<i64: 1, 128>}, {pipeline_mode = #tpu.pipeline_mode<synchronous>, transform_indices = @transform_8, window_bounds = array<i64: 1, 128>}, {pipeline_mode = #tpu.pipeline_mode<synchronous>, transform_indices = @transform_9, window_bounds = array<i64: 4, 32, 64>}, {pipeline_mode = #tpu.pipeline_mode<synchronous>, transform_indices = @transform_10, window_bounds = array<i64: 4, 128, 64>}, {pipeline_mode = #tpu.pipeline_mode<synchronous>, transform_indices = @transform_11, window_bounds = array<i64: 1, 64>}, {pipeline_mode = #tpu.pipeline_mode<synchronous>, transform_indices = @transform_12, window_bounds = array<i64: 1, 64>}, {pipeline_mode = #tpu.pipeline_mode<synchronous>, transform_indices = @transform_13, window_bounds = array<i64: 4, 16, 32>}, {pipeline_mode = #tpu.pipeline_mode<synchronous>, transform_indices = @transform_14, window_bounds = array<i64: 4, 64, 32>}, {pipeline_mode = #tpu.pipeline_mode<synchronous>, transform_indices = @transform_15, window_bounds = array<i64: 1, 32>}, {pipeline_mode = #tpu.pipeline_mode<synchronous>, transform_indices = @transform_16, window_bounds = array<i64: 1, 32>}, {pipeline_mode = #tpu.pipeline_mode<synchronous>, transform_indices = @transform_17, window_bounds = array<i64: 4, 8, 16>}, {pipeline_mode = #tpu.pipeline_mode<synchronous>, transform_indices = @transform_18, window_bounds = array<i64: 4, 32, 32>}, {pipeline_mode = #tpu.pipeline_mode<synchronous>, transform_indices = @transform_19, window_bounds = array<i64: 1, 32>}, {pipeline_mode = #tpu.pipeline_mode<synchronous>, transform_indices = @transform_20, window_bounds = array<i64: 1, 32>}, {pipeline_mode = #tpu.pipeline_mode<synchronous>, transform_indices = @transform_21, window_bounds = array<i64: 4, 4, 8>}, {pipeline_mode = #tpu.pipeline_mode<synchronous>, transform_indices = @transform_22, window_bounds = array<i64: 4, 32, 1>}, {pipeline_mode = #tpu.pipeline_mode<synchronous>, transform_indices = @transform_23, window_bounds = array<i64: 1, 1>}, {pipeline_mode = #tpu.pipeline_mode<synchronous>, transform_indices = @transform_24, window_bounds = array<i64: 4, 1>}]} {
    %c0 = arith.constant 0 : index
    %c0_0 = arith.constant 0 : index
    %0 = vector.load %arg1[%c0, %c0_0] : memref<256x11xf32, #tpu.memory_space<vmem>>, vector<256x11xf32>
    %1 = arith.truncf %0 : vector<256x11xf32> to vector<256x11xbf16>
    %c0_1 = arith.constant 0 : index
    %c0_2 = arith.constant 0 : index
    %c0_3 = arith.constant 0 : index
    %2 = vector.load %arg2[%c0_1, %c0_2, %c0_3] : memref<4x128x256xbf16, #tpu.memory_space<vmem>>, vector<1x128x256xbf16>
    %3 = vector.shape_cast %2 : vector<1x128x256xbf16> to vector<128x256xbf16>
    %cst = arith.constant dense<0.000000e+00> : vector<128x11xf32>
    %4 = tpu.matmul %3, %1, %cst {dimension_numbers = #tpu.dot_dimension_numbers<[1], [0], [0], [1], [0, 0, 1, 1], [], []>} : vector<128x256xbf16>, vector<256x11xbf16>, vector<128x11xf32> -> vector<128x11xf32>
    %5 = arith.truncf %4 : vector<128x11xf32> to vector<128x11xbf16>
    %c0_4 = arith.constant 0 : index
    %c0_5 = arith.constant 0 : index
    %c0_6 = arith.constant 0 : index
    %6 = vector.load %arg3[%c0_4, %c0_5, %c0_6] : memref<4x11x256xbf16, #tpu.memory_space<vmem>>, vector<1x11x256xbf16>
    %7 = vector.shape_cast %6 : vector<1x11x256xbf16> to vector<11x256xbf16>
    %cst_7 = arith.constant dense<0.000000e+00> : vector<128x256xf32>
    %8 = tpu.matmul %5, %7, %cst_7 {dimension_numbers = #tpu.dot_dimension_numbers<[1], [0], [0], [1], [0, 0, 1, 1], [], []>} : vector<128x11xbf16>, vector<11x256xbf16>, vector<128x256xf32> -> vector<128x256xf32>
    %c1 = arith.constant 1 : index
    %c0_8 = arith.constant 0 : index
    %c0_9 = arith.constant 0 : index
    %9 = vector.load %arg2[%c1, %c0_8, %c0_9] : memref<4x128x256xbf16, #tpu.memory_space<vmem>>, vector<1x128x256xbf16>
    %10 = vector.shape_cast %9 : vector<1x128x256xbf16> to vector<128x256xbf16>
    %cst_10 = arith.constant dense<0.000000e+00> : vector<128x11xf32>
    %11 = tpu.matmul %10, %1, %cst_10 {dimension_numbers = #tpu.dot_dimension_numbers<[1], [0], [0], [1], [0, 0, 1, 1], [], []>} : vector<128x256xbf16>, vector<256x11xbf16>, vector<128x11xf32> -> vector<128x11xf32>
    %12 = arith.truncf %11 : vector<128x11xf32> to vector<128x11xbf16>
    %c1_11 = arith.constant 1 : index
    %c0_12 = arith.constant 0 : index
    %c0_13 = arith.constant 0 : index
    %13 = vector.load %arg3[%c1_11, %c0_12, %c0_13] : memref<4x11x256xbf16, #tpu.memory_space<vmem>>, vector<1x11x256xbf16>
    %14 = vector.shape_cast %13 : vector<1x11x256xbf16> to vector<11x256xbf16>
    %cst_14 = arith.constant dense<0.000000e+00> : vector<128x256xf32>
    %15 = tpu.matmul %12, %14, %cst_14 {dimension_numbers = #tpu.dot_dimension_numbers<[1], [0], [0], [1], [0, 0, 1, 1], [], []>} : vector<128x11xbf16>, vector<11x256xbf16>, vector<128x256xf32> -> vector<128x256xf32>
    %16 = arith.addf %8, %15 : vector<128x256xf32>
    %c2 = arith.constant 2 : index
    %c0_15 = arith.constant 0 : index
    %c0_16 = arith.constant 0 : index
    %17 = vector.load %arg2[%c2, %c0_15, %c0_16] : memref<4x128x256xbf16, #tpu.memory_space<vmem>>, vector<1x128x256xbf16>
    %18 = vector.shape_cast %17 : vector<1x128x256xbf16> to vector<128x256xbf16>
    %cst_17 = arith.constant dense<0.000000e+00> : vector<128x11xf32>
    %19 = tpu.matmul %18, %1, %cst_17 {dimension_numbers = #tpu.dot_dimension_numbers<[1], [0], [0], [1], [0, 0, 1, 1], [], []>} : vector<128x256xbf16>, vector<256x11xbf16>, vector<128x11xf32> -> vector<128x11xf32>
    %20 = arith.truncf %19 : vector<128x11xf32> to vector<128x11xbf16>
    %c2_18 = arith.constant 2 : index
    %c0_19 = arith.constant 0 : index
    %c0_20 = arith.constant 0 : index
    %21 = vector.load %arg3[%c2_18, %c0_19, %c0_20] : memref<4x11x256xbf16, #tpu.memory_space<vmem>>, vector<1x11x256xbf16>
    %22 = vector.shape_cast %21 : vector<1x11x256xbf16> to vector<11x256xbf16>
    %cst_21 = arith.constant dense<0.000000e+00> : vector<128x256xf32>
    %23 = tpu.matmul %20, %22, %cst_21 {dimension_numbers = #tpu.dot_dimension_numbers<[1], [0], [0], [1], [0, 0, 1, 1], [], []>} : vector<128x11xbf16>, vector<11x256xbf16>, vector<128x256xf32> -> vector<128x256xf32>
    %24 = arith.addf %16, %23 : vector<128x256xf32>
    %c3 = arith.constant 3 : index
    %c0_22 = arith.constant 0 : index
    %c0_23 = arith.constant 0 : index
    %25 = vector.load %arg2[%c3, %c0_22, %c0_23] : memref<4x128x256xbf16, #tpu.memory_space<vmem>>, vector<1x128x256xbf16>
    %26 = vector.shape_cast %25 : vector<1x128x256xbf16> to vector<128x256xbf16>
    %cst_24 = arith.constant dense<0.000000e+00> : vector<128x11xf32>
    %27 = tpu.matmul %26, %1, %cst_24 {dimension_numbers = #tpu.dot_dimension_numbers<[1], [0], [0], [1], [0, 0, 1, 1], [], []>} : vector<128x256xbf16>, vector<256x11xbf16>, vector<128x11xf32> -> vector<128x11xf32>
    %28 = arith.truncf %27 : vector<128x11xf32> to vector<128x11xbf16>
    %c3_25 = arith.constant 3 : index
    %c0_26 = arith.constant 0 : index
    %c0_27 = arith.constant 0 : index
    %29 = vector.load %arg3[%c3_25, %c0_26, %c0_27] : memref<4x11x256xbf16, #tpu.memory_space<vmem>>, vector<1x11x256xbf16>
    %30 = vector.shape_cast %29 : vector<1x11x256xbf16> to vector<11x256xbf16>
    %cst_28 = arith.constant dense<0.000000e+00> : vector<128x256xf32>
    %31 = tpu.matmul %28, %30, %cst_28 {dimension_numbers = #tpu.dot_dimension_numbers<[1], [0], [0], [1], [0, 0, 1, 1], [], []>} : vector<128x11xbf16>, vector<11x256xbf16>, vector<128x256xf32> -> vector<128x256xf32>
    %32 = arith.addf %24, %31 : vector<128x256xf32>
    %cst_29 = arith.constant dense<0.000000e+00> : vector<256xf32>
    %33 = vector.multi_reduction <add>, %32, %cst_29 [0] : vector<128x256xf32> to vector<256xf32>
    %34 = vector.shape_cast %33 : vector<256xf32> to vector<1x256xf32>
    %cst_30 = arith.constant 1.280000e+02 : f32
    %35 = vector.broadcast %cst_30 : f32 to vector<1x256xf32>
    %36 = arith.divf %34, %35 : vector<1x256xf32>
    %37 = vector.broadcast %36 : vector<1x256xf32> to vector<128x256xf32>
    %38 = arith.subf %32, %37 : vector<128x256xf32>
    %39 = arith.mulf %38, %38 : vector<128x256xf32>
    %cst_31 = arith.constant dense<0.000000e+00> : vector<256xf32>
    %40 = vector.multi_reduction <add>, %39, %cst_31 [0] : vector<128x256xf32> to vector<256xf32>
    %41 = vector.shape_cast %40 : vector<256xf32> to vector<1x256xf32>
    %cst_32 = arith.constant 1.280000e+02 : f32
    %42 = vector.broadcast %cst_32 : f32 to vector<1x256xf32>
    %43 = arith.divf %41, %42 : vector<1x256xf32>
    %cst_33 = arith.constant 9.99999974E-6 : f32
    %44 = vector.broadcast %cst_33 : f32 to vector<1x256xf32>
    %45 = arith.addf %43, %44 : vector<1x256xf32>
    %46 = math.rsqrt %45 : vector<1x256xf32>
    %47 = vector.broadcast %46 : vector<1x256xf32> to vector<128x256xf32>
    %48 = arith.mulf %38, %47 : vector<128x256xf32>
    %c0_34 = arith.constant 0 : index
    %c0_35 = arith.constant 0 : index
    %49 = vector.load %arg4[%c0_34, %c0_35] : memref<1x256xf32, #tpu.memory_space<vmem>>, vector<1x256xf32>
    %50 = vector.broadcast %49 : vector<1x256xf32> to vector<128x256xf32>
    %51 = arith.mulf %50, %48 : vector<128x256xf32>
    %c0_36 = arith.constant 0 : index
    %c0_37 = arith.constant 0 : index
    %52 = vector.load %arg5[%c0_36, %c0_37] : memref<1x256xf32, #tpu.memory_space<vmem>>, vector<1x256xf32>
    %53 = vector.broadcast %52 : vector<1x256xf32> to vector<128x256xf32>
    %54 = arith.addf %51, %53 : vector<128x256xf32>
    %cst_38 = arith.constant 0.000000e+00 : f32
    %55 = vector.broadcast %cst_38 : f32 to vector<128x256xf32>
    %56 = arith.cmpf ogt, %54, %55 : vector<128x256xf32>
    %cst_39 = arith.constant 2.000000e-01 : f32
    %57 = vector.broadcast %cst_39 : f32 to vector<128x256xf32>
    %58 = arith.mulf %57, %54 : vector<128x256xf32>
    %59 = arith.select %56, %54, %58 : vector<128x256xi1>, vector<128x256xf32>
    %60 = arith.truncf %59 : vector<128x256xf32> to vector<128x256xbf16>
    %c0_40 = arith.constant 0 : index
    %c0_41 = arith.constant 0 : index
    %c0_42 = arith.constant 0 : index
    %61 = vector.load %arg6[%c0_40, %c0_41, %c0_42] : memref<4x64x128xbf16, #tpu.memory_space<vmem>>, vector<1x64x128xbf16>
    %62 = vector.shape_cast %61 : vector<1x64x128xbf16> to vector<64x128xbf16>
    %cst_43 = arith.constant dense<0.000000e+00> : vector<64x256xf32>
    %63 = tpu.matmul %62, %60, %cst_43 {dimension_numbers = #tpu.dot_dimension_numbers<[1], [0], [0], [1], [0, 0, 1, 1], [], []>} : vector<64x128xbf16>, vector<128x256xbf16>, vector<64x256xf32> -> vector<64x256xf32>
    %64 = arith.truncf %63 : vector<64x256xf32> to vector<64x256xbf16>
    %c0_44 = arith.constant 0 : index
    %c0_45 = arith.constant 0 : index
    %c0_46 = arith.constant 0 : index
    %65 = vector.load %arg7[%c0_44, %c0_45, %c0_46] : memref<4x256x128xbf16, #tpu.memory_space<vmem>>, vector<1x256x128xbf16>
    %66 = vector.shape_cast %65 : vector<1x256x128xbf16> to vector<256x128xbf16>
    %cst_47 = arith.constant dense<0.000000e+00> : vector<64x128xf32>
    %67 = tpu.matmul %64, %66, %cst_47 {dimension_numbers = #tpu.dot_dimension_numbers<[1], [0], [0], [1], [0, 0, 1, 1], [], []>} : vector<64x256xbf16>, vector<256x128xbf16>, vector<64x128xf32> -> vector<64x128xf32>
    %c1_48 = arith.constant 1 : index
    %c0_49 = arith.constant 0 : index
    %c0_50 = arith.constant 0 : index
    %68 = vector.load %arg6[%c1_48, %c0_49, %c0_50] : memref<4x64x128xbf16, #tpu.memory_space<vmem>>, vector<1x64x128xbf16>
    %69 = vector.shape_cast %68 : vector<1x64x128xbf16> to vector<64x128xbf16>
    %cst_51 = arith.constant dense<0.000000e+00> : vector<64x256xf32>
    %70 = tpu.matmul %69, %60, %cst_51 {dimension_numbers = #tpu.dot_dimension_numbers<[1], [0], [0], [1], [0, 0, 1, 1], [], []>} : vector<64x128xbf16>, vector<128x256xbf16>, vector<64x256xf32> -> vector<64x256xf32>
    %71 = arith.truncf %70 : vector<64x256xf32> to vector<64x256xbf16>
    %c1_52 = arith.constant 1 : index
    %c0_53 = arith.constant 0 : index
    %c0_54 = arith.constant 0 : index
    %72 = vector.load %arg7[%c1_52, %c0_53, %c0_54] : memref<4x256x128xbf16, #tpu.memory_space<vmem>>, vector<1x256x128xbf16>
    %73 = vector.shape_cast %72 : vector<1x256x128xbf16> to vector<256x128xbf16>
    %cst_55 = arith.constant dense<0.000000e+00> : vector<64x128xf32>
    %74 = tpu.matmul %71, %73, %cst_55 {dimension_numbers = #tpu.dot_dimension_numbers<[1], [0], [0], [1], [0, 0, 1, 1], [], []>} : vector<64x256xbf16>, vector<256x128xbf16>, vector<64x128xf32> -> vector<64x128xf32>
    %75 = arith.addf %67, %74 : vector<64x128xf32>
    %c2_56 = arith.constant 2 : index
    %c0_57 = arith.constant 0 : index
    %c0_58 = arith.constant 0 : index
    %76 = vector.load %arg6[%c2_56, %c0_57, %c0_58] : memref<4x64x128xbf16, #tpu.memory_space<vmem>>, vector<1x64x128xbf16>
    %77 = vector.shape_cast %76 : vector<1x64x128xbf16> to vector<64x128xbf16>
    %cst_59 = arith.constant dense<0.000000e+00> : vector<64x256xf32>
    %78 = tpu.matmul %77, %60, %cst_59 {dimension_numbers = #tpu.dot_dimension_numbers<[1], [0], [0], [1], [0, 0, 1, 1], [], []>} : vector<64x128xbf16>, vector<128x256xbf16>, vector<64x256xf32> -> vector<64x256xf32>
    %79 = arith.truncf %78 : vector<64x256xf32> to vector<64x256xbf16>
    %c2_60 = arith.constant 2 : index
    %c0_61 = arith.constant 0 : index
    %c0_62 = arith.constant 0 : index
    %80 = vector.load %arg7[%c2_60, %c0_61, %c0_62] : memref<4x256x128xbf16, #tpu.memory_space<vmem>>, vector<1x256x128xbf16>
    %81 = vector.shape_cast %80 : vector<1x256x128xbf16> to vector<256x128xbf16>
    %cst_63 = arith.constant dense<0.000000e+00> : vector<64x128xf32>
    %82 = tpu.matmul %79, %81, %cst_63 {dimension_numbers = #tpu.dot_dimension_numbers<[1], [0], [0], [1], [0, 0, 1, 1], [], []>} : vector<64x256xbf16>, vector<256x128xbf16>, vector<64x128xf32> -> vector<64x128xf32>
    %83 = arith.addf %75, %82 : vector<64x128xf32>
    %c3_64 = arith.constant 3 : index
    %c0_65 = arith.constant 0 : index
    %c0_66 = arith.constant 0 : index
    %84 = vector.load %arg6[%c3_64, %c0_65, %c0_66] : memref<4x64x128xbf16, #tpu.memory_space<vmem>>, vector<1x64x128xbf16>
    %85 = vector.shape_cast %84 : vector<1x64x128xbf16> to vector<64x128xbf16>
    %cst_67 = arith.constant dense<0.000000e+00> : vector<64x256xf32>
    %86 = tpu.matmul %85, %60, %cst_67 {dimension_numbers = #tpu.dot_dimension_numbers<[1], [0], [0], [1], [0, 0, 1, 1], [], []>} : vector<64x128xbf16>, vector<128x256xbf16>, vector<64x256xf32> -> vector<64x256xf32>
    %87 = arith.truncf %86 : vector<64x256xf32> to vector<64x256xbf16>
    %c3_68 = arith.constant 3 : index
    %c0_69 = arith.constant 0 : index
    %c0_70 = arith.constant 0 : index
    %88 = vector.load %arg7[%c3_68, %c0_69, %c0_70] : memref<4x256x128xbf16, #tpu.memory_space<vmem>>, vector<1x256x128xbf16>
    %89 = vector.shape_cast %88 : vector<1x256x128xbf16> to vector<256x128xbf16>
    %cst_71 = arith.constant dense<0.000000e+00> : vector<64x128xf32>
    %90 = tpu.matmul %87, %89, %cst_71 {dimension_numbers = #tpu.dot_dimension_numbers<[1], [0], [0], [1], [0, 0, 1, 1], [], []>} : vector<64x256xbf16>, vector<256x128xbf16>, vector<64x128xf32> -> vector<64x128xf32>
    %91 = arith.addf %83, %90 : vector<64x128xf32>
    %cst_72 = arith.constant dense<0.000000e+00> : vector<128xf32>
    %92 = vector.multi_reduction <add>, %91, %cst_72 [0] : vector<64x128xf32> to vector<128xf32>
    %93 = vector.shape_cast %92 : vector<128xf32> to vector<1x128xf32>
    %cst_73 = arith.constant 6.400000e+01 : f32
    %94 = vector.broadcast %cst_73 : f32 to vector<1x128xf32>
    %95 = arith.divf %93, %94 : vector<1x128xf32>
    %96 = vector.broadcast %95 : vector<1x128xf32> to vector<64x128xf32>
    %97 = arith.subf %91, %96 : vector<64x128xf32>
    %98 = arith.mulf %97, %97 : vector<64x128xf32>
    %cst_74 = arith.constant dense<0.000000e+00> : vector<128xf32>
    %99 = vector.multi_reduction <add>, %98, %cst_74 [0] : vector<64x128xf32> to vector<128xf32>
    %100 = vector.shape_cast %99 : vector<128xf32> to vector<1x128xf32>
    %cst_75 = arith.constant 6.400000e+01 : f32
    %101 = vector.broadcast %cst_75 : f32 to vector<1x128xf32>
    %102 = arith.divf %100, %101 : vector<1x128xf32>
    %cst_76 = arith.constant 9.99999974E-6 : f32
    %103 = vector.broadcast %cst_76 : f32 to vector<1x128xf32>
    %104 = arith.addf %102, %103 : vector<1x128xf32>
    %105 = math.rsqrt %104 : vector<1x128xf32>
    %106 = vector.broadcast %105 : vector<1x128xf32> to vector<64x128xf32>
    %107 = arith.mulf %97, %106 : vector<64x128xf32>
    %c0_77 = arith.constant 0 : index
    %c0_78 = arith.constant 0 : index
    %108 = vector.load %arg8[%c0_77, %c0_78] : memref<1x128xf32, #tpu.memory_space<vmem>>, vector<1x128xf32>
    %109 = vector.broadcast %108 : vector<1x128xf32> to vector<64x128xf32>
    %110 = arith.mulf %109, %107 : vector<64x128xf32>
    %c0_79 = arith.constant 0 : index
    %c0_80 = arith.constant 0 : index
    %111 = vector.load %arg9[%c0_79, %c0_80] : memref<1x128xf32, #tpu.memory_space<vmem>>, vector<1x128xf32>
    %112 = vector.broadcast %111 : vector<1x128xf32> to vector<64x128xf32>
    %113 = arith.addf %110, %112 : vector<64x128xf32>
    %cst_81 = arith.constant 0.000000e+00 : f32
    %114 = vector.broadcast %cst_81 : f32 to vector<64x128xf32>
    %115 = arith.cmpf ogt, %113, %114 : vector<64x128xf32>
    %cst_82 = arith.constant 2.000000e-01 : f32
    %116 = vector.broadcast %cst_82 : f32 to vector<64x128xf32>
    %117 = arith.mulf %116, %113 : vector<64x128xf32>
    %118 = arith.select %115, %113, %117 : vector<64x128xi1>, vector<64x128xf32>
    %119 = arith.truncf %118 : vector<64x128xf32> to vector<64x128xbf16>
    %c0_83 = arith.constant 0 : index
    %c0_84 = arith.constant 0 : index
    %c0_85 = arith.constant 0 : index
    %120 = vector.load %arg10[%c0_83, %c0_84, %c0_85] : memref<4x32x64xbf16, #tpu.memory_space<vmem>>, vector<1x32x64xbf16>
    %121 = vector.shape_cast %120 : vector<1x32x64xbf16> to vector<32x64xbf16>
    %cst_86 = arith.constant dense<0.000000e+00> : vector<32x128xf32>
    %122 = tpu.matmul %121, %119, %cst_86 {dimension_numbers = #tpu.dot_dimension_numbers<[1], [0], [0], [1], [0, 0, 1, 1], [], []>} : vector<32x64xbf16>, vector<64x128xbf16>, vector<32x128xf32> -> vector<32x128xf32>
    %123 = arith.truncf %122 : vector<32x128xf32> to vector<32x128xbf16>
    %c0_87 = arith.constant 0 : index
    %c0_88 = arith.constant 0 : index
    %c0_89 = arith.constant 0 : index
    %124 = vector.load %arg11[%c0_87, %c0_88, %c0_89] : memref<4x128x64xbf16, #tpu.memory_space<vmem>>, vector<1x128x64xbf16>
    %125 = vector.shape_cast %124 : vector<1x128x64xbf16> to vector<128x64xbf16>
    %cst_90 = arith.constant dense<0.000000e+00> : vector<32x64xf32>
    %126 = tpu.matmul %123, %125, %cst_90 {dimension_numbers = #tpu.dot_dimension_numbers<[1], [0], [0], [1], [0, 0, 1, 1], [], []>} : vector<32x128xbf16>, vector<128x64xbf16>, vector<32x64xf32> -> vector<32x64xf32>
    %c1_91 = arith.constant 1 : index
    %c0_92 = arith.constant 0 : index
    %c0_93 = arith.constant 0 : index
    %127 = vector.load %arg10[%c1_91, %c0_92, %c0_93] : memref<4x32x64xbf16, #tpu.memory_space<vmem>>, vector<1x32x64xbf16>
    %128 = vector.shape_cast %127 : vector<1x32x64xbf16> to vector<32x64xbf16>
    %cst_94 = arith.constant dense<0.000000e+00> : vector<32x128xf32>
    %129 = tpu.matmul %128, %119, %cst_94 {dimension_numbers = #tpu.dot_dimension_numbers<[1], [0], [0], [1], [0, 0, 1, 1], [], []>} : vector<32x64xbf16>, vector<64x128xbf16>, vector<32x128xf32> -> vector<32x128xf32>
    %130 = arith.truncf %129 : vector<32x128xf32> to vector<32x128xbf16>
    %c1_95 = arith.constant 1 : index
    %c0_96 = arith.constant 0 : index
    %c0_97 = arith.constant 0 : index
    %131 = vector.load %arg11[%c1_95, %c0_96, %c0_97] : memref<4x128x64xbf16, #tpu.memory_space<vmem>>, vector<1x128x64xbf16>
    %132 = vector.shape_cast %131 : vector<1x128x64xbf16> to vector<128x64xbf16>
    %cst_98 = arith.constant dense<0.000000e+00> : vector<32x64xf32>
    %133 = tpu.matmul %130, %132, %cst_98 {dimension_numbers = #tpu.dot_dimension_numbers<[1], [0], [0], [1], [0, 0, 1, 1], [], []>} : vector<32x128xbf16>, vector<128x64xbf16>, vector<32x64xf32> -> vector<32x64xf32>
    %134 = arith.addf %126, %133 : vector<32x64xf32>
    %c2_99 = arith.constant 2 : index
    %c0_100 = arith.constant 0 : index
    %c0_101 = arith.constant 0 : index
    %135 = vector.load %arg10[%c2_99, %c0_100, %c0_101] : memref<4x32x64xbf16, #tpu.memory_space<vmem>>, vector<1x32x64xbf16>
    %136 = vector.shape_cast %135 : vector<1x32x64xbf16> to vector<32x64xbf16>
    %cst_102 = arith.constant dense<0.000000e+00> : vector<32x128xf32>
    %137 = tpu.matmul %136, %119, %cst_102 {dimension_numbers = #tpu.dot_dimension_numbers<[1], [0], [0], [1], [0, 0, 1, 1], [], []>} : vector<32x64xbf16>, vector<64x128xbf16>, vector<32x128xf32> -> vector<32x128xf32>
    %138 = arith.truncf %137 : vector<32x128xf32> to vector<32x128xbf16>
    %c2_103 = arith.constant 2 : index
    %c0_104 = arith.constant 0 : index
    %c0_105 = arith.constant 0 : index
    %139 = vector.load %arg11[%c2_103, %c0_104, %c0_105] : memref<4x128x64xbf16, #tpu.memory_space<vmem>>, vector<1x128x64xbf16>
    %140 = vector.shape_cast %139 : vector<1x128x64xbf16> to vector<128x64xbf16>
    %cst_106 = arith.constant dense<0.000000e+00> : vector<32x64xf32>
    %141 = tpu.matmul %138, %140, %cst_106 {dimension_numbers = #tpu.dot_dimension_numbers<[1], [0], [0], [1], [0, 0, 1, 1], [], []>} : vector<32x128xbf16>, vector<128x64xbf16>, vector<32x64xf32> -> vector<32x64xf32>
    %142 = arith.addf %134, %141 : vector<32x64xf32>
    %c3_107 = arith.constant 3 : index
    %c0_108 = arith.constant 0 : index
    %c0_109 = arith.constant 0 : index
    %143 = vector.load %arg10[%c3_107, %c0_108, %c0_109] : memref<4x32x64xbf16, #tpu.memory_space<vmem>>, vector<1x32x64xbf16>
    %144 = vector.shape_cast %143 : vector<1x32x64xbf16> to vector<32x64xbf16>
    %cst_110 = arith.constant dense<0.000000e+00> : vector<32x128xf32>
    %145 = tpu.matmul %144, %119, %cst_110 {dimension_numbers = #tpu.dot_dimension_numbers<[1], [0], [0], [1], [0, 0, 1, 1], [], []>} : vector<32x64xbf16>, vector<64x128xbf16>, vector<32x128xf32> -> vector<32x128xf32>
    %146 = arith.truncf %145 : vector<32x128xf32> to vector<32x128xbf16>
    %c3_111 = arith.constant 3 : index
    %c0_112 = arith.constant 0 : index
    %c0_113 = arith.constant 0 : index
    %147 = vector.load %arg11[%c3_111, %c0_112, %c0_113] : memref<4x128x64xbf16, #tpu.memory_space<vmem>>, vector<1x128x64xbf16>
    %148 = vector.shape_cast %147 : vector<1x128x64xbf16> to vector<128x64xbf16>
    %cst_114 = arith.constant dense<0.000000e+00> : vector<32x64xf32>
    %149 = tpu.matmul %146, %148, %cst_114 {dimension_numbers = #tpu.dot_dimension_numbers<[1], [0], [0], [1], [0, 0, 1, 1], [], []>} : vector<32x128xbf16>, vector<128x64xbf16>, vector<32x64xf32> -> vector<32x64xf32>
    %150 = arith.addf %142, %149 : vector<32x64xf32>
    %cst_115 = arith.constant dense<0.000000e+00> : vector<64xf32>
    %151 = vector.multi_reduction <add>, %150, %cst_115 [0] : vector<32x64xf32> to vector<64xf32>
    %152 = vector.shape_cast %151 : vector<64xf32> to vector<1x64xf32>
    %cst_116 = arith.constant 3.200000e+01 : f32
    %153 = vector.broadcast %cst_116 : f32 to vector<1x64xf32>
    %154 = arith.divf %152, %153 : vector<1x64xf32>
    %155 = vector.broadcast %154 : vector<1x64xf32> to vector<32x64xf32>
    %156 = arith.subf %150, %155 : vector<32x64xf32>
    %157 = arith.mulf %156, %156 : vector<32x64xf32>
    %cst_117 = arith.constant dense<0.000000e+00> : vector<64xf32>
    %158 = vector.multi_reduction <add>, %157, %cst_117 [0] : vector<32x64xf32> to vector<64xf32>
    %159 = vector.shape_cast %158 : vector<64xf32> to vector<1x64xf32>
    %cst_118 = arith.constant 3.200000e+01 : f32
    %160 = vector.broadcast %cst_118 : f32 to vector<1x64xf32>
    %161 = arith.divf %159, %160 : vector<1x64xf32>
    %cst_119 = arith.constant 9.99999974E-6 : f32
    %162 = vector.broadcast %cst_119 : f32 to vector<1x64xf32>
    %163 = arith.addf %161, %162 : vector<1x64xf32>
    %164 = math.rsqrt %163 : vector<1x64xf32>
    %165 = vector.broadcast %164 : vector<1x64xf32> to vector<32x64xf32>
    %166 = arith.mulf %156, %165 : vector<32x64xf32>
    %c0_120 = arith.constant 0 : index
    %c0_121 = arith.constant 0 : index
    %167 = vector.load %arg12[%c0_120, %c0_121] : memref<1x64xf32, #tpu.memory_space<vmem>>, vector<1x64xf32>
    %168 = vector.broadcast %167 : vector<1x64xf32> to vector<32x64xf32>
    %169 = arith.mulf %168, %166 : vector<32x64xf32>
    %c0_122 = arith.constant 0 : index
    %c0_123 = arith.constant 0 : index
    %170 = vector.load %arg13[%c0_122, %c0_123] : memref<1x64xf32, #tpu.memory_space<vmem>>, vector<1x64xf32>
    %171 = vector.broadcast %170 : vector<1x64xf32> to vector<32x64xf32>
    %172 = arith.addf %169, %171 : vector<32x64xf32>
    %cst_124 = arith.constant 0.000000e+00 : f32
    %173 = vector.broadcast %cst_124 : f32 to vector<32x64xf32>
    %174 = arith.cmpf ogt, %172, %173 : vector<32x64xf32>
    %cst_125 = arith.constant 2.000000e-01 : f32
    %175 = vector.broadcast %cst_125 : f32 to vector<32x64xf32>
    %176 = arith.mulf %175, %172 : vector<32x64xf32>
    %177 = arith.select %174, %172, %176 : vector<32x64xi1>, vector<32x64xf32>
    %178 = arith.truncf %177 : vector<32x64xf32> to vector<32x64xbf16>
    %c0_126 = arith.constant 0 : index
    %c0_127 = arith.constant 0 : index
    %c0_128 = arith.constant 0 : index
    %179 = vector.load %arg14[%c0_126, %c0_127, %c0_128] : memref<4x16x32xbf16, #tpu.memory_space<vmem>>, vector<1x16x32xbf16>
    %180 = vector.shape_cast %179 : vector<1x16x32xbf16> to vector<16x32xbf16>
    %cst_129 = arith.constant dense<0.000000e+00> : vector<16x64xf32>
    %181 = tpu.matmul %180, %178, %cst_129 {dimension_numbers = #tpu.dot_dimension_numbers<[1], [0], [0], [1], [0, 0, 1, 1], [], []>} : vector<16x32xbf16>, vector<32x64xbf16>, vector<16x64xf32> -> vector<16x64xf32>
    %182 = arith.truncf %181 : vector<16x64xf32> to vector<16x64xbf16>
    %c0_130 = arith.constant 0 : index
    %c0_131 = arith.constant 0 : index
    %c0_132 = arith.constant 0 : index
    %183 = vector.load %arg15[%c0_130, %c0_131, %c0_132] : memref<4x64x32xbf16, #tpu.memory_space<vmem>>, vector<1x64x32xbf16>
    %184 = vector.shape_cast %183 : vector<1x64x32xbf16> to vector<64x32xbf16>
    %cst_133 = arith.constant dense<0.000000e+00> : vector<16x32xf32>
    %185 = tpu.matmul %182, %184, %cst_133 {dimension_numbers = #tpu.dot_dimension_numbers<[1], [0], [0], [1], [0, 0, 1, 1], [], []>} : vector<16x64xbf16>, vector<64x32xbf16>, vector<16x32xf32> -> vector<16x32xf32>
    %c1_134 = arith.constant 1 : index
    %c0_135 = arith.constant 0 : index
    %c0_136 = arith.constant 0 : index
    %186 = vector.load %arg14[%c1_134, %c0_135, %c0_136] : memref<4x16x32xbf16, #tpu.memory_space<vmem>>, vector<1x16x32xbf16>
    %187 = vector.shape_cast %186 : vector<1x16x32xbf16> to vector<16x32xbf16>
    %cst_137 = arith.constant dense<0.000000e+00> : vector<16x64xf32>
    %188 = tpu.matmul %187, %178, %cst_137 {dimension_numbers = #tpu.dot_dimension_numbers<[1], [0], [0], [1], [0, 0, 1, 1], [], []>} : vector<16x32xbf16>, vector<32x64xbf16>, vector<16x64xf32> -> vector<16x64xf32>
    %189 = arith.truncf %188 : vector<16x64xf32> to vector<16x64xbf16>
    %c1_138 = arith.constant 1 : index
    %c0_139 = arith.constant 0 : index
    %c0_140 = arith.constant 0 : index
    %190 = vector.load %arg15[%c1_138, %c0_139, %c0_140] : memref<4x64x32xbf16, #tpu.memory_space<vmem>>, vector<1x64x32xbf16>
    %191 = vector.shape_cast %190 : vector<1x64x32xbf16> to vector<64x32xbf16>
    %cst_141 = arith.constant dense<0.000000e+00> : vector<16x32xf32>
    %192 = tpu.matmul %189, %191, %cst_141 {dimension_numbers = #tpu.dot_dimension_numbers<[1], [0], [0], [1], [0, 0, 1, 1], [], []>} : vector<16x64xbf16>, vector<64x32xbf16>, vector<16x32xf32> -> vector<16x32xf32>
    %193 = arith.addf %185, %192 : vector<16x32xf32>
    %c2_142 = arith.constant 2 : index
    %c0_143 = arith.constant 0 : index
    %c0_144 = arith.constant 0 : index
    %194 = vector.load %arg14[%c2_142, %c0_143, %c0_144] : memref<4x16x32xbf16, #tpu.memory_space<vmem>>, vector<1x16x32xbf16>
    %195 = vector.shape_cast %194 : vector<1x16x32xbf16> to vector<16x32xbf16>
    %cst_145 = arith.constant dense<0.000000e+00> : vector<16x64xf32>
    %196 = tpu.matmul %195, %178, %cst_145 {dimension_numbers = #tpu.dot_dimension_numbers<[1], [0], [0], [1], [0, 0, 1, 1], [], []>} : vector<16x32xbf16>, vector<32x64xbf16>, vector<16x64xf32> -> vector<16x64xf32>
    %197 = arith.truncf %196 : vector<16x64xf32> to vector<16x64xbf16>
    %c2_146 = arith.constant 2 : index
    %c0_147 = arith.constant 0 : index
    %c0_148 = arith.constant 0 : index
    %198 = vector.load %arg15[%c2_146, %c0_147, %c0_148] : memref<4x64x32xbf16, #tpu.memory_space<vmem>>, vector<1x64x32xbf16>
    %199 = vector.shape_cast %198 : vector<1x64x32xbf16> to vector<64x32xbf16>
    %cst_149 = arith.constant dense<0.000000e+00> : vector<16x32xf32>
    %200 = tpu.matmul %197, %199, %cst_149 {dimension_numbers = #tpu.dot_dimension_numbers<[1], [0], [0], [1], [0, 0, 1, 1], [], []>} : vector<16x64xbf16>, vector<64x32xbf16>, vector<16x32xf32> -> vector<16x32xf32>
    %201 = arith.addf %193, %200 : vector<16x32xf32>
    %c3_150 = arith.constant 3 : index
    %c0_151 = arith.constant 0 : index
    %c0_152 = arith.constant 0 : index
    %202 = vector.load %arg14[%c3_150, %c0_151, %c0_152] : memref<4x16x32xbf16, #tpu.memory_space<vmem>>, vector<1x16x32xbf16>
    %203 = vector.shape_cast %202 : vector<1x16x32xbf16> to vector<16x32xbf16>
    %cst_153 = arith.constant dense<0.000000e+00> : vector<16x64xf32>
    %204 = tpu.matmul %203, %178, %cst_153 {dimension_numbers = #tpu.dot_dimension_numbers<[1], [0], [0], [1], [0, 0, 1, 1], [], []>} : vector<16x32xbf16>, vector<32x64xbf16>, vector<16x64xf32> -> vector<16x64xf32>
    %205 = arith.truncf %204 : vector<16x64xf32> to vector<16x64xbf16>
    %c3_154 = arith.constant 3 : index
    %c0_155 = arith.constant 0 : index
    %c0_156 = arith.constant 0 : index
    %206 = vector.load %arg15[%c3_154, %c0_155, %c0_156] : memref<4x64x32xbf16, #tpu.memory_space<vmem>>, vector<1x64x32xbf16>
    %207 = vector.shape_cast %206 : vector<1x64x32xbf16> to vector<64x32xbf16>
    %cst_157 = arith.constant dense<0.000000e+00> : vector<16x32xf32>
    %208 = tpu.matmul %205, %207, %cst_157 {dimension_numbers = #tpu.dot_dimension_numbers<[1], [0], [0], [1], [0, 0, 1, 1], [], []>} : vector<16x64xbf16>, vector<64x32xbf16>, vector<16x32xf32> -> vector<16x32xf32>
    %209 = arith.addf %201, %208 : vector<16x32xf32>
    %cst_158 = arith.constant dense<0.000000e+00> : vector<32xf32>
    %210 = vector.multi_reduction <add>, %209, %cst_158 [0] : vector<16x32xf32> to vector<32xf32>
    %211 = vector.shape_cast %210 : vector<32xf32> to vector<1x32xf32>
    %cst_159 = arith.constant 1.600000e+01 : f32
    %212 = vector.broadcast %cst_159 : f32 to vector<1x32xf32>
    %213 = arith.divf %211, %212 : vector<1x32xf32>
    %214 = vector.broadcast %213 : vector<1x32xf32> to vector<16x32xf32>
    %215 = arith.subf %209, %214 : vector<16x32xf32>
    %216 = arith.mulf %215, %215 : vector<16x32xf32>
    %cst_160 = arith.constant dense<0.000000e+00> : vector<32xf32>
    %217 = vector.multi_reduction <add>, %216, %cst_160 [0] : vector<16x32xf32> to vector<32xf32>
    %218 = vector.shape_cast %217 : vector<32xf32> to vector<1x32xf32>
    %cst_161 = arith.constant 1.600000e+01 : f32
    %219 = vector.broadcast %cst_161 : f32 to vector<1x32xf32>
    %220 = arith.divf %218, %219 : vector<1x32xf32>
    %cst_162 = arith.constant 9.99999974E-6 : f32
    %221 = vector.broadcast %cst_162 : f32 to vector<1x32xf32>
    %222 = arith.addf %220, %221 : vector<1x32xf32>
    %223 = math.rsqrt %222 : vector<1x32xf32>
    %224 = vector.broadcast %223 : vector<1x32xf32> to vector<16x32xf32>
    %225 = arith.mulf %215, %224 : vector<16x32xf32>
    %c0_163 = arith.constant 0 : index
    %c0_164 = arith.constant 0 : index
    %226 = vector.load %arg16[%c0_163, %c0_164] : memref<1x32xf32, #tpu.memory_space<vmem>>, vector<1x32xf32>
    %227 = vector.broadcast %226 : vector<1x32xf32> to vector<16x32xf32>
    %228 = arith.mulf %227, %225 : vector<16x32xf32>
    %c0_165 = arith.constant 0 : index
    %c0_166 = arith.constant 0 : index
    %229 = vector.load %arg17[%c0_165, %c0_166] : memref<1x32xf32, #tpu.memory_space<vmem>>, vector<1x32xf32>
    %230 = vector.broadcast %229 : vector<1x32xf32> to vector<16x32xf32>
    %231 = arith.addf %228, %230 : vector<16x32xf32>
    %cst_167 = arith.constant 0.000000e+00 : f32
    %232 = vector.broadcast %cst_167 : f32 to vector<16x32xf32>
    %233 = arith.cmpf ogt, %231, %232 : vector<16x32xf32>
    %cst_168 = arith.constant 2.000000e-01 : f32
    %234 = vector.broadcast %cst_168 : f32 to vector<16x32xf32>
    %235 = arith.mulf %234, %231 : vector<16x32xf32>
    %236 = arith.select %233, %231, %235 : vector<16x32xi1>, vector<16x32xf32>
    %237 = arith.truncf %236 : vector<16x32xf32> to vector<16x32xbf16>
    %c0_169 = arith.constant 0 : index
    %c0_170 = arith.constant 0 : index
    %c0_171 = arith.constant 0 : index
    %238 = vector.load %arg18[%c0_169, %c0_170, %c0_171] : memref<4x8x16xbf16, #tpu.memory_space<vmem>>, vector<1x8x16xbf16>
    %239 = vector.shape_cast %238 : vector<1x8x16xbf16> to vector<8x16xbf16>
    %cst_172 = arith.constant dense<0.000000e+00> : vector<8x32xf32>
    %240 = tpu.matmul %239, %237, %cst_172 {dimension_numbers = #tpu.dot_dimension_numbers<[1], [0], [0], [1], [0, 0, 1, 1], [], []>} : vector<8x16xbf16>, vector<16x32xbf16>, vector<8x32xf32> -> vector<8x32xf32>
    %241 = arith.truncf %240 : vector<8x32xf32> to vector<8x32xbf16>
    %c0_173 = arith.constant 0 : index
    %c0_174 = arith.constant 0 : index
    %c0_175 = arith.constant 0 : index
    %242 = vector.load %arg19[%c0_173, %c0_174, %c0_175] : memref<4x32x32xbf16, #tpu.memory_space<vmem>>, vector<1x32x32xbf16>
    %243 = vector.shape_cast %242 : vector<1x32x32xbf16> to vector<32x32xbf16>
    %cst_176 = arith.constant dense<0.000000e+00> : vector<8x32xf32>
    %244 = tpu.matmul %241, %243, %cst_176 {dimension_numbers = #tpu.dot_dimension_numbers<[1], [0], [0], [1], [0, 0, 1, 1], [], []>} : vector<8x32xbf16>, vector<32x32xbf16>, vector<8x32xf32> -> vector<8x32xf32>
    %c1_177 = arith.constant 1 : index
    %c0_178 = arith.constant 0 : index
    %c0_179 = arith.constant 0 : index
    %245 = vector.load %arg18[%c1_177, %c0_178, %c0_179] : memref<4x8x16xbf16, #tpu.memory_space<vmem>>, vector<1x8x16xbf16>
    %246 = vector.shape_cast %245 : vector<1x8x16xbf16> to vector<8x16xbf16>
    %cst_180 = arith.constant dense<0.000000e+00> : vector<8x32xf32>
    %247 = tpu.matmul %246, %237, %cst_180 {dimension_numbers = #tpu.dot_dimension_numbers<[1], [0], [0], [1], [0, 0, 1, 1], [], []>} : vector<8x16xbf16>, vector<16x32xbf16>, vector<8x32xf32> -> vector<8x32xf32>
    %248 = arith.truncf %247 : vector<8x32xf32> to vector<8x32xbf16>
    %c1_181 = arith.constant 1 : index
    %c0_182 = arith.constant 0 : index
    %c0_183 = arith.constant 0 : index
    %249 = vector.load %arg19[%c1_181, %c0_182, %c0_183] : memref<4x32x32xbf16, #tpu.memory_space<vmem>>, vector<1x32x32xbf16>
    %250 = vector.shape_cast %249 : vector<1x32x32xbf16> to vector<32x32xbf16>
    %cst_184 = arith.constant dense<0.000000e+00> : vector<8x32xf32>
    %251 = tpu.matmul %248, %250, %cst_184 {dimension_numbers = #tpu.dot_dimension_numbers<[1], [0], [0], [1], [0, 0, 1, 1], [], []>} : vector<8x32xbf16>, vector<32x32xbf16>, vector<8x32xf32> -> vector<8x32xf32>
    %252 = arith.addf %244, %251 : vector<8x32xf32>
    %c2_185 = arith.constant 2 : index
    %c0_186 = arith.constant 0 : index
    %c0_187 = arith.constant 0 : index
    %253 = vector.load %arg18[%c2_185, %c0_186, %c0_187] : memref<4x8x16xbf16, #tpu.memory_space<vmem>>, vector<1x8x16xbf16>
    %254 = vector.shape_cast %253 : vector<1x8x16xbf16> to vector<8x16xbf16>
    %cst_188 = arith.constant dense<0.000000e+00> : vector<8x32xf32>
    %255 = tpu.matmul %254, %237, %cst_188 {dimension_numbers = #tpu.dot_dimension_numbers<[1], [0], [0], [1], [0, 0, 1, 1], [], []>} : vector<8x16xbf16>, vector<16x32xbf16>, vector<8x32xf32> -> vector<8x32xf32>
    %256 = arith.truncf %255 : vector<8x32xf32> to vector<8x32xbf16>
    %c2_189 = arith.constant 2 : index
    %c0_190 = arith.constant 0 : index
    %c0_191 = arith.constant 0 : index
    %257 = vector.load %arg19[%c2_189, %c0_190, %c0_191] : memref<4x32x32xbf16, #tpu.memory_space<vmem>>, vector<1x32x32xbf16>
    %258 = vector.shape_cast %257 : vector<1x32x32xbf16> to vector<32x32xbf16>
    %cst_192 = arith.constant dense<0.000000e+00> : vector<8x32xf32>
    %259 = tpu.matmul %256, %258, %cst_192 {dimension_numbers = #tpu.dot_dimension_numbers<[1], [0], [0], [1], [0, 0, 1, 1], [], []>} : vector<8x32xbf16>, vector<32x32xbf16>, vector<8x32xf32> -> vector<8x32xf32>
    %260 = arith.addf %252, %259 : vector<8x32xf32>
    %c3_193 = arith.constant 3 : index
    %c0_194 = arith.constant 0 : index
    %c0_195 = arith.constant 0 : index
    %261 = vector.load %arg18[%c3_193, %c0_194, %c0_195] : memref<4x8x16xbf16, #tpu.memory_space<vmem>>, vector<1x8x16xbf16>
    %262 = vector.shape_cast %261 : vector<1x8x16xbf16> to vector<8x16xbf16>
    %cst_196 = arith.constant dense<0.000000e+00> : vector<8x32xf32>
    %263 = tpu.matmul %262, %237, %cst_196 {dimension_numbers = #tpu.dot_dimension_numbers<[1], [0], [0], [1], [0, 0, 1, 1], [], []>} : vector<8x16xbf16>, vector<16x32xbf16>, vector<8x32xf32> -> vector<8x32xf32>
    %264 = arith.truncf %263 : vector<8x32xf32> to vector<8x32xbf16>
    %c3_197 = arith.constant 3 : index
    %c0_198 = arith.constant 0 : index
    %c0_199 = arith.constant 0 : index
    %265 = vector.load %arg19[%c3_197, %c0_198, %c0_199] : memref<4x32x32xbf16, #tpu.memory_space<vmem>>, vector<1x32x32xbf16>
    %266 = vector.shape_cast %265 : vector<1x32x32xbf16> to vector<32x32xbf16>
    %cst_200 = arith.constant dense<0.000000e+00> : vector<8x32xf32>
    %267 = tpu.matmul %264, %266, %cst_200 {dimension_numbers = #tpu.dot_dimension_numbers<[1], [0], [0], [1], [0, 0, 1, 1], [], []>} : vector<8x32xbf16>, vector<32x32xbf16>, vector<8x32xf32> -> vector<8x32xf32>
    %268 = arith.addf %260, %267 : vector<8x32xf32>
    %cst_201 = arith.constant dense<0.000000e+00> : vector<32xf32>
    %269 = vector.multi_reduction <add>, %268, %cst_201 [0] : vector<8x32xf32> to vector<32xf32>
    %270 = vector.shape_cast %269 : vector<32xf32> to vector<1x32xf32>
    %cst_202 = arith.constant 8.000000e+00 : f32
    %271 = vector.broadcast %cst_202 : f32 to vector<1x32xf32>
    %272 = arith.divf %270, %271 : vector<1x32xf32>
    %273 = vector.broadcast %272 : vector<1x32xf32> to vector<8x32xf32>
    %274 = arith.subf %268, %273 : vector<8x32xf32>
    %275 = arith.mulf %274, %274 : vector<8x32xf32>
    %cst_203 = arith.constant dense<0.000000e+00> : vector<32xf32>
    %276 = vector.multi_reduction <add>, %275, %cst_203 [0] : vector<8x32xf32> to vector<32xf32>
    %277 = vector.shape_cast %276 : vector<32xf32> to vector<1x32xf32>
    %cst_204 = arith.constant 8.000000e+00 : f32
    %278 = vector.broadcast %cst_204 : f32 to vector<1x32xf32>
    %279 = arith.divf %277, %278 : vector<1x32xf32>
    %cst_205 = arith.constant 9.99999974E-6 : f32
    %280 = vector.broadcast %cst_205 : f32 to vector<1x32xf32>
    %281 = arith.addf %279, %280 : vector<1x32xf32>
    %282 = math.rsqrt %281 : vector<1x32xf32>
    %283 = vector.broadcast %282 : vector<1x32xf32> to vector<8x32xf32>
    %284 = arith.mulf %274, %283 : vector<8x32xf32>
    %c0_206 = arith.constant 0 : index
    %c0_207 = arith.constant 0 : index
    %285 = vector.load %arg20[%c0_206, %c0_207] : memref<1x32xf32, #tpu.memory_space<vmem>>, vector<1x32xf32>
    %286 = vector.broadcast %285 : vector<1x32xf32> to vector<8x32xf32>
    %287 = arith.mulf %286, %284 : vector<8x32xf32>
    %c0_208 = arith.constant 0 : index
    %c0_209 = arith.constant 0 : index
    %288 = vector.load %arg21[%c0_208, %c0_209] : memref<1x32xf32, #tpu.memory_space<vmem>>, vector<1x32xf32>
    %289 = vector.broadcast %288 : vector<1x32xf32> to vector<8x32xf32>
    %290 = arith.addf %287, %289 : vector<8x32xf32>
    %cst_210 = arith.constant 0.000000e+00 : f32
    %291 = vector.broadcast %cst_210 : f32 to vector<8x32xf32>
    %292 = arith.cmpf ogt, %290, %291 : vector<8x32xf32>
    %cst_211 = arith.constant 2.000000e-01 : f32
    %293 = vector.broadcast %cst_211 : f32 to vector<8x32xf32>
    %294 = arith.mulf %293, %290 : vector<8x32xf32>
    %295 = arith.select %292, %290, %294 : vector<8x32xi1>, vector<8x32xf32>
    %296 = arith.truncf %295 : vector<8x32xf32> to vector<8x32xbf16>
    %c0_212 = arith.constant 0 : index
    %c0_213 = arith.constant 0 : index
    %c0_214 = arith.constant 0 : index
    %297 = vector.load %arg22[%c0_212, %c0_213, %c0_214] : memref<4x4x8xbf16, #tpu.memory_space<vmem>>, vector<1x4x8xbf16>
    %298 = vector.shape_cast %297 : vector<1x4x8xbf16> to vector<4x8xbf16>
    %cst_215 = arith.constant dense<0.000000e+00> : vector<4x32xf32>
    %299 = tpu.matmul %298, %296, %cst_215 {dimension_numbers = #tpu.dot_dimension_numbers<[1], [0], [0], [1], [0, 0, 1, 1], [], []>} : vector<4x8xbf16>, vector<8x32xbf16>, vector<4x32xf32> -> vector<4x32xf32>
    %300 = arith.truncf %299 : vector<4x32xf32> to vector<4x32xbf16>
    %c0_216 = arith.constant 0 : index
    %c0_217 = arith.constant 0 : index
    %c0_218 = arith.constant 0 : index
    %301 = vector.load %arg23[%c0_216, %c0_217, %c0_218] : memref<4x32x1xbf16, #tpu.memory_space<vmem>>, vector<1x32x1xbf16>
    %302 = vector.shape_cast %301 : vector<1x32x1xbf16> to vector<32x1xbf16>
    %cst_219 = arith.constant dense<0.000000e+00> : vector<4x1xf32>
    %303 = tpu.matmul %300, %302, %cst_219 {dimension_numbers = #tpu.dot_dimension_numbers<[1], [0], [0], [1], [0, 0, 1, 1], [], []>} : vector<4x32xbf16>, vector<32x1xbf16>, vector<4x1xf32> -> vector<4x1xf32>
    %c1_220 = arith.constant 1 : index
    %c0_221 = arith.constant 0 : index
    %c0_222 = arith.constant 0 : index
    %304 = vector.load %arg22[%c1_220, %c0_221, %c0_222] : memref<4x4x8xbf16, #tpu.memory_space<vmem>>, vector<1x4x8xbf16>
    %305 = vector.shape_cast %304 : vector<1x4x8xbf16> to vector<4x8xbf16>
    %cst_223 = arith.constant dense<0.000000e+00> : vector<4x32xf32>
    %306 = tpu.matmul %305, %296, %cst_223 {dimension_numbers = #tpu.dot_dimension_numbers<[1], [0], [0], [1], [0, 0, 1, 1], [], []>} : vector<4x8xbf16>, vector<8x32xbf16>, vector<4x32xf32> -> vector<4x32xf32>
    %307 = arith.truncf %306 : vector<4x32xf32> to vector<4x32xbf16>
    %c1_224 = arith.constant 1 : index
    %c0_225 = arith.constant 0 : index
    %c0_226 = arith.constant 0 : index
    %308 = vector.load %arg23[%c1_224, %c0_225, %c0_226] : memref<4x32x1xbf16, #tpu.memory_space<vmem>>, vector<1x32x1xbf16>
    %309 = vector.shape_cast %308 : vector<1x32x1xbf16> to vector<32x1xbf16>
    %cst_227 = arith.constant dense<0.000000e+00> : vector<4x1xf32>
    %310 = tpu.matmul %307, %309, %cst_227 {dimension_numbers = #tpu.dot_dimension_numbers<[1], [0], [0], [1], [0, 0, 1, 1], [], []>} : vector<4x32xbf16>, vector<32x1xbf16>, vector<4x1xf32> -> vector<4x1xf32>
    %311 = arith.addf %303, %310 : vector<4x1xf32>
    %c2_228 = arith.constant 2 : index
    %c0_229 = arith.constant 0 : index
    %c0_230 = arith.constant 0 : index
    %312 = vector.load %arg22[%c2_228, %c0_229, %c0_230] : memref<4x4x8xbf16, #tpu.memory_space<vmem>>, vector<1x4x8xbf16>
    %313 = vector.shape_cast %312 : vector<1x4x8xbf16> to vector<4x8xbf16>
    %cst_231 = arith.constant dense<0.000000e+00> : vector<4x32xf32>
    %314 = tpu.matmul %313, %296, %cst_231 {dimension_numbers = #tpu.dot_dimension_numbers<[1], [0], [0], [1], [0, 0, 1, 1], [], []>} : vector<4x8xbf16>, vector<8x32xbf16>, vector<4x32xf32> -> vector<4x32xf32>
    %315 = arith.truncf %314 : vector<4x32xf32> to vector<4x32xbf16>
    %c2_232 = arith.constant 2 : index
    %c0_233 = arith.constant 0 : index
    %c0_234 = arith.constant 0 : index
    %316 = vector.load %arg23[%c2_232, %c0_233, %c0_234] : memref<4x32x1xbf16, #tpu.memory_space<vmem>>, vector<1x32x1xbf16>
    %317 = vector.shape_cast %316 : vector<1x32x1xbf16> to vector<32x1xbf16>
    %cst_235 = arith.constant dense<0.000000e+00> : vector<4x1xf32>
    %318 = tpu.matmul %315, %317, %cst_235 {dimension_numbers = #tpu.dot_dimension_numbers<[1], [0], [0], [1], [0, 0, 1, 1], [], []>} : vector<4x32xbf16>, vector<32x1xbf16>, vector<4x1xf32> -> vector<4x1xf32>
    %319 = arith.addf %311, %318 : vector<4x1xf32>
    %c3_236 = arith.constant 3 : index
    %c0_237 = arith.constant 0 : index
    %c0_238 = arith.constant 0 : index
    %320 = vector.load %arg22[%c3_236, %c0_237, %c0_238] : memref<4x4x8xbf16, #tpu.memory_space<vmem>>, vector<1x4x8xbf16>
    %321 = vector.shape_cast %320 : vector<1x4x8xbf16> to vector<4x8xbf16>
    %cst_239 = arith.constant dense<0.000000e+00> : vector<4x32xf32>
    %322 = tpu.matmul %321, %296, %cst_239 {dimension_numbers = #tpu.dot_dimension_numbers<[1], [0], [0], [1], [0, 0, 1, 1], [], []>} : vector<4x8xbf16>, vector<8x32xbf16>, vector<4x32xf32> -> vector<4x32xf32>
    %323 = arith.truncf %322 : vector<4x32xf32> to vector<4x32xbf16>
    %c3_240 = arith.constant 3 : index
    %c0_241 = arith.constant 0 : index
    %c0_242 = arith.constant 0 : index
    %324 = vector.load %arg23[%c3_240, %c0_241, %c0_242] : memref<4x32x1xbf16, #tpu.memory_space<vmem>>, vector<1x32x1xbf16>
    %325 = vector.shape_cast %324 : vector<1x32x1xbf16> to vector<32x1xbf16>
    %cst_243 = arith.constant dense<0.000000e+00> : vector<4x1xf32>
    %326 = tpu.matmul %323, %325, %cst_243 {dimension_numbers = #tpu.dot_dimension_numbers<[1], [0], [0], [1], [0, 0, 1, 1], [], []>} : vector<4x32xbf16>, vector<32x1xbf16>, vector<4x1xf32> -> vector<4x1xf32>
    %327 = arith.addf %319, %326 : vector<4x1xf32>
    %c0_244 = arith.constant 0 : index
    %c0_245 = arith.constant 0 : index
    %328 = vector.load %arg24[%c0_244, %c0_245] : memref<1x1xf32, #tpu.memory_space<vmem>>, vector<1x1xf32>
    %329 = vector.broadcast %328 : vector<1x1xf32> to vector<4x1xf32>
    %330 = arith.addf %327, %329 : vector<4x1xf32>
    %331 = arith.negf %330 : vector<4x1xf32>
    %332 = math.exp %331 : vector<4x1xf32>
    %cst_246 = arith.constant 1.000000e+00 : f32
    %333 = vector.broadcast %cst_246 : f32 to vector<4x1xf32>
    %334 = arith.addf %333, %332 : vector<4x1xf32>
    %335 = arith.divf %333, %334 : vector<4x1xf32>
    %c0_247 = arith.constant 0 : index
    %c0_248 = arith.constant 0 : index
    %336 = vector.load %arg25[%c0_247, %c0_248] : memref<4x1xf32, #tpu.memory_space<vmem>>, vector<4x1xf32>
    tpu.vector_store %arg25[%c0_247, %c0_248], %335 {strides = array<i32>} : memref<4x1xf32, #tpu.memory_space<vmem>>, vector<4x1xf32>,
    return
  }
  func.func @transform_0(%arg0: i32) -> (i32, i32) {
    %c0_i32 = arith.constant 0 : i32
    %c0_i32_0 = arith.constant 0 : i32
    %c0_i32_1 = arith.constant 0 : i32
    return %c0_i32, %c0_i32_0 : i32, i32
  }
  func.func @transform_1(%arg0: i32) -> (i32, i32, i32) {
    %c0_i32 = arith.constant 0 : i32
    %c0_i32_0 = arith.constant 0 : i32
    %c0_i32_1 = arith.constant 0 : i32
    %c0_i32_2 = arith.constant 0 : i32
    return %c0_i32, %c0_i32_0, %c0_i32_1 : i32, i32, i32
  }
  func.func @transform_2(%arg0: i32) -> (i32, i32, i32) {
    %c0_i32 = arith.constant 0 : i32
    %c0_i32_0 = arith.constant 0 : i32
    %c0_i32_1 = arith.constant 0 : i32
    %c0_i32_2 = arith.constant 0 : i32
    return %c0_i32, %c0_i32_0, %c0_i32_1 : i32, i32, i32
  }
  func.func @transform_3(%arg0: i32) -> (i32, i32) {
    %c0_i32 = arith.constant 0 : i32
    %c0_i32_0 = arith.constant 0 : i32
    %c0_i32_1 = arith.constant 0 : i32
    return %c0_i32, %c0_i32_0 : i32, i32
  }
  func.func @transform_4(%arg0: i32) -> (i32, i32) {
    %c0_i32 = arith.constant 0 : i32
    %c0_i32_0 = arith.constant 0 : i32
    %c0_i32_1 = arith.constant 0 : i32
    return %c0_i32, %c0_i32_0 : i32, i32
  }
  func.func @transform_5(%arg0: i32) -> (i32, i32, i32) {
    %c0_i32 = arith.constant 0 : i32
    %c0_i32_0 = arith.constant 0 : i32
    %c0_i32_1 = arith.constant 0 : i32
    %c0_i32_2 = arith.constant 0 : i32
    return %c0_i32, %c0_i32_0, %c0_i32_1 : i32, i32, i32
  }
  func.func @transform_6(%arg0: i32) -> (i32, i32, i32) {
    %c0_i32 = arith.constant 0 : i32
    %c0_i32_0 = arith.constant 0 : i32
    %c0_i32_1 = arith.constant 0 : i32
    %c0_i32_2 = arith.constant 0 : i32
    return %c0_i32, %c0_i32_0, %c0_i32_1 : i32, i32, i32
  }
  func.func @transform_7(%arg0: i32) -> (i32, i32) {
    %c0_i32 = arith.constant 0 : i32
    %c0_i32_0 = arith.constant 0 : i32
    %c0_i32_1 = arith.constant 0 : i32
    return %c0_i32, %c0_i32_0 : i32, i32
  }
  func.func @transform_8(%arg0: i32) -> (i32, i32) {
    %c0_i32 = arith.constant 0 : i32
    %c0_i32_0 = arith.constant 0 : i32
    %c0_i32_1 = arith.constant 0 : i32
    return %c0_i32, %c0_i32_0 : i32, i32
  }
  func.func @transform_9(%arg0: i32) -> (i32, i32, i32) {
    %c0_i32 = arith.constant 0 : i32
    %c0_i32_0 = arith.constant 0 : i32
    %c0_i32_1 = arith.constant 0 : i32
    %c0_i32_2 = arith.constant 0 : i32
    return %c0_i32, %c0_i32_0, %c0_i32_1 : i32, i32, i32
  }
  func.func @transform_10(%arg0: i32) -> (i32, i32, i32) {
    %c0_i32 = arith.constant 0 : i32
    %c0_i32_0 = arith.constant 0 : i32
    %c0_i32_1 = arith.constant 0 : i32
    %c0_i32_2 = arith.constant 0 : i32
    return %c0_i32, %c0_i32_0, %c0_i32_1 : i32, i32, i32
  }
  func.func @transform_11(%arg0: i32) -> (i32, i32) {
    %c0_i32 = arith.constant 0 : i32
    %c0_i32_0 = arith.constant 0 : i32
    %c0_i32_1 = arith.constant 0 : i32
    return %c0_i32, %c0_i32_0 : i32, i32
  }
  func.func @transform_12(%arg0: i32) -> (i32, i32) {
    %c0_i32 = arith.constant 0 : i32
    %c0_i32_0 = arith.constant 0 : i32
    %c0_i32_1 = arith.constant 0 : i32
    return %c0_i32, %c0_i32_0 : i32, i32
  }
  func.func @transform_13(%arg0: i32) -> (i32, i32, i32) {
    %c0_i32 = arith.constant 0 : i32
    %c0_i32_0 = arith.constant 0 : i32
    %c0_i32_1 = arith.constant 0 : i32
    %c0_i32_2 = arith.constant 0 : i32
    return %c0_i32, %c0_i32_0, %c0_i32_1 : i32, i32, i32
  }
  func.func @transform_14(%arg0: i32) -> (i32, i32, i32) {
    %c0_i32 = arith.constant 0 : i32
    %c0_i32_0 = arith.constant 0 : i32
    %c0_i32_1 = arith.constant 0 : i32
    %c0_i32_2 = arith.constant 0 : i32
    return %c0_i32, %c0_i32_0, %c0_i32_1 : i32, i32, i32
  }
  func.func @transform_15(%arg0: i32) -> (i32, i32) {
    %c0_i32 = arith.constant 0 : i32
    %c0_i32_0 = arith.constant 0 : i32
    %c0_i32_1 = arith.constant 0 : i32
    return %c0_i32, %c0_i32_0 : i32, i32
  }
  func.func @transform_16(%arg0: i32) -> (i32, i32) {
    %c0_i32 = arith.constant 0 : i32
    %c0_i32_0 = arith.constant 0 : i32
    %c0_i32_1 = arith.constant 0 : i32
    return %c0_i32, %c0_i32_0 : i32, i32
  }
  func.func @transform_17(%arg0: i32) -> (i32, i32, i32) {
    %c0_i32 = arith.constant 0 : i32
    %c0_i32_0 = arith.constant 0 : i32
    %c0_i32_1 = arith.constant 0 : i32
    %c0_i32_2 = arith.constant 0 : i32
    return %c0_i32, %c0_i32_0, %c0_i32_1 : i32, i32, i32
  }
  func.func @transform_18(%arg0: i32) -> (i32, i32, i32) {
    %c0_i32 = arith.constant 0 : i32
    %c0_i32_0 = arith.constant 0 : i32
    %c0_i32_1 = arith.constant 0 : i32
    %c0_i32_2 = arith.constant 0 : i32
    return %c0_i32, %c0_i32_0, %c0_i32_1 : i32, i32, i32
  }
  func.func @transform_19(%arg0: i32) -> (i32, i32) {
    %c0_i32 = arith.constant 0 : i32
    %c0_i32_0 = arith.constant 0 : i32
    %c0_i32_1 = arith.constant 0 : i32
    return %c0_i32, %c0_i32_0 : i32, i32
  }
  func.func @transform_20(%arg0: i32) -> (i32, i32) {
    %c0_i32 = arith.constant 0 : i32
    %c0_i32_0 = arith.constant 0 : i32
    %c0_i32_1 = arith.constant 0 : i32
    return %c0_i32, %c0_i32_0 : i32, i32
  }
  func.func @transform_21(%arg0: i32) -> (i32, i32, i32) {
    %c0_i32 = arith.constant 0 : i32
    %c0_i32_0 = arith.constant 0 : i32
    %c0_i32_1 = arith.constant 0 : i32
    %c0_i32_2 = arith.constant 0 : i32
    return %c0_i32, %c0_i32_0, %c0_i32_1 : i32, i32, i32
  }
  func.func @transform_22(%arg0: i32) -> (i32, i32, i32) {
    %c0_i32 = arith.constant 0 : i32
    %c0_i32_0 = arith.constant 0 : i32
    %c0_i32_1 = arith.constant 0 : i32
    %c0_i32_2 = arith.constant 0 : i32
    return %c0_i32, %c0_i32_0, %c0_i32_1 : i32, i32, i32
  }
  func.func @transform_23(%arg0: i32) -> (i32, i32) {
    %c0_i32 = arith.constant 0 : i32
    %c0_i32_0 = arith.constant 0 : i32
    %c0_i32_1 = arith.constant 0 : i32
    return %c0_i32, %c0_i32_0 : i32, i32
  }
  func.func @transform_24(%arg0: i32) -> (i32, i32) {
    %c0_i32 = arith.constant 0 : i32
    %c0_i32_0 = arith.constant 0 : i32
    %c0_i32_1 = arith.constant 0 : i32
    return %c0_i32, %c0_i32_0 : i32, i32
  }
}

</mosaic_0001>

<bundles_post_ra>
// kernel: discriminator_forward.1
= control target key start
LH: loop header
LB: loop body
LE: loop exit
PB: predicated region body
PF: predicated region fallthrough
CT: control target
= control target key end

     0   :  { %vm569_vm0 = vcmask 1044480   ;;  %vm570_vm1 = vcmask 1045504   ;;  %v7574_v57 = vmov 65535   ;;  %vm544_vm2 = vcmask 89088   ;;  %s9746_s0 = inlined_call_operand.vmem [shape: f32[256,11], index: 0, kind: input, shape index: {}]   ;;  %s9747_s1 = inlined_call_operand.vmem [shape: bf16[4,128,256], index: 1, kind: input, shape index: {}]   ;;  %s9748_s2 = inlined_call_operand.vmem [shape: bf16[4,11,256], index: 2, kind: input, shape index: {}]   ;;  %s9749_s5 = inlined_call_operand.vmem [shape: bf16[4,64,128], index: 5, kind: input, shape index: {}]   ;;  %s9750_s3 = inlined_call_operand.vmem [shape: f32[1,256], index: 3, kind: input, shape index: {}]   ;;  %s9751_s6 = inlined_call_operand.vmem [shape: bf16[4,256,128], index: 6, kind: input, shape index: {}]   ;;  %s9752_s4 = inlined_call_operand.vmem [shape: f32[1,256], index: 4, kind: input, shape index: {}]   ;;  %s9753_s9 = inlined_call_operand.vmem [shape: bf16[4,32,64], index: 9, kind: input, shape index: {}]   ;;  %s9754_s10 = inlined_call_operand.vmem [shape: bf16[4,128,64], index: 10, kind: input, shape index: {}]   ;;  %s9755_s7 = inlined_call_operand.vmem [shape: f32[1,128], index: 7, kind: input, shape index: {}]   ;;  %s9756_s8 = inlined_call_operand.vmem [shape: f32[1,128], index: 8, kind: input, shape index: {}]   ;;  %s9757_s13 = inlined_call_operand.vmem [shape: bf16[4,16,32], index: 13, kind: input, shape index: {}]   ;;  %s9758_s14 = inlined_call_operand.vmem [shape: bf16[4,64,32], index: 14, kind: input, shape index: {}]   ;;  %s9759_s11 = inlined_call_operand.vmem [shape: f32[1,64], index: 11, kind: input, shape index: {}]   ;;  %s9760_s12 = inlined_call_operand.vmem [shape: f32[1,64], index: 12, kind: input, shape index: {}]   ;;  %s9761_s18 = inlined_call_operand.vmem [shape: bf16[4,32,32], index: 18, kind: input, shape index: {}]   ;;  %s9762_s15 = inlined_call_operand.vmem [shape: f32[1,32], index: 15, kind: input, shape index: {}]   ;;  %s9763_s16 = inlined_call_operand.vmem [shape: f32[1,32], index: 16, kind: input, shape index: {}]   ;;  %s9764_s17 = inlined_call_operand.vmem [shape: bf16[4,8,16], index: 17, kind: input, shape index: {}]   ;;  %s9765_s22 = inlined_call_operand.vmem [shape: bf16[4,32,1], index: 22, kind: input, shape index: {}]   ;;  %s9766_s19 = inlined_call_operand.vmem [shape: f32[1,32], index: 19, kind: input, shape index: {}]   ;;  %s9767_s20 = inlined_call_operand.vmem [shape: f32[1,32], index: 20, kind: input, shape index: {}]   ;;  %s9768_s21 = inlined_call_operand.vmem [shape: bf16[4,4,8], index: 21, kind: input, shape index: {}]   ;;  %s9769_s23 = inlined_call_operand.<no memory space> [shape: f32[1,1], index: 23, kind: input, shape index: {}]   ;;  %s9770_s24 = inlined_call_operand.vmem [shape: f32[4,1], index: 24, kind: output, shape index: {}]  }
   0x1   :  { %9778 = sst [smem:[#allocation3_spill]] %s9746_s0  ;;  %v571_v58 = vsel %vm569_vm0, 4294967295, %v7574_v57 }
   0x2   :  { %9779 = sst [smem:[#allocation4_spill]] %s9747_s1  ;;  %s9787_s27 = sld [smem:[#allocation3_spill]]  ;;  %v7898_v60 = vsel %vm570_vm1, %v571_v58, 0 }
   0x3   :  { %9780 = sst [smem:[#allocation5_spill]] %s9748_s2  ;;  %s9788_s25 = sld [smem:[#allocation4_spill]] }
   0x4   :  { %9781 = sst [smem:[#allocation6_spill]] %s9749_s5 }
   0x5   :  { %9782 = sst [smem:[#allocation7_spill]] %s9750_s3 }
   0x6   :  { %9783 = sst [smem:[#allocation8_spill]] %s9751_s6 }
   0x7   :  { %9784 = sst [smem:[#allocation9_spill]] %s9752_s4  ;;  %s9792_s4 = sld [smem:[#allocation6_spill]] }
   0x8   :  { %9785 = sst [smem:[#allocation10_spill]] %s9753_s9  ;;  %v96_v0 = vld [vmem:[%s9787_s27 + $0x80] sm:$0xff]  ;;  %v97_v1 = vld [vmem:[%s9787_s27 + $0x88] sm:$0xff]  ;;  %v98_v5 = vld [vmem:[%s9787_s27 + $0x90] sm:$0xff]  ;;  %s9791_s6 = sld [smem:[#allocation9_spill]] }
   0x9   :  { %9786 = sst [smem:[#allocation11_spill]] %s9754_s10  ;;  %v80_v2 = vld [vmem:[%s9787_s27] sm:$0xff]  ;;  %v7712_v3 = vpack.c.bf16 %v97_v1, %v96_v0  ;;  %v81_v4 = vld [vmem:[%s9787_s27 + $0x8] sm:$0xff]  ;;  %v99_v6 = vld [vmem:[%s9787_s27 + $0x98] sm:$0xff]  ;;  %s9790_s10 = sld [smem:[#allocation7_spill]] }
   0xa   :  { %v7723_v7 = vpack.c.bf16 %v81_v4, %v80_v2  ;;  %v7725_v8 = vpack.c.bf16 %v99_v6, %v98_v5  ;;  %v82_v9 = vld [vmem:[%s9787_s27 + $0x10] sm:$0xff]  ;;  %v83_v10 = vld [vmem:[%s9787_s27 + $0x18] sm:$0xff]  ;;  %v100_v11 = vld [vmem:[%s9787_s27 + $0xa0] sm:$0xff]  ;;  %s9793_s29 = sld [smem:[#allocation8_spill]]  ;;  %s9811_s5 = sld [smem:[#allocation10_spill]] }
   0xb   :  { %6350 = vmatprep.subr.bf16.mxu1 %v7712_v3  ;;  %v101_v12 = vld [vmem:[%s9787_s27 + $0xa8] sm:$0xff]  ;;  %6286 = vmatprep.subr.bf16.mxu0 %v7712_v3  ;;  %v7742_v13 = vpack.c.bf16 %v83_v10, %v82_v9  ;;  %v84_v15 = vld [vmem:[%s9787_s27 + $0x20] sm:$0xff]  ;;  %v102_v17 = vld [vmem:[%s9787_s27 + $0xb0] sm:$0xff] }
   0xc   :  { %6351 = vmatpush3.bf16.msra.mxu1 %v7723_v7  ;;  %6287 = vmatpush3.bf16.msra.mxu0 %v7723_v7  ;;  %v7746_v14 = vpack.c.bf16 %v101_v12, %v100_v11  ;;  %v85_v16 = vld [vmem:[%s9787_s27 + $0x28] sm:$0xff]  ;;  %v103_v18 = vld [vmem:[%s9787_s27 + $0xb8] sm:$0xff]  ;;  %v86_v21 = vld [vmem:[%s9787_s27 + $0x30] sm:$0xff] }
   0xd   :  { %6352 = vmatprep.subr.bf16.mxu1 %v7725_v8  ;;  %6288 = vmatprep.subr.bf16.mxu0 %v7725_v8  ;;  %v7762_v19 = vpack.c.bf16 %v85_v16, %v84_v15  ;;  %v7766_v20 = vpack.c.bf16 %v103_v18, %v102_v17  ;;  %v87_v22 = vld [vmem:[%s9787_s27 + $0x38] sm:$0xff]  ;;  %v104_v23 = vld [vmem:[%s9787_s27 + $0xc0] sm:$0xff]  ;;  %v105_v24 = vld [vmem:[%s9787_s27 + $0xc8] sm:$0xff] }
   0xe   :  { %v7296_v25 = vld [vmem:[%s9788_s25 + $0x84] ss:$8 sps:$4 sm:$0xff]   ;;  %v7785_v26 = vpack.c.bf16 %v87_v22, %v86_v21  ;;  %v7792_v28 = vpack.c.bf16 %v105_v24, %v104_v23  ;;  %v106_v30 = vld [vmem:[%s9787_s27 + $0xd0] sm:$0xff]  ;;  %v107_v31 = vld [vmem:[%s9787_s27 + $0xd8] sm:$0xff] }
   0xf   :  { %v88_v27 = vld [vmem:[%s9787_s27 + $0x40] sm:$0xff]  ;;  %v89_v29 = vld [vmem:[%s9787_s27 + $0x48] sm:$0xff]  ;;  %460 = vmatprep.mubr.bf16.mxu1 %v7296_v25  ;;  %v90_v33 = vld [vmem:[%s9787_s27 + $0x50] sm:$0xff]  ;;  %v7812_v34 = vpack.c.bf16 %v107_v31, %v106_v30 }
  0x10   :  { %6353 = vmatpush3.bf16.msra.mxu1 %v7742_v13  ;;  %6289 = vmatpush3.bf16.msra.mxu0 %v7742_v13  ;;  %v7805_v32 = vpack.c.bf16 %v89_v29, %v88_v27  ;;  %v91_v35 = vld [vmem:[%s9787_s27 + $0x58] sm:$0xff]  ;;  %v108_v36 = vld [vmem:[%s9787_s27 + $0xe0] sm:$0xff]  ;;  %v109_v37 = vld [vmem:[%s9787_s27 + $0xe8] sm:$0xff] }
  0x11   :  { %6354 = vmatprep.subr.bf16.mxu1 %v7746_v14  ;;  %6290 = vmatprep.subr.bf16.mxu0 %v7746_v14  ;;  %v92_v38 = vld [vmem:[%s9787_s27 + $0x60] sm:$0xff]  ;;  %v7828_v39 = vpack.c.bf16 %v91_v35, %v90_v33  ;;  %v93_v40 = vld [vmem:[%s9787_s27 + $0x68] sm:$0xff]  ;;  %v7835_v41 = vpack.c.bf16 %v109_v37, %v108_v36  ;;  %v110_v42 = vld [vmem:[%s9787_s27 + $0xf0] sm:$0xff] }
  0x12   :  { %v111_v43 = vld [vmem:[%s9787_s27 + $0xf8] sm:$0xff]  ;;  %v7320_v44 = vld [vmem:[%s9788_s25 + $0x4] ss:$8 sps:$4 sm:$0xff]   ;;  %v7848_v45 = vpack.c.bf16 %v93_v40, %v92_v38  ;;  %v94_v46 = vld [vmem:[%s9787_s27 + $0x70] sm:$0xff] }
  0x13   :  { %v7855_v47 = vpack.c.bf16 %v111_v43, %v110_v42  ;;  %v95_v48 = vld [vmem:[%s9787_s27 + $0x78] sm:$0xff]  ;;  %256 = vmatprep.mubr.bf16.mxu0 %v7320_v44  ;;  %v7294_v50 = vld [vmem:[%s9788_s25 + $0x80] ss:$8 sps:$4 sm:$0xff]   ;;  %v7300_v55 = vld [vmem:[%s9788_s25 + $0xa4] ss:$8 sps:$4 sm:$0xff]   ;;  %s9789_s27 = sld [smem:[#allocation5_spill]] }
  0x14   :  { %6355 = vmatpush3.bf16.msra.mxu1 %v7762_v19  ;;  %6291 = vmatpush3.bf16.msra.mxu0 %v7762_v19  ;;  %v7862_v49 = vpack.c.bf16 %v95_v48, %v94_v46  ;;  %v7297_v51 = vld [vmem:[%s9788_s25 + $0x94] ss:$8 sps:$4 sm:$0xff]   ;;  %v7318_v52 = vld [vmem:[%s9788_s25] ss:$8 sps:$4 sm:$0xff]   ;;  %v7299_v54 = vld [vmem:[%s9788_s25 + $0x90] ss:$8 sps:$4 sm:$0xff]  }
  0x15   :  { %6356 = vmatprep.subr.bf16.mxu1 %v7766_v20  ;;  %6292 = vmatprep.subr.bf16.mxu0 %v7766_v20  ;;  %v7321_v53 = vld [vmem:[%s9788_s25 + $0x14] ss:$8 sps:$4 sm:$0xff]   ;;  %v7323_v56 = vld [vmem:[%s9788_s25 + $0x10] ss:$8 sps:$4 sm:$0xff]   ;;  %v7324_v59 = vld [vmem:[%s9788_s25 + $0x24] ss:$8 sps:$4 sm:$0xff]  }
  0x16   :  { %v7302_v0 = vld [vmem:[%s9788_s25 + $0xa0] ss:$8 sps:$4 sm:$0xff]   ;;  %v7303_v1 = vld [vmem:[%s9788_s25 + $0xb4] ss:$8 sps:$4 sm:$0xff]   ;;  %v7305_v6 = vld [vmem:[%s9788_s25 + $0xb0] ss:$8 sps:$4 sm:$0xff]  }
  0x17   :  { %v7326_v4 = vld [vmem:[%s9788_s25 + $0x20] ss:$8 sps:$4 sm:$0xff]   ;;  %v7327_v5 = vld [vmem:[%s9788_s25 + $0x34] ss:$8 sps:$4 sm:$0xff]   ;;  %v7329_v9 = vld [vmem:[%s9788_s25 + $0x30] ss:$8 sps:$4 sm:$0xff]  }
  0x18   :  { %6357 = vmatpush3.bf16.msra.mxu1 %v7785_v26  ;;  %6293 = vmatpush3.bf16.msra.mxu0 %v7785_v26  ;;  %v7306_v10 = vld [vmem:[%s9788_s25 + $0xc4] ss:$8 sps:$4 sm:$0xff]   ;;  %v7308_v12 = vld [vmem:[%s9788_s25 + $0xc0] ss:$8 sps:$4 sm:$0xff]   ;;  %v7309_v16 = vld [vmem:[%s9788_s25 + $0xd4] ss:$8 sps:$4 sm:$0xff]  }
  0x19   :  { %6358 = vmatprep.subr.bf16.mxu1 %v7792_v28  ;;  %6294 = vmatprep.subr.bf16.mxu0 %v7792_v28  ;;  %v7366_v61 = vld [vmem:[%s9789_s27 + $0x10] ss:$8 sps:$4 sm:$0x3f]   ;;  %v7368_v62 = vld [vmem:[%s9789_s27 + $0x14] ss:$8 sps:$4 sm:$0x3f]  }
  0x1a   :  { %v574_v63 = vand.u32 %v7366_v61, %v7898_v60  ;;  %v577_v2 = vand.u32 %v7368_v62, %v7898_v60  ;;  %v7330_v11 = vld [vmem:[%s9788_s25 + $0x44] ss:$8 sps:$4 sm:$0xff]   ;;  %v7332_v15 = vld [vmem:[%s9788_s25 + $0x40] ss:$8 sps:$4 sm:$0xff]   ;;  %v7333_v17 = vld [vmem:[%s9788_s25 + $0x54] ss:$8 sps:$4 sm:$0xff]  }
  0x1b   :  { %v7311_v18 = vld [vmem:[%s9788_s25 + $0xd0] ss:$8 sps:$4 sm:$0xff]   ;;  %v7312_v22 = vld [vmem:[%s9788_s25 + $0xe4] ss:$8 sps:$4 sm:$0xff]   ;;  %v7314_v23 = vld [vmem:[%s9788_s25 + $0xe0] ss:$8 sps:$4 sm:$0xff]  }
  0x1c   :  { %6359 = vmatpush3.bf16.msra.mxu1 %v7805_v32  ;;  %6295 = vmatpush3.bf16.msra.mxu0 %v7805_v32  ;;  %v7335_v21 = vld [vmem:[%s9788_s25 + $0x50] ss:$8 sps:$4 sm:$0xff]   ;;  %v7338_v24 = vld [vmem:[%s9788_s25 + $0x60] ss:$8 sps:$4 sm:$0xff]   ;;  %v7315_v25 = vld [vmem:[%s9788_s25 + $0xf4] ss:$8 sps:$4 sm:$0xff]  }
  0x1d   :  { %6360 = vmatprep.subr.bf16.mxu1 %v7812_v34  ;;  %6296 = vmatprep.subr.bf16.mxu0 %v7812_v34  ;;  %v7339_v27 = vld [vmem:[%s9788_s25 + $0x74] ss:$8 sps:$4 sm:$0xff]   ;;  %v7317_v29 = vld [vmem:[%s9788_s25 + $0xf0] ss:$8 sps:$4 sm:$0xff]   ;;  %v7344_v31 = vld [vmem:[%s9788_s25 + $0x104] ss:$8 sps:$4 sm:$0xff]  }
  0x1e   :  { %v7341_v30 = vld [vmem:[%s9788_s25 + $0x70] ss:$8 sps:$4 sm:$0xff]   ;;  %v7342_v33 = vld [vmem:[%s9788_s25 + $0x100] ss:$8 sps:$4 sm:$0xff]   ;;  %v7345_v35 = vld [vmem:[%s9788_s25 + $0x114] ss:$8 sps:$4 sm:$0xff]  }
  0x1f   :  { %v7347_v36 = vld [vmem:[%s9788_s25 + $0x110] ss:$8 sps:$4 sm:$0xff]   ;;  %v7348_v37 = vld [vmem:[%s9788_s25 + $0x124] ss:$8 sps:$4 sm:$0xff]   ;;  %v7363_v38 = vld [vmem:[%s9788_s25 + $0x174] ss:$8 sps:$4 sm:$0xff]  }
  0x20   :  { %6361 = vmatpush3.bf16.msra.mxu1 %v7828_v39  ;;  %6297 = vmatpush3.bf16.msra.mxu0 %v7828_v39  ;;  %v7371_v40 = vld [vmem:[%s9788_s25 + $0x184] ss:$8 sps:$4 sm:$0xff]   ;;  %v7369_v42 = vld [vmem:[%s9788_s25 + $0x180] ss:$8 sps:$4 sm:$0xff]   ;;  %v7372_v43 = vld [vmem:[%s9788_s25 + $0x194] ss:$8 sps:$4 sm:$0xff]  }
  0x21   :  { %6362 = vmatprep.subr.bf16.mxu1 %v7835_v41  ;;  %6298 = vmatprep.subr.bf16.mxu0 %v7835_v41  ;;  %v7375_v46 = vld [vmem:[%s9788_s25 + $0x1a4] ss:$8 sps:$4 sm:$0xff]   ;;  %v7378_v48 = vld [vmem:[%s9788_s25 + $0x1b4] ss:$8 sps:$4 sm:$0xff]   ;;  %v7392_v57 = vld [vmem:[%s9788_s25 + $0x1f0] ss:$8 sps:$4 sm:$0xff]  }
  0x22   :  { %v7393_v62 = vld [vmem:[%s9789_s27] ss:$8 sps:$4 sm:$0x3f]  }
  0x24   :  { %6363 = vmatpush3.bf16.msra.mxu1 %v7848_v45  ;;  %6299 = vmatpush3.bf16.msra.mxu0 %v7848_v45 }
  0x25   :  { %6364 = vmatprep.subr.bf16.mxu1 %v7855_v47  ;;  %6300 = vmatprep.subr.bf16.mxu0 %v7855_v47 }
  0x28   :  { %6365 = vmatpush3.bf16.msra.mxu1 %v7862_v49  ;;  %6301 = vmatpush3.bf16.msra.mxu0 %v7862_v49 }
  0x29   :  { %6414 = vmatprep.subr.bf16.mxu1 %v7712_v3  ;;  %579 = vmatprep.subr.bf16.mxu0 %v577_v2 }
  0x2b   :  { %461 = vmatmul.mubr.bf16.vlgmr.msra.gmra.mrb[0].mxu1 %v7294_v50  ;;  %257 = vmatmul.mubr.bf16.vlgmr.msra.gmra.mrb[0].mxu0 %v7318_v52  ;;  %v7381_v50 = vld [vmem:[%s9788_s25 + $0x1c4] ss:$8 sps:$4 sm:$0xff]   ;;  %v7384_v52 = vld [vmem:[%s9788_s25 + $0x1d4] ss:$8 sps:$4 sm:$0xff]  }
  0x2c   :  { %468 = vmatprep.mubr.bf16.mxu1 %v7297_v51  ;;  %264 = vmatprep.mubr.bf16.mxu0 %v7321_v53  ;;  %v7383_v51 = vld [vmem:[%s9788_s25 + $0x1c0] ss:$8 sps:$4 sm:$0xff]   ;;  %v7386_v53 = vld [vmem:[%s9788_s25 + $0x1d0] ss:$8 sps:$4 sm:$0xff]  }
  0x2d   :  { %6415 = vmatpush3.bf16.msra.mxu1 %v7723_v7  ;;  %580 = vmatpush1.bf16.msra.mxu0 %v574_v63 }
  0x2e   :  { %6416 = vmatprep.subr.bf16.mxu1 %v7725_v8 }
  0x31   :  { %6417 = vmatpush3.bf16.msra.mxu1 %v7742_v13 }
  0x32   :  { %6418 = vmatprep.subr.bf16.mxu1 %v7746_v14 }
  0x33   :  { %469 = vmatmul.mubr.bf16.gmra.mrb[4].mxu1 %v7299_v54  ;;  %265 = vmatmul.mubr.bf16.gmra.mrb[4].mxu0 %v7323_v56  ;;  %v7387_v54 = vld [vmem:[%s9788_s25 + $0x1e4] ss:$8 sps:$4 sm:$0xff]   ;;  %v7390_v56 = vld [vmem:[%s9788_s25 + $0x1f4] ss:$8 sps:$4 sm:$0xff]  }
  0x34   :  { %476 = vmatprep.mubr.bf16.mxu1 %v7300_v55  ;;  %272 = vmatprep.mubr.bf16.mxu0 %v7324_v59  ;;  %v7389_v55 = vld [vmem:[%s9788_s25 + $0x1e0] ss:$8 sps:$4 sm:$0xff]  }
  0x35   :  { %6419 = vmatpush3.bf16.msra.mxu1 %v7762_v19 }
  0x36   :  { %6420 = vmatprep.subr.bf16.mxu1 %v7766_v20 }
  0x39   :  { %6421 = vmatpush3.bf16.msra.mxu1 %v7785_v26 }
  0x3a   :  { %6422 = vmatprep.subr.bf16.mxu1 %v7792_v28 }
  0x3b   :  { %477 = vmatmul.mubr.bf16.gmra.mrb[8].mxu1 %v7302_v0  ;;  %273 = vmatmul.mubr.bf16.gmra.mrb[8].mxu0 %v7326_v4 }
  0x3c   :  { %484 = vmatprep.mubr.bf16.mxu1 %v7303_v1  ;;  %280 = vmatprep.mubr.bf16.mxu0 %v7327_v5  ;;  %v7398_v5 = vld [vmem:[%s9789_s27 + $0x24] ss:$8 sps:$4 sm:$0x3f]  }
  0x3d   :  { %6423 = vmatpush3.bf16.msra.mxu1 %v7805_v32 }
  0x3e   :  { %6424 = vmatprep.subr.bf16.mxu1 %v7812_v34 }
  0x41   :  { %6425 = vmatpush3.bf16.msra.mxu1 %v7828_v39 }
  0x42   :  { %6426 = vmatprep.subr.bf16.mxu1 %v7835_v41 }
  0x43   :  { %485 = vmatmul.mubr.bf16.gmra.mrb[12].mxu1 %v7305_v6  ;;  %281 = vmatmul.mubr.bf16.gmra.mrb[12].mxu0 %v7329_v9 }
  0x44   :  { %492 = vmatprep.mubr.bf16.mxu1 %v7306_v10  ;;  %288 = vmatprep.mubr.bf16.mxu0 %v7330_v11 }
  0x45   :  { %6427 = vmatpush3.bf16.msra.mxu1 %v7848_v45 }
  0x46   :  { %6428 = vmatprep.subr.bf16.mxu1 %v7855_v47 }
  0x49   :  { %6429 = vmatpush3.bf16.msra.mxu1 %v7862_v49 }
  0x4a   :  { %6478 = vmatprep.subr.bf16.mxu1 %v7712_v3  ;;  %v7336_v3 = vld [vmem:[%s9788_s25 + $0x64] ss:$8 sps:$4 sm:$0xff]  }
  0x4b   :  { %493 = vmatmul.mubr.bf16.gmra.mrb[16].mxu1 %v7308_v12  ;;  %289 = vmatmul.mubr.bf16.gmra.mrb[16].mxu0 %v7332_v15  ;;  %v725_v12 = vand.u32 %v7393_v62, %v7898_v60 }
  0x4c   :  { %500 = vmatprep.mubr.bf16.mxu1 %v7309_v16  ;;  %296 = vmatprep.mubr.bf16.mxu0 %v7333_v17  ;;  %v1084_v17 = vand.u32 %v7398_v5, %v7898_v60 }
  0x53   :  { %501 = vmatmul.mubr.bf16.gmra.mrb[20].mxu1 %v7311_v18  ;;  %297 = vmatmul.mubr.bf16.gmra.mrb[20].mxu0 %v7335_v21 }
  0x54   :  { %508 = vmatprep.mubr.bf16.mxu1 %v7312_v22  ;;  %304 = vmatprep.mubr.bf16.mxu0 %v7336_v3 }
  0x5b   :  { %509 = vmatmul.mubr.bf16.gmra.mrb[24].mxu1 %v7314_v23  ;;  %305 = vmatmul.mubr.bf16.gmra.mrb[24].mxu0 %v7338_v24 }
  0x5c   :  { %516 = vmatprep.mubr.bf16.mxu1 %v7315_v25  ;;  %312 = vmatprep.mubr.bf16.mxu0 %v7339_v27 }
  0x63   :  { %517 = vmatmul.mubr.bf16.gmra.mrb[28].mxu1 %v7317_v29  ;;  %313 = vmatmul.mubr.bf16.gmra.mrb[28].mxu0 %v7341_v30 }
  0x64   :  { %972 = vmatprep.mubr.bf16.mxu1 %v7344_v31 }
  0x6b   :  { %973 = vmatmul.mubr.bf16.vlgmr.msra.gmra.mrb[32].mxu1 %v7342_v33 }
  0x6c   :  { %980 = vmatprep.mubr.bf16.mxu1 %v7345_v35  ;;  %6479 = vmatpush3.bf16.msra.mxu1 %v7723_v7  ;;  %v7350_v7 = vld [vmem:[%s9788_s25 + $0x120] ss:$8 sps:$4 sm:$0xff]  }
  0x6d   :  { %6480 = vmatprep.subr.bf16.mxu1 %v7725_v8  ;;  %v7351_v8 = vld [vmem:[%s9788_s25 + $0x134] ss:$8 sps:$4 sm:$0xff]  }
  0x70   :  { %6481 = vmatpush3.bf16.msra.mxu1 %v7742_v13  ;;  %v7353_v13 = vld [vmem:[%s9788_s25 + $0x130] ss:$8 sps:$4 sm:$0xff]  }
  0x71   :  { %6482 = vmatprep.subr.bf16.mxu1 %v7746_v14  ;;  %v7354_v14 = vld [vmem:[%s9788_s25 + $0x144] ss:$8 sps:$4 sm:$0xff]  }
  0x73   :  { %981 = vmatmul.mubr.bf16.gmra.mrb[36].mxu1 %v7347_v36 }
  0x74   :  { %988 = vmatprep.mubr.bf16.mxu1 %v7348_v37  ;;  %6483 = vmatpush3.bf16.msra.mxu1 %v7762_v19  ;;  %v7575_v19 = vmov 0  }
  0x75   :  { %6484 = vmatprep.subr.bf16.mxu1 %v7766_v20  ;;  %611 = vmatprep.mubr.bf16.mxu0 %v7575_v19  ;;  %v7356_v20 = vld [vmem:[%s9788_s25 + $0x140] ss:$8 sps:$4 sm:$0xff]  }
  0x78   :  { %6485 = vmatpush3.bf16.msra.mxu1 %v7785_v26  ;;  %v7357_v26 = vld [vmem:[%s9788_s25 + $0x154] ss:$8 sps:$4 sm:$0xff]  }
  0x79   :  { %6486 = vmatprep.subr.bf16.mxu1 %v7792_v28  ;;  %v7359_v28 = vld [vmem:[%s9788_s25 + $0x150] ss:$8 sps:$4 sm:$0xff]  }
  0x7b   :  { %989 = vmatmul.mubr.bf16.gmra.mrb[40].mxu1 %v7350_v7 }
  0x7c   :  { %996 = vmatprep.mubr.bf16.mxu1 %v7351_v8  ;;  %6487 = vmatpush3.bf16.msra.mxu1 %v7805_v32  ;;  %v7360_v32 = vld [vmem:[%s9788_s25 + $0x164] ss:$8 sps:$4 sm:$0xff]  }
  0x7d   :  { %6488 = vmatprep.subr.bf16.mxu1 %v7812_v34  ;;  %v7362_v34 = vld [vmem:[%s9788_s25 + $0x160] ss:$8 sps:$4 sm:$0xff]  }
  0x80   :  { %6489 = vmatpush3.bf16.msra.mxu1 %v7828_v39  ;;  %v7365_v39 = vld [vmem:[%s9788_s25 + $0x170] ss:$8 sps:$4 sm:$0xff]  }
  0x81   :  { %6490 = vmatprep.subr.bf16.mxu1 %v7835_v41  ;;  %v7395_v41 = vld [vmem:[%s9789_s27 + $0x4] ss:$8 sps:$4 sm:$0x3f]  }
  0x82   :  { %v728_v44 = vand.u32 %v7395_v41, %v7898_v60 }
  0x83   :  { %997 = vmatmul.mubr.bf16.gmra.mrb[44].mxu1 %v7353_v13 }
  0x84   :  { %1004 = vmatprep.mubr.bf16.mxu1 %v7354_v14  ;;  %6491 = vmatpush3.bf16.msra.mxu1 %v7848_v45  ;;  %v7374_v45 = vld [vmem:[%s9788_s25 + $0x190] ss:$8 sps:$4 sm:$0xff]  }
  0x85   :  { %6492 = vmatprep.subr.bf16.mxu1 %v7855_v47  ;;  %730 = vmatprep.subr.bf16.mxu0 %v728_v44  ;;  %v7377_v47 = vld [vmem:[%s9788_s25 + $0x1a0] ss:$8 sps:$4 sm:$0xff]  }
  0x88   :  { %6493 = vmatpush3.bf16.msra.mxu1 %v7862_v49  ;;  %v7380_v49 = vld [vmem:[%s9788_s25 + $0x1b0] ss:$8 sps:$4 sm:$0xff]   ;;  %s9812_s25 = sld [smem:[#allocation11_spill]] }
  0x8b   :  { %1005 = vmatmul.mubr.bf16.gmra.mrb[48].mxu1 %v7356_v20 }
  0x8c   :  { %1012 = vmatprep.mubr.bf16.mxu1 %v7357_v26 }
  0x93   :  { %1013 = vmatmul.mubr.bf16.gmra.mrb[52].mxu1 %v7359_v28 }
  0x94   :  { %1020 = vmatprep.mubr.bf16.mxu1 %v7360_v32 }
  0x9b   :  { %1021 = vmatmul.mubr.bf16.gmra.mrb[56].mxu1 %v7362_v34 }
  0x9c   :  { %1028 = vmatprep.mubr.bf16.mxu1 %v7363_v38 }
  0xa3   :  { %1029 = vmatmul.mubr.bf16.gmra.mrb[60].mxu1 %v7365_v39 }
  0xa4   :  { %1360 = vmatprep.mubr.bf16.mxu1 %v7371_v40 }
  0xab   :  { %1361 = vmatmul.mubr.bf16.vlgmr.msra.gmra.mrb[64].mxu1 %v7369_v42 }
  0xac   :  { %1368 = vmatprep.mubr.bf16.mxu1 %v7372_v43 }
  0xb3   :  { %1369 = vmatmul.mubr.bf16.gmra.mrb[68].mxu1 %v7374_v45 }
  0xb4   :  { %1376 = vmatprep.mubr.bf16.mxu1 %v7375_v46 }
  0xbb   :  { %1377 = vmatmul.mubr.bf16.gmra.mrb[72].mxu1 %v7377_v47 }
  0xbc   :  { %1384 = vmatprep.mubr.bf16.mxu1 %v7378_v48 }
  0xc3   :  { %1385 = vmatmul.mubr.bf16.gmra.mrb[76].mxu1 %v7380_v49 }
  0xc4   :  { %1392 = vmatprep.mubr.bf16.mxu1 %v7381_v50 }
  0xcb   :  { %1393 = vmatmul.mubr.bf16.gmra.mrb[80].mxu1 %v7383_v51 }
  0xcc   :  { %1400 = vmatprep.mubr.bf16.mxu1 %v7384_v52 }
  0xd3   :  { %1401 = vmatmul.mubr.bf16.gmra.mrb[84].mxu1 %v7386_v53 }
  0xd4   :  { %1408 = vmatprep.mubr.bf16.mxu1 %v7387_v54 }
  0xdb   :  { %1409 = vmatmul.mubr.bf16.gmra.mrb[88].mxu1 %v7389_v55 }
  0xdc   :  { %1416 = vmatprep.mubr.bf16.mxu1 %v7390_v56 }
  0xe3   :  { %1417 = vmatmul.mubr.bf16.gmra.mrb[92].mxu1 %v7392_v57 }
  0xe4   :  { %2072 = vmatprep.mubr.bf16.mxu1 %v7575_v19 }
  0xfe   :  { %v6366_v58 = vpop.f32.mrb[0].mxu1  ;;  %v6302_v59 = vpop.f32.mrb[0].mxu0 }
  0xff   :  { %v6367_v61 = vpop.f32.mrb[1].mxu1  ;;  %v6303_v63 = vpop.f32.mrb[1].mxu0 }
 0x100   :  { %v6368_v0 = vadd.f32 %v6367_v61, %v6366_v58  ;;  %v6369_v1 = vpop.f32.mrb[2].mxu1  ;;  %v8106_v2 = vadd.f32 %v6303_v63, %v6302_v59  ;;  %v6305_v4 = vpop.f32.mrb[2].mxu0 }
 0x101   :  { %v6370_v6 = vpop.f32.mrb[3].mxu1  ;;  %v6306_v9 = vpop.f32.mrb[3].mxu0 }
 0x102   :  { %v6371_v10 = vadd.f32 %v6370_v6, %v6369_v1  ;;  %v8111_v11 = vadd.f32 %v6306_v9, %v6305_v4 }
 0x104   :  { %v525_v15 = vpack.c.bf16 %v6371_v10, %v6368_v0  ;;  %v321_v16 = vpack.c.bf16 %v8111_v11, %v8106_v2 }
 0x106   :  { %v6372_v18 = vpop.f32.mrb[4].mxu1  ;;  %5742 = vmatmul.mubr.msk.bf16.vlgmr.msra.gmra.mrb[32].mxu0 %vm544_vm2, %v525_v15  ;;  %v6308_v21 = vpop.f32.mrb[4].mxu0 }
 0x107   :  { %v6373_v22 = vpop.f32.mrb[5].mxu1  ;;  %621 = vmatprep.mubr.bf16.mxu0 %v7575_v19  ;;  %731 = vmatpush1.bf16.msra.mxu0 %v725_v12  ;;  %v6309_v3 = vpop.f32.mrb[5].mxu0 }
 0x108   :  { %v6374_v23 = vadd.f32 %v6373_v22, %v6372_v18  ;;  %v6375_v24 = vpop.f32.mrb[6].mxu1  ;;  %v8119_v25 = vadd.f32 %v6309_v3, %v6308_v21  ;;  %v6311_v27 = vpop.f32.mrb[6].mxu0  ;;  %1086 = vmatprep.subr.bf16.mxu0 %v1084_v17 }
 0x109   :  { %v6376_v29 = vpop.f32.mrb[7].mxu1  ;;  %v6312_v30 = vpop.f32.mrb[7].mxu0 }
 0x10a   :  { %v6377_v31 = vadd.f32 %v6376_v29, %v6375_v24  ;;  %v8121_v33 = vadd.f32 %v6312_v30, %v6311_v27 }
 0x10c   :  { %v526_v35 = vpack.c.bf16 %v6377_v31, %v6374_v23  ;;  %v322_v36 = vpack.c.bf16 %v8121_v33, %v8119_v25 }
 0x10e   :  { %v6378_v37 = vpop.f32.mrb[8].mxu1  ;;  %5743 = vmatmul.mubr.msk.bf16.gmra.mrb[36].mxu0 %vm544_vm2, %v526_v35  ;;  %v6314_v7 = vpop.f32.mrb[8].mxu0 }
 0x10f   :  { %v6379_v8 = vpop.f32.mrb[9].mxu1  ;;  %631 = vmatprep.mubr.bf16.mxu0 %v7575_v19  ;;  %v6315_v13 = vpop.f32.mrb[9].mxu0 }
 0x110   :  { %v6380_v14 = vadd.f32 %v6379_v8, %v6378_v37  ;;  %v6381_v20 = vpop.f32.mrb[10].mxu1  ;;  %v8127_v26 = vadd.f32 %v6315_v13, %v6314_v7  ;;  %v6317_v28 = vpop.f32.mrb[10].mxu0 }
 0x111   :  { %v6382_v32 = vpop.f32.mrb[11].mxu1  ;;  %v6318_v34 = vpop.f32.mrb[11].mxu0 }
 0x112   :  { %v6383_v38 = vadd.f32 %v6382_v32, %v6381_v20  ;;  %v8129_v39 = vadd.f32 %v6318_v34, %v6317_v28 }
 0x114   :  { %v527_v40 = vpack.c.bf16 %v6383_v38, %v6380_v14  ;;  %v323_v41 = vpack.c.bf16 %v8129_v39, %v8127_v26 }
 0x116   :  { %v6384_v42 = vpop.f32.mrb[12].mxu1  ;;  %5744 = vmatmul.mubr.msk.bf16.gmra.mrb[40].mxu0 %vm544_vm2, %v527_v40  ;;  %v6320_v43 = vpop.f32.mrb[12].mxu0 }
 0x117   :  { %v6385_v44 = vpop.f32.mrb[13].mxu1  ;;  %641 = vmatprep.mubr.bf16.mxu0 %v7575_v19  ;;  %v6321_v45 = vpop.f32.mrb[13].mxu0 }
 0x118   :  { %v6386_v46 = vadd.f32 %v6385_v44, %v6384_v42  ;;  %v6387_v47 = vpop.f32.mrb[14].mxu1  ;;  %v8135_v48 = vadd.f32 %v6321_v45, %v6320_v43  ;;  %v6323_v49 = vpop.f32.mrb[14].mxu0 }
 0x119   :  { %v6388_v50 = vpop.f32.mrb[15].mxu1  ;;  %v6324_v51 = vpop.f32.mrb[15].mxu0 }
 0x11a   :  { %v6389_v52 = vadd.f32 %v6388_v50, %v6387_v47  ;;  %v8137_v53 = vadd.f32 %v6324_v51, %v6323_v49 }
 0x11c   :  { %v528_v54 = vpack.c.bf16 %v6389_v52, %v6386_v46  ;;  %v324_v55 = vpack.c.bf16 %v8137_v53, %v8135_v48 }
 0x11e   :  { %v6390_v56 = vpop.f32.mrb[16].mxu1  ;;  %5745 = vmatmul.mubr.msk.bf16.gmra.mrb[44].mxu0 %vm544_vm2, %v528_v54  ;;  %v6326_v57 = vpop.f32.mrb[16].mxu0 }
 0x11f   :  { %v6391_v58 = vpop.f32.mrb[17].mxu1  ;;  %651 = vmatprep.mubr.bf16.mxu0 %v7575_v19  ;;  %v6327_v59 = vpop.f32.mrb[17].mxu0 }
 0x120   :  { %v6392_v61 = vadd.f32 %v6391_v58, %v6390_v56  ;;  %v6393_v62 = vpop.f32.mrb[18].mxu1  ;;  %v8143_v63 = vadd.f32 %v6327_v59, %v6326_v57  ;;  %v6329_v0 = vpop.f32.mrb[18].mxu0 }
 0x121   :  { %v6394_v1 = vpop.f32.mrb[19].mxu1  ;;  %v6330_v4 = vpop.f32.mrb[19].mxu0 }
 0x122   :  { %v6395_v5 = vadd.f32 %v6394_v1, %v6393_v62  ;;  %v8145_v6 = vadd.f32 %v6330_v4, %v6329_v0  ;;  %v7396_v1 = vld [vmem:[%s9789_s27 + $0x20] ss:$8 sps:$4 sm:$0x3f]  }
 0x124   :  { %v529_v9 = vpack.c.bf16 %v6395_v5, %v6392_v61  ;;  %v325_v10 = vpack.c.bf16 %v8145_v6, %v8143_v63 }
 0x126   :  { %v6396_v12 = vpop.f32.mrb[20].mxu1  ;;  %5746 = vmatmul.mubr.msk.bf16.gmra.mrb[48].mxu0 %vm544_vm2, %v529_v9  ;;  %v6332_v15 = vpop.f32.mrb[20].mxu0 }
 0x127   :  { %v6397_v17 = vpop.f32.mrb[21].mxu1  ;;  %661 = vmatprep.mubr.bf16.mxu0 %v7575_v19  ;;  %v6333_v18 = vpop.f32.mrb[21].mxu0 }
 0x128   :  { %v6398_v21 = vadd.f32 %v6397_v17, %v6396_v12  ;;  %v6399_v22 = vpop.f32.mrb[22].mxu1  ;;  %v8151_v3 = vadd.f32 %v6333_v18, %v6332_v15  ;;  %v6335_v23 = vpop.f32.mrb[22].mxu0  ;;  %v7401_v12 = vld [vmem:[%s9789_s27 + $0x34] ss:$8 sps:$4 sm:$0x3f]   ;;  %v1081_v18 = vand.u32 %v7396_v1, %v7898_v60 }
 0x129   :  { %v6400_v24 = vpop.f32.mrb[23].mxu1  ;;  %v6336_v27 = vpop.f32.mrb[23].mxu0 }
 0x12a   :  { %v6401_v29 = vadd.f32 %v6400_v24, %v6399_v22  ;;  %v8153_v30 = vadd.f32 %v6336_v27, %v6335_v23  ;;  %v1472_v22 = vand.u32 %v7401_v12, %v7898_v60 }
 0x12c   :  { %v530_v31 = vpack.c.bf16 %v6401_v29, %v6398_v21  ;;  %v326_v35 = vpack.c.bf16 %v8153_v30, %v8151_v3 }
 0x12e   :  { %v6402_v37 = vpop.f32.mrb[24].mxu1  ;;  %5747 = vmatmul.mubr.msk.bf16.gmra.mrb[52].mxu0 %vm544_vm2, %v530_v31  ;;  %v6338_v7 = vpop.f32.mrb[24].mxu0 }
 0x12f   :  { %v6403_v8 = vpop.f32.mrb[25].mxu1  ;;  %671 = vmatprep.mubr.bf16.mxu0 %v7575_v19  ;;  %v6339_v13 = vpop.f32.mrb[25].mxu0 }
 0x130   :  { %v6404_v14 = vadd.f32 %v6403_v8, %v6402_v37  ;;  %v6405_v20 = vpop.f32.mrb[26].mxu1  ;;  %v8159_v28 = vadd.f32 %v6339_v13, %v6338_v7  ;;  %v6341_v32 = vpop.f32.mrb[26].mxu0 }
 0x131   :  { %v6406_v34 = vpop.f32.mrb[27].mxu1  ;;  %v6342_v38 = vpop.f32.mrb[27].mxu0 }
 0x132   :  { %v6407_v40 = vadd.f32 %v6406_v34, %v6405_v20  ;;  %v8161_v42 = vadd.f32 %v6342_v38, %v6341_v32 }
 0x134   :  { %v531_v43 = vpack.c.bf16 %v6407_v40, %v6404_v14  ;;  %v327_v44 = vpack.c.bf16 %v8161_v42, %v8159_v28  ;;  %v7399_v42 = vld [vmem:[%s9789_s27 + $0x30] ss:$8 sps:$4 sm:$0x3f]  }
 0x136   :  { %v6408_v45 = vpop.f32.mrb[28].mxu1  ;;  %5748 = vmatmul.mubr.msk.bf16.gmra.mrb[56].mxu0 %vm544_vm2, %v531_v43  ;;  %v6344_v46 = vpop.f32.mrb[28].mxu0 }
 0x137   :  { %v6409_v47 = vpop.f32.mrb[29].mxu1  ;;  %681 = vmatprep.mubr.bf16.mxu0 %v7575_v19  ;;  %v6345_v49 = vpop.f32.mrb[29].mxu0 }
 0x138   :  { %v6410_v50 = vadd.f32 %v6409_v47, %v6408_v45  ;;  %v6411_v51 = vpop.f32.mrb[30].mxu1  ;;  %v8167_v52 = vadd.f32 %v6345_v49, %v6344_v46  ;;  %v6347_v54 = vpop.f32.mrb[30].mxu0 }
 0x139   :  { %v6412_v56 = vpop.f32.mrb[31].mxu1  ;;  %v6348_v57 = vpop.f32.mrb[31].mxu0 }
 0x13a   :  { %v6413_v58 = vadd.f32 %v6412_v56, %v6411_v51  ;;  %v8169_v59 = vadd.f32 %v6348_v57, %v6347_v54 }
 0x13c   :  { %v532_v61 = vpack.c.bf16 %v6413_v58, %v6410_v50  ;;  %v328_v62 = vpack.c.bf16 %v8169_v59, %v8167_v52 }
 0x13e   :  { %5749 = vmatmul.mubr.msk.bf16.gmra.mrb[60].mxu0 %vm544_vm2, %v532_v61  ;;  %v6430_v0 = vpop.f32.mrb[32].mxu1 }
 0x13f   :  { %762 = vmatprep.mubr.bf16.mxu0 %v7575_v19  ;;  %v6431_v4 = vpop.f32.mrb[33].mxu1 }
 0x140   :  { %v8178_v5 = vadd.f32 %v6431_v4, %v6430_v0  ;;  %v6433_v9 = vpop.f32.mrb[34].mxu1 }
 0x141   :  { %v6434_v15 = vpop.f32.mrb[35].mxu1 }
 0x142   :  { %v8183_v17 = vadd.f32 %v6434_v15, %v6433_v9 }
 0x144   :  { %v1037_v21 = vpack.c.bf16 %v8183_v17, %v8178_v5 }
 0x146   :  { %5752 = vmatmul.mubr.msk.bf16.vlgmr.msra.gmra.mrb[32].mxu0 %vm544_vm2, %v321_v16  ;;  %v6436_v23 = vpop.f32.mrb[36].mxu1 }
 0x147   :  { %772 = vmatprep.mubr.bf16.mxu0 %v7575_v19  ;;  %1087 = vmatpush1.bf16.msra.mxu0 %v1081_v18  ;;  %v6437_v24 = vpop.f32.mrb[37].mxu1 }
 0x148   :  { %v8194_v27 = vadd.f32 %v6437_v24, %v6436_v23  ;;  %v6439_v29 = vpop.f32.mrb[38].mxu1  ;;  %1474 = vmatprep.subr.bf16.mxu0 %v1472_v22  ;;  %v1469_v23 = vand.u32 %v7399_v42, %v7898_v60 }
 0x149   :  { %v6440_v31 = vpop.f32.mrb[39].mxu1 }
 0x14a   :  { %v8196_v37 = vadd.f32 %v6440_v31, %v6439_v29 }
 0x14c   :  { %v1038_v7 = vpack.c.bf16 %v8196_v37, %v8194_v27 }
 0x14e   :  { %5753 = vmatmul.mubr.msk.bf16.gmra.mrb[36].mxu0 %vm544_vm2, %v322_v36  ;;  %v6442_v2 = vpop.f32.mrb[40].mxu1 }
 0x14f   :  { %782 = vmatprep.mubr.bf16.mxu0 %v7575_v19  ;;  %v6443_v11 = vpop.f32.mrb[41].mxu1 }
 0x150   :  { %v8205_v16 = vadd.f32 %v6443_v11, %v6442_v2  ;;  %v6445_v8 = vpop.f32.mrb[42].mxu1 }
 0x151   :  { %v6446_v13 = vpop.f32.mrb[43].mxu1 }
 0x152   :  { %v8207_v14 = vadd.f32 %v6446_v13, %v6445_v8 }
 0x154   :  { %v1039_v20 = vpack.c.bf16 %v8207_v14, %v8205_v16 }
 0x156   :  { %5754 = vmatmul.mubr.msk.bf16.gmra.mrb[40].mxu0 %vm544_vm2, %v323_v41  ;;  %v6448_v25 = vpop.f32.mrb[44].mxu1 }
 0x157   :  { %792 = vmatprep.mubr.bf16.mxu0 %v7575_v19  ;;  %v6449_v33 = vpop.f32.mrb[45].mxu1 }
 0x158   :  { %v8216_v36 = vadd.f32 %v6449_v33, %v6448_v25  ;;  %v6451_v32 = vpop.f32.mrb[46].mxu1 }
 0x159   :  { %v6452_v34 = vpop.f32.mrb[47].mxu1 }
 0x15a   :  { %v8218_v38 = vadd.f32 %v6452_v34, %v6451_v32 }
 0x15c   :  { %v1040_v40 = vpack.c.bf16 %v8218_v38, %v8216_v36 }
 0x15e   :  { %5755 = vmatmul.mubr.msk.bf16.gmra.mrb[44].mxu0 %vm544_vm2, %v324_v55  ;;  %v6454_v26 = vpop.f32.mrb[48].mxu1 }
 0x15f   :  { %802 = vmatprep.mubr.bf16.mxu0 %v7575_v19  ;;  %v6455_v39 = vpop.f32.mrb[49].mxu1 }
 0x160   :  { %v8227_v41 = vadd.f32 %v6455_v39, %v6454_v26  ;;  %v6457_v43 = vpop.f32.mrb[50].mxu1 }
 0x161   :  { %v6458_v45 = vpop.f32.mrb[51].mxu1 }
 0x162   :  { %v8229_v46 = vadd.f32 %v6458_v45, %v6457_v43 }
 0x164   :  { %v1041_v47 = vpack.c.bf16 %v8229_v46, %v8227_v41 }
 0x166   :  { %5756 = vmatmul.mubr.msk.bf16.gmra.mrb[48].mxu0 %vm544_vm2, %v325_v10  ;;  %v6460_v48 = vpop.f32.mrb[52].mxu1 }
 0x167   :  { %812 = vmatprep.mubr.bf16.mxu0 %v7575_v19  ;;  %v6461_v53 = vpop.f32.mrb[53].mxu1 }
 0x168   :  { %v8238_v55 = vadd.f32 %v6461_v53, %v6460_v48  ;;  %v6463_v49 = vpop.f32.mrb[54].mxu1 }
 0x169   :  { %v6464_v50 = vpop.f32.mrb[55].mxu1 }
 0x16a   :  { %v8240_v51 = vadd.f32 %v6464_v50, %v6463_v49 }
 0x16c   :  { %v1042_v54 = vpack.c.bf16 %v8240_v51, %v8238_v55 }
 0x16e   :  { %5757 = vmatmul.mubr.msk.bf16.gmra.mrb[52].mxu0 %vm544_vm2, %v326_v35  ;;  %v6466_v63 = vpop.f32.mrb[56].mxu1 }
 0x16f   :  { %822 = vmatprep.mubr.bf16.mxu0 %v7575_v19  ;;  %v6467_v6 = vpop.f32.mrb[57].mxu1 }
 0x170   :  { %v8249_v10 = vadd.f32 %v6467_v6, %v6466_v63  ;;  %v6469_v56 = vpop.f32.mrb[58].mxu1 }
 0x171   :  { %v6470_v57 = vpop.f32.mrb[59].mxu1 }
 0x172   :  { %v8251_v58 = vadd.f32 %v6470_v57, %v6469_v56 }
 0x174   :  { %v1043_v61 = vpack.c.bf16 %v8251_v58, %v8249_v10 }
 0x176   :  { %5758 = vmatmul.mubr.msk.bf16.gmra.mrb[56].mxu0 %vm544_vm2, %v327_v44  ;;  %v6472_v3 = vpop.f32.mrb[60].mxu1 }
 0x177   :  { %832 = vmatprep.mubr.bf16.mxu0 %v7575_v19  ;;  %v6473_v30 = vpop.f32.mrb[61].mxu1 }
 0x178   :  { %v8260_v35 = vadd.f32 %v6473_v30, %v6472_v3  ;;  %v6475_v0 = vpop.f32.mrb[62].mxu1 }
 0x179   :  { %v6476_v1 = vpop.f32.mrb[63].mxu1 }
 0x17a   :  { %v8262_v4 = vadd.f32 %v6476_v1, %v6475_v0 }
 0x17c   :  { %v1044_v9 = vpack.c.bf16 %v8262_v4, %v8260_v35 }
 0x17e   :  { %5759 = vmatmul.mubr.msk.bf16.gmra.mrb[60].mxu0 %vm544_vm2, %v328_v62  ;;  %v6494_v28 = vpop.f32.mrb[64].mxu1 }
 0x17f   :  { %1118 = vmatprep.mubr.bf16.mxu0 %v7575_v19  ;;  %v6495_v44 = vpop.f32.mrb[65].mxu1 }
 0x180   :  { %v8274_v12 = vadd.f32 %v6495_v44, %v6494_v28  ;;  %v6497_v15 = vpop.f32.mrb[66].mxu1 }
 0x181   :  { %v6498_v18 = vpop.f32.mrb[67].mxu1 }
 0x182   :  { %v8276_v22 = vadd.f32 %v6498_v18, %v6497_v15 }
 0x184   :  { %v1425_v52 = vpack.c.bf16 %v8276_v22, %v8274_v12 }
 0x186   :  { %5796 = vmatmul.mubr.msk.bf16.vlgmr.msra.gmra.mrb[32].mxu0 %vm544_vm2, %v1037_v21  ;;  %v6500_v59 = vpop.f32.mrb[68].mxu1 }
 0x187   :  { %1128 = vmatprep.mubr.bf16.mxu0 %v7575_v19  ;;  %1475 = vmatpush1.bf16.msra.mxu0 %v1469_v23  ;;  %v6501_v62 = vpop.f32.mrb[69].mxu1 }
 0x188   :  { %v8286_v24 = vadd.f32 %v6501_v62, %v6500_v59  ;;  %v6503_v29 = vpop.f32.mrb[70].mxu1 }
 0x189   :  { %v6504_v31 = vpop.f32.mrb[71].mxu1 }
 0x18a   :  { %v6505_v2 = vadd.f32 %v6504_v31, %v6503_v29 }
 0x18c   :  { %v1426_v60 = vpack.c.bf16 %v6505_v2, %v8286_v24 }
 0x18e   :  { %5797 = vmatmul.mubr.msk.bf16.gmra.mrb[36].mxu0 %vm544_vm2, %v1038_v7  ;;  %v6506_v5 = vpop.f32.mrb[72].mxu1 }
 0x18f   :  { %1138 = vmatprep.mubr.bf16.mxu0 %v7575_v19  ;;  %v6507_v17 = vpop.f32.mrb[73].mxu1 }
 0x190   :  { %v6508_v21 = vadd.f32 %v6507_v17, %v6506_v5  ;;  %v6509_v11 = vpop.f32.mrb[74].mxu1 }
 0x191   :  { %v6510_v8 = vpop.f32.mrb[75].mxu1 }
 0x192   :  { %v6511_v13 = vadd.f32 %v6510_v8, %v6509_v11 }
 0x194   :  { %v1427_v25 = vpack.c.bf16 %v6511_v13, %v6508_v21 }
 0x196   :  { %5798 = vmatmul.mubr.msk.bf16.gmra.mrb[40].mxu0 %vm544_vm2, %v1039_v20  ;;  %v6512_v33 = vpop.f32.mrb[76].mxu1 }
 0x197   :  { %1148 = vmatprep.mubr.bf16.mxu0 %v7575_v19  ;;  %v6513_v27 = vpop.f32.mrb[77].mxu1 }
 0x198   :  { %v6514_v37 = vadd.f32 %v6513_v27, %v6512_v33  ;;  %v6515_v7 = vpop.f32.mrb[78].mxu1 }
 0x199   :  { %v6516_v32 = vpop.f32.mrb[79].mxu1 }
 0x19a   :  { %v6517_v34 = vadd.f32 %v6516_v32, %v6515_v7 }
 0x19c   :  { %v1428_v26 = vpack.c.bf16 %v6517_v34, %v6514_v37 }
 0x19e   :  { %5799 = vmatmul.mubr.msk.bf16.gmra.mrb[44].mxu0 %vm544_vm2, %v1040_v40  ;;  %v6518_v39 = vpop.f32.mrb[80].mxu1 }
 0x19f   :  { %1158 = vmatprep.mubr.bf16.mxu0 %v7575_v19  ;;  %v6519_v16 = vpop.f32.mrb[81].mxu1 }
 0x1a0   :  { %v6520_v14 = vadd.f32 %v6519_v16, %v6518_v39  ;;  %v6521_v20 = vpop.f32.mrb[82].mxu1 }
 0x1a1   :  { %v6522_v43 = vpop.f32.mrb[83].mxu1 }
 0x1a2   :  { %v6523_v45 = vadd.f32 %v6522_v43, %v6521_v20 }
 0x1a4   :  { %v1429_v48 = vpack.c.bf16 %v6523_v45, %v6520_v14 }
 0x1a6   :  { %5800 = vmatmul.mubr.msk.bf16.gmra.mrb[48].mxu0 %vm544_vm2, %v1041_v47  ;;  %v6524_v53 = vpop.f32.mrb[84].mxu1 }
 0x1a7   :  { %1168 = vmatprep.mubr.bf16.mxu0 %v7575_v19  ;;  %v6525_v36 = vpop.f32.mrb[85].mxu1 }
 0x1a8   :  { %v6526_v38 = vadd.f32 %v6525_v36, %v6524_v53  ;;  %v6527_v40 = vpop.f32.mrb[86].mxu1 }
 0x1a9   :  { %v6528_v49 = vpop.f32.mrb[87].mxu1 }
 0x1aa   :  { %v6529_v50 = vadd.f32 %v6528_v49, %v6527_v40 }
 0x1ac   :  { %v1430_v63 = vpack.c.bf16 %v6529_v50, %v6526_v38 }
 0x1ae   :  { %5801 = vmatmul.mubr.msk.bf16.gmra.mrb[52].mxu0 %vm544_vm2, %v1042_v54  ;;  %v6530_v6 = vpop.f32.mrb[88].mxu1 }
 0x1af   :  { %1178 = vmatprep.mubr.bf16.mxu0 %v7575_v19  ;;  %v6531_v41 = vpop.f32.mrb[89].mxu1 }
 0x1b0   :  { %v6532_v46 = vadd.f32 %v6531_v41, %v6530_v6  ;;  %v6533_v47 = vpop.f32.mrb[90].mxu1 }
 0x1b1   :  { %v6534_v56 = vpop.f32.mrb[91].mxu1 }
 0x1b2   :  { %v6535_v57 = vadd.f32 %v6534_v56, %v6533_v47 }
 0x1b4   :  { %v1431_v3 = vpack.c.bf16 %v6535_v57, %v6532_v46 }
 0x1b6   :  { %5802 = vmatmul.mubr.msk.bf16.gmra.mrb[56].mxu0 %vm544_vm2, %v1043_v61  ;;  %v6536_v30 = vpop.f32.mrb[92].mxu1 }
 0x1b7   :  { %1188 = vmatprep.mubr.bf16.mxu0 %v7575_v19  ;;  %v6537_v55 = vpop.f32.mrb[93].mxu1 }
 0x1b8   :  { %v6538_v51 = vadd.f32 %v6537_v55, %v6536_v30  ;;  %v6539_v54 = vpop.f32.mrb[94].mxu1 }
 0x1b9   :  { %v6540_v0 = vpop.f32.mrb[95].mxu1 }
 0x1ba   :  { %v6541_v1 = vadd.f32 %v6540_v0, %v6539_v54 }
 0x1bc   :  { %v1432_v28 = vpack.c.bf16 %v6541_v1, %v6538_v51 }
 0x1be   :  { %5803 = vmatmul.mubr.msk.bf16.gmra.mrb[60].mxu0 %vm544_vm2, %v1044_v9 }
 0x1bf   :  { %1506 = vmatprep.mubr.bf16.mxu0 %v7575_v19 }
 0x1c6   :  { %5840 = vmatmul.mubr.msk.bf16.vlgmr.msra.gmra.mrb[32].mxu0 %vm544_vm2, %v1425_v52 }
 0x1c7   :  { %1516 = vmatprep.mubr.bf16.mxu0 %v7575_v19 }
 0x1ce   :  { %5841 = vmatmul.mubr.msk.bf16.gmra.mrb[36].mxu0 %vm544_vm2, %v1426_v60 }
 0x1cf   :  { %1526 = vmatprep.mubr.bf16.mxu0 %v7575_v19 }
 0x1d6   :  { %5842 = vmatmul.mubr.msk.bf16.gmra.mrb[40].mxu0 %vm544_vm2, %v1427_v25 }
 0x1d7   :  { %1536 = vmatprep.mubr.bf16.mxu0 %v7575_v19 }
 0x1de   :  { %5843 = vmatmul.mubr.msk.bf16.gmra.mrb[44].mxu0 %vm544_vm2, %v1428_v26 }
 0x1df   :  { %1546 = vmatprep.mubr.bf16.mxu0 %v7575_v19 }
 0x1e6   :  { %5844 = vmatmul.mubr.msk.bf16.gmra.mrb[48].mxu0 %vm544_vm2, %v1429_v48 }
 0x1e7   :  { %1556 = vmatprep.mubr.bf16.mxu0 %v7575_v19 }
 0x1ee   :  { %5845 = vmatmul.mubr.msk.bf16.gmra.mrb[52].mxu0 %vm544_vm2, %v1430_v63 }
 0x1ef   :  { %1566 = vmatprep.mubr.bf16.mxu0 %v7575_v19 }
 0x1f6   :  { %5846 = vmatmul.mubr.msk.bf16.gmra.mrb[56].mxu0 %vm544_vm2, %v1431_v3 }
 0x1f7   :  { %1576 = vmatprep.mubr.bf16.mxu0 %v7575_v19 }
 0x1fe   :  { %5847 = vmatmul.mubr.msk.bf16.gmra.mrb[60].mxu0 %vm544_vm2, %v1432_v28 }
 0x1ff   :  { %2687 = vmatprep.mubr.bf16.mxu0 %v7575_v19 }
 0x299   :  { %v8343_v10 = vpop.f32.mrb[32].mxu0 }
 0x29a   :  { %v8345_v58 = vpop.f32.mrb[33].mxu0 }
 0x29b   :  { %v8347_v61 = vpop.f32.mrb[34].mxu0 }
 0x29c   :  { %v1619_v35 = vadd.f32 %v8347_v61, %v8343_v10  ;;  %v8351_v4 = vpop.f32.mrb[35].mxu0 }
 0x29d   :  { %v1640_v9 = vadd.f32 %v8351_v4, %v8345_v58 }
 0x2a1   :  { %v8355_v42 = vpop.f32.mrb[36].mxu0 }
 0x2a2   :  { %v1620_v44 = vadd.f32 %v1619_v35, %v8355_v42  ;;  %v8358_v12 = vpop.f32.mrb[37].mxu0 }
 0x2a3   :  { %v1641_v15 = vadd.f32 %v1640_v9, %v8358_v12  ;;  %v8361_v18 = vpop.f32.mrb[38].mxu0 }
 0x2a4   :  { %v1621_v22 = vadd.f32 %v1620_v44, %v8361_v18  ;;  %v8364_v23 = vpop.f32.mrb[39].mxu0 }
 0x2a5   :  { %v1642_v52 = vadd.f32 %v1641_v15, %v8364_v23 }
 0x2a9   :  { %v8367_v59 = vpop.f32.mrb[40].mxu0 }
 0x2aa   :  { %v1622_v62 = vadd.f32 %v1621_v22, %v8367_v59  ;;  %v8370_v24 = vpop.f32.mrb[41].mxu0 }
 0x2ab   :  { %v1643_v29 = vadd.f32 %v1642_v52, %v8370_v24  ;;  %v8373_v31 = vpop.f32.mrb[42].mxu0 }
 0x2ac   :  { %v1623_v2 = vadd.f32 %v1622_v62, %v8373_v31  ;;  %v8376_v60 = vpop.f32.mrb[43].mxu0 }
 0x2ad   :  { %v1644_v5 = vadd.f32 %v1643_v29, %v8376_v60 }
 0x2b1   :  { %v1538_v17 = vpop.f32.mrb[44].mxu0 }
 0x2b2   :  { %v1624_v21 = vadd.f32 %v1623_v2, %v1538_v17  ;;  %v8379_v11 = vpop.f32.mrb[45].mxu0 }
 0x2b3   :  { %v1645_v8 = vadd.f32 %v1644_v5, %v8379_v11  ;;  %v1542_v13 = vpop.f32.mrb[46].mxu0 }
 0x2b4   :  { %v1625_v25 = vadd.f32 %v1624_v21, %v1542_v13  ;;  %v8382_v33 = vpop.f32.mrb[47].mxu0 }
 0x2b5   :  { %v1646_v27 = vadd.f32 %v1645_v8, %v8382_v33 }
 0x2b9   :  { %v1548_v37 = vpop.f32.mrb[48].mxu0 }
 0x2ba   :  { %v1626_v7 = vadd.f32 %v1625_v25, %v1548_v37  ;;  %v8385_v32 = vpop.f32.mrb[49].mxu0 }
 0x2bb   :  { %v1647_v34 = vadd.f32 %v1646_v27, %v8385_v32  ;;  %v1552_v26 = vpop.f32.mrb[50].mxu0 }
 0x2bc   :  { %v1627_v39 = vadd.f32 %v1626_v7, %v1552_v26  ;;  %v8388_v16 = vpop.f32.mrb[51].mxu0 }
 0x2bd   :  { %v1648_v14 = vadd.f32 %v1647_v34, %v8388_v16 }
 0x2c1   :  { %v1558_v20 = vpop.f32.mrb[52].mxu0 }
 0x2c2   :  { %v1628_v43 = vadd.f32 %v1627_v39, %v1558_v20  ;;  %v8391_v45 = vpop.f32.mrb[53].mxu0 }
 0x2c3   :  { %v1649_v48 = vadd.f32 %v1648_v14, %v8391_v45  ;;  %v1562_v53 = vpop.f32.mrb[54].mxu0 }
 0x2c4   :  { %v1629_v36 = vadd.f32 %v1628_v43, %v1562_v53  ;;  %v8394_v38 = vpop.f32.mrb[55].mxu0 }
 0x2c5   :  { %v1650_v40 = vadd.f32 %v1649_v48, %v8394_v38 }
 0x2c9   :  { %v1568_v49 = vpop.f32.mrb[56].mxu0 }
 0x2ca   :  { %v1630_v50 = vadd.f32 %v1629_v36, %v1568_v49  ;;  %v8397_v63 = vpop.f32.mrb[57].mxu0 }
 0x2cb   :  { %v1651_v6 = vadd.f32 %v1650_v40, %v8397_v63  ;;  %v1572_v41 = vpop.f32.mrb[58].mxu0 }
 0x2cc   :  { %v1631_v46 = vadd.f32 %v1630_v50, %v1572_v41  ;;  %v1574_v47 = vpop.f32.mrb[59].mxu0 }
 0x2cd   :  { %v1652_v56 = vadd.f32 %v1651_v6, %v1574_v47 }
 0x2d1   :  { %v1578_v57 = vpop.f32.mrb[60].mxu0 }
 0x2d2   :  { %v1632_v3 = vadd.f32 %v1631_v46, %v1578_v57  ;;  %v1580_v30 = vpop.f32.mrb[61].mxu0 }
 0x2d3   :  { %v1653_v55 = vadd.f32 %v1652_v56, %v1580_v30  ;;  %v1582_v51 = vpop.f32.mrb[62].mxu0 }
 0x2d4   :  { %v1633_v54 = vadd.f32 %v1632_v3, %v1582_v51  ;;  %v1584_v0 = vpop.f32.mrb[63].mxu0 }
 0x2d5   :  { %v1654_v1 = vadd.f32 %v1653_v55, %v1584_v0 }
 0x2d6   :  { %v1634_v28 = vrot.slane %v1633_v54, 4 }
 0x2d7   :  { %v1655_v35 = vrot.slane %v1654_v1, 4 }
 0x2d8   :  { %v1635_v9 = vadd.f32 %v1634_v28, %v1633_v54 }
 0x2d9   :  { %v1656_v44 = vadd.f32 %v1655_v35, %v1654_v1 }
 0x2da   :  { %v1636_v15 = vrot.slane %v1635_v9, 2 }
 0x2db   :  { %v1657_v22 = vrot.slane %v1656_v44, 2 }
 0x2dc   :  { %v1637_v52 = vadd.f32 %v1636_v15, %v1635_v9 }
 0x2dd   :  { %v1658_v62 = vadd.f32 %v1657_v22, %v1656_v44 }
 0x2de   :  { %v1638_v29 = vrot.slane %v1637_v52, 1 }
 0x2df   :  { %v1659_v2 = vrot.slane %v1658_v62, 1 }
 0x2e0   :  { %v1639_v5 = vadd.f32 %v1638_v29, %v1637_v52 }
 0x2e1   :  { %v1660_v21 = vadd.f32 %v1659_v2, %v1658_v62 }
 0x2e2   :  { %v1662_v8 = vmul.f32 0.0078125, %v1639_v5 }
 0x2e3   :  { %v1663_v25 = vmul.f32 0.0078125, %v1660_v21 }
 0x2e4   :  { %v8401_v27 = vsub.f32 %v8343_v10, %v1662_v8  ;;  %v8404_v7 = vsub.f32 %v8347_v61, %v1662_v8  ;;  %v8407_v34 = vsub.f32 %v8355_v42, %v1662_v8  ;;  %v8410_v39 = vsub.f32 %v8361_v18, %v1662_v8 }
 0x2e5   :  { %v8413_v14 = vsub.f32 %v8367_v59, %v1662_v8  ;;  %v8416_v43 = vsub.f32 %v8373_v31, %v1662_v8  ;;  %v8418_v48 = vsub.f32 %v1538_v17, %v1662_v8  ;;  %v8420_v36 = vsub.f32 %v1542_v13, %v1662_v8 }
 0x2e6   :  { %v8422_v10 = vsub.f32 %v1548_v37, %v1662_v8  ;;  %v8424_v61 = vsub.f32 %v1552_v26, %v1662_v8  ;;  %v8426_v40 = vsub.f32 %v1558_v20, %v1662_v8  ;;  %v8428_v42 = vsub.f32 %v1562_v53, %v1662_v8 }
 0x2e7   :  { %v8430_v18 = vsub.f32 %v1568_v49, %v1662_v8  ;;  %v8432_v50 = vsub.f32 %v1572_v41, %v1662_v8  ;;  %v8434_v59 = vsub.f32 %v1578_v57, %v1662_v8  ;;  %v8436_v31 = vsub.f32 %v1582_v51, %v1662_v8 }
 0x2e8   :  { %v1696_v17 = vmul.f32 %v8401_v27, %v8401_v27  ;;  %v1698_v13 = vmul.f32 %v8404_v7, %v8404_v7  ;;  %v1700_v37 = vmul.f32 %v8407_v34, %v8407_v34  ;;  %v1702_v26 = vmul.f32 %v8410_v39, %v8410_v39 }
 0x2e9   :  { %v8447_v53 = vsub.f32 %v8345_v58, %v1663_v25  ;;  %v8450_v49 = vsub.f32 %v8351_v4, %v1663_v25  ;;  %v8453_v6 = vsub.f32 %v8358_v12, %v1663_v25  ;;  %v8456_v41 = vsub.f32 %v8364_v23, %v1663_v25 }
 0x2ea   :  { %v1728_v20 = vadd.f32 %v1698_v13, %v1696_v17  ;;  %v8459_v46 = vsub.f32 %v8370_v24, %v1663_v25  ;;  %v8462_v56 = vsub.f32 %v8376_v60, %v1663_v25  ;;  %v8465_v57 = vsub.f32 %v8379_v11, %v1663_v25 }
 0x2eb   :  { %v8468_v3 = vsub.f32 %v8382_v33, %v1663_v25  ;;  %v8471_v4 = vsub.f32 %v8385_v32, %v1663_v25  ;;  %v8474_v12 = vsub.f32 %v8388_v16, %v1663_v25  ;;  %v8477_v23 = vsub.f32 %v8391_v45, %v1663_v25 }
 0x2ec   :  { %v1729_v58 = vadd.f32 %v1728_v20, %v1700_v37  ;;  %v8480_v24 = vsub.f32 %v8394_v38, %v1663_v25  ;;  %v8483_v60 = vsub.f32 %v8397_v63, %v1663_v25  ;;  %v8485_v11 = vsub.f32 %v1574_v47, %v1663_v25 }
 0x2ed   :  { %v1704_v33 = vmul.f32 %v8413_v14, %v8413_v14  ;;  %v8489_v32 = vsub.f32 %v1580_v30, %v1663_v25  ;;  %v8491_v51 = vsub.f32 %v1584_v0, %v1663_v25  ;;  %v1697_v16 = vmul.f32 %v8447_v53, %v8447_v53 }
 0x2ee   :  { %v1730_v55 = vadd.f32 %v1729_v58, %v1702_v26  ;;  %v1699_v45 = vmul.f32 %v8450_v49, %v8450_v49  ;;  %v1706_v38 = vmul.f32 %v8416_v43, %v8416_v43  ;;  %v1708_v47 = vmul.f32 %v8418_v48, %v8418_v48 }
 0x2ef   :  { %v1701_v30 = vmul.f32 %v8453_v6, %v8453_v6  ;;  %v1710_v0 = vmul.f32 %v8420_v36, %v8420_v36  ;;  %v1703_v35 = vmul.f32 %v8456_v41, %v8456_v41  ;;  %v1712_v44 = vmul.f32 %v8422_v10, %v8422_v10 }
 0x2f0   :  { %v1731_v63 = vadd.f32 %v1730_v55, %v1704_v33  ;;  %v1749_v1 = vadd.f32 %v1699_v45, %v1697_v16  ;;  %v1705_v22 = vmul.f32 %v8459_v46, %v8459_v46  ;;  %v1714_v62 = vmul.f32 %v8424_v61, %v8424_v61 }
 0x2f1   :  { %v1707_v2 = vmul.f32 %v8462_v56, %v8462_v56  ;;  %v1716_v21 = vmul.f32 %v8426_v40, %v8426_v40  ;;  %v1709_v25 = vmul.f32 %v8465_v57, %v8465_v57  ;;  %v1718_v13 = vmul.f32 %v8428_v42, %v8428_v42 }
 0x2f2   :  { %v1732_v54 = vadd.f32 %v1731_v63, %v1706_v38  ;;  %v1750_v9 = vadd.f32 %v1749_v1, %v1701_v30  ;;  %v1711_v26 = vmul.f32 %v8468_v3, %v8468_v3  ;;  %v1720_v58 = vmul.f32 %v8430_v18, %v8430_v18 }
 0x2f3   :  { %v1713_v55 = vmul.f32 %v8471_v4, %v8471_v4  ;;  %v1722_v45 = vmul.f32 %v8432_v50, %v8432_v50  ;;  %v1715_v63 = vmul.f32 %v8474_v12, %v8474_v12  ;;  %v1717_v1 = vmul.f32 %v8477_v23, %v8477_v23 }
 0x2f4   :  { %v1733_v28 = vadd.f32 %v1732_v54, %v1708_v47  ;;  %v1751_v52 = vadd.f32 %v1750_v9, %v1703_v35  ;;  %v1724_v54 = vmul.f32 %v8434_v59, %v8434_v59  ;;  %v1719_v9 = vmul.f32 %v8480_v24, %v8480_v24 }
 0x2f6   :  { %v1734_v15 = vadd.f32 %v1733_v28, %v1710_v0  ;;  %v1752_v5 = vadd.f32 %v1751_v52, %v1705_v22  ;;  %v1726_v28 = vmul.f32 %v8436_v31, %v8436_v31  ;;  %v1721_v22 = vmul.f32 %v8483_v60, %v8483_v60 }
 0x2f8   :  { %v1735_v29 = vadd.f32 %v1734_v15, %v1712_v44  ;;  %v1753_v17 = vadd.f32 %v1752_v5, %v1707_v2 }
 0x2fa   :  { %v1736_v8 = vadd.f32 %v1735_v29, %v1714_v62  ;;  %v1754_v20 = vadd.f32 %v1753_v17, %v1709_v25  ;;  %v1723_v29 = vmul.f32 %v8485_v11, %v8485_v11  ;;  %v1727_v17 = vmul.f32 %v8491_v51, %v8491_v51 }
 0x2fc   :  { %v1737_v37 = vadd.f32 %v1736_v8, %v1716_v21  ;;  %v1755_v16 = vadd.f32 %v1754_v20, %v1711_v26  ;;  %v1725_v21 = vmul.f32 %v8489_v32, %v8489_v32 }
 0x2fe   :  { %v1738_v33 = vadd.f32 %v1737_v37, %v1718_v13  ;;  %v1756_v47 = vadd.f32 %v1755_v16, %v1713_v55 }
 0x300   :  { %v1739_v38 = vadd.f32 %v1738_v33, %v1720_v58  ;;  %v1757_v0 = vadd.f32 %v1756_v47, %v1715_v63 }
 0x302   :  { %v1740_v30 = vadd.f32 %v1739_v38, %v1722_v45  ;;  %v1758_v44 = vadd.f32 %v1757_v0, %v1717_v1  ;;  %v1810_v45 = vlaneseq  ;;  %v1808_v0 = vld [vmem:[%s9790_s10] sm:$0x3] }
 0x304   :  { %v1741_v35 = vadd.f32 %v1740_v30, %v1724_v54  ;;  %v1759_v52 = vadd.f32 %v1758_v44, %v1719_v9  ;;  %v1811_v54 = vshrl.u32 %v1810_v45, 7  ;;  %v1852_v9 = vld [vmem:[%s9791_s6] sm:$0x3] }
 0x306   :  { %v1742_v15 = vadd.f32 %v1741_v35, %v1726_v28  ;;  %v1760_v2 = vadd.f32 %v1759_v52, %v1721_v22  ;;  %v1812_v28 = vsub.s32 0, %v1811_v54 }
 0x308   :  { %v1743_v62 = vrot.slane %v1742_v15, 4  ;;  %v1761_v8 = vadd.f32 %v1760_v2, %v1723_v29  ;;  %v8553_v22 = vrot.slane %v1808_v0, %v1812_v28 }
 0x30a   :  { %v1744_v5 = vadd.f32 %v1743_v62, %v1742_v15  ;;  %v1762_v13 = vadd.f32 %v1761_v8, %v1725_v21  ;;  %v1816_v15 = vsub.s32 1, %v1811_v54  ;;  %v8557_v62 = vrot.slane %v1852_v9, %v1812_v28 }
 0x30c   :  { %v1745_v25 = vrot.slane %v1744_v5, 2  ;;  %v1763_v26 = vadd.f32 %v1762_v13, %v1727_v17 }
 0x30e   :  { %v1746_v37 = vadd.f32 %v1745_v25, %v1744_v5  ;;  %v1764_v58 = vrot.slane %v1763_v26, 4 }
 0x310   :  { %v1747_v20 = vrot.slane %v1746_v37, 1  ;;  %v1765_v55 = vadd.f32 %v1764_v58, %v1763_v26 }
 0x312   :  { %v1748_v33 = vadd.f32 %v1747_v20, %v1746_v37  ;;  %v1766_v38 = vrot.slane %v1765_v55, 2 }
 0x314   :  { %v1770_v16 = vmul.f32 0.0078125, %v1748_v33  ;;  %v1767_v47 = vadd.f32 %v1766_v38, %v1765_v55 }
 0x316   :  { %v1772_v63 = vadd.f32 1e-05, %v1770_v16  ;;  %v1768_v30 = vrot.slane %v1767_v47, 1 }
 0x318   :  { %7558 = vrsqrt.f32 %v1772_v63  ;;  %v1769_v1 = vadd.f32 %v1768_v30, %v1767_v47 }
 0x31a   :  { %v1771_v35 = vmul.f32 0.0078125, %v1769_v1 }
 0x31c   :  { %v1773_v44 = vadd.f32 1e-05, %v1771_v35 }
 0x31e   :  { %7560 = vrsqrt.f32 %v1773_v44 }
 0x322   :  { %v8555_v52 = vpop.eup %7558 }
 0x323   :  { %v8561_v29 = vmul.f32 %v8555_v52, %v8432_v50  ;;  %v8565_v2 = vmul.f32 %v8555_v52, %v8434_v59  ;;  %v1806_v5 = vmul.f32 %v8555_v52, %v8436_v31  ;;  %v1776_v21 = vmul.f32 %v8555_v52, %v8401_v27 }
 0x324   :  { %v1778_v8 = vmul.f32 %v8555_v52, %v8404_v7  ;;  %v1780_v25 = vmul.f32 %v8555_v52, %v8407_v34  ;;  %v1782_v50 = vmul.f32 %v8555_v52, %v8410_v39  ;;  %v1784_v17 = vmul.f32 %v8555_v52, %v8413_v14 }
 0x325   :  { %v1850_v59 = vmul.f32 %v8553_v22, %v1806_v5  ;;  %v1820_v13 = vmul.f32 %v8553_v22, %v1776_v21  ;;  %v1786_v31 = vmul.f32 %v8555_v52, %v8416_v43  ;;  %v8585_v27 = vmul.f32 %v8555_v52, %v8418_v48 }
 0x326   :  { %v1822_v7 = vmul.f32 %v8553_v22, %v1778_v8  ;;  %v1824_v34 = vmul.f32 %v8553_v22, %v1780_v25  ;;  %v1826_v39 = vmul.f32 %v8553_v22, %v1782_v50  ;;  %v1828_v37 = vmul.f32 %v8553_v22, %v1784_v17 }
 0x327   :  { %v8591_v14 = vrot.slane %v1808_v0, %v1816_v15  ;;  %v1864_v26 = vadd.f32 %v8557_v62, %v1820_v13  ;;  %v8596_v20 = vmul.f32 %v8555_v52, %v8420_v36  ;;  %v8598_v43 = vrot.slane %v1852_v9, %v1816_v15 }
 0x328   :  { %v1866_v48 = vadd.f32 %v8557_v62, %v1822_v7  ;;  %v1868_v58 = vadd.f32 %v8557_v62, %v1824_v34  ;;  %v1870_v33 = vadd.f32 %v8557_v62, %v1826_v39  ;;  %v8604_v55 = vadd.f32 %v8557_v62, %v1850_v59  ;;  %v8610_v63 = vpop.eup %7560 }
 0x329   :  { %vm1896_vm3 = vcmp.gt.f32.partialorder %v1864_v26, 0.0  ;;  %v1928_v16 = vmul.f32 0.2, %v1864_v26  ;;  %v8607_v45 = vadd.f32 %v8557_v62, %v1828_v37  ;;  %v1830_v36 = vmul.f32 %v8553_v22, %v1786_v31 }
 0x32a   :  { %vm1898_vm4 = vcmp.gt.f32.partialorder %v1866_v48, 0.0  ;;  %v1930_v38 = vmul.f32 0.2, %v1866_v48  ;;  %vm1900_vm5 = vcmp.gt.f32.partialorder %v1868_v58, 0.0  ;;  %vm1902_vm6 = vcmp.gt.f32.partialorder %v1870_v33, 0.0 }
 0x32b   :  { %v1960_v47 = vsel %vm1896_vm3, %v1864_v26, %v1928_v16  ;;  %v1932_v54 = vmul.f32 0.2, %v1868_v58  ;;  %v1934_v30 = vmul.f32 0.2, %v1870_v33  ;;  %v8614_v1 = vmul.f32 %v8610_v63, %v8485_v11 }
 0x32c   :  { %v8618_v0 = vmul.f32 %v8610_v63, %v8489_v32  ;;  %v1807_v28 = vmul.f32 %v8610_v63, %v8491_v51  ;;  %v1777_v35 = vmul.f32 %v8610_v63, %v8447_v53  ;;  %v1779_v9 = vmul.f32 %v8610_v63, %v8450_v49 }
 0x32d   :  { %v1962_v44 = vsel %vm1898_vm4, %v1866_v48, %v1930_v38  ;;  %v1781_v15 = vmul.f32 %v8610_v63, %v8453_v6  ;;  %v1783_v11 = vmul.f32 %v8610_v63, %v8456_v41  ;;  %vm1904_vm7 = vcmp.gt.f32.partialorder %v8607_v45, 0.0 }
 0x32e   :  { %v1851_v32 = vmul.f32 %v8591_v14, %v1807_v28  ;;  %v1821_v5 = vmul.f32 %v8591_v14, %v1777_v35  ;;  %v8633_v51 = vpack.c.bf16 %v1962_v44, %v1960_v47  ;;  %v1964_v53 = vsel %vm1900_vm5, %v1868_v58, %v1932_v54 }
 0x32f   :  { %v1823_v21 = vmul.f32 %v8591_v14, %v1779_v9  ;;  %v1825_v49 = vmul.f32 %v8591_v14, %v1781_v15  ;;  %v1827_v8 = vmul.f32 %v8591_v14, %v1783_v11  ;;  %v1966_v6 = vsel %vm1902_vm6, %v1870_v33, %v1934_v30 }
 0x330   :  { %v1865_v41 = vadd.f32 %v8598_v43, %v1821_v5  ;;  %v8641_v25 = vpack.c.bf16 %v1966_v6, %v1964_v53  ;;  %v1785_v50 = vmul.f32 %v8610_v63, %v8459_v46  ;;  %v1874_v17 = vadd.f32 %v8557_v62, %v1830_v36 }
 0x331   :  { %v1867_v59 = vadd.f32 %v8598_v43, %v1823_v21  ;;  %v1869_v13 = vadd.f32 %v8598_v43, %v1825_v49  ;;  %v1871_v31 = vadd.f32 %v8598_v43, %v1827_v8  ;;  %v1787_v7 = vmul.f32 %v8610_v63, %v8462_v56 }
 0x332   :  { %v8652_v34 = vadd.f32 %v8598_v43, %v1851_v32  ;;  %vm1897_vm8 = vcmp.gt.f32.partialorder %v1865_v41, 0.0  ;;  %v1929_v39 = vmul.f32 0.2, %v1865_v41  ;;  %v1829_v37 = vmul.f32 %v8591_v14, %v1785_v50 }
 0x333   :  { %vm1899_vm9 = vcmp.gt.f32.partialorder %v1867_v59, 0.0  ;;  %v1931_v46 = vmul.f32 0.2, %v1867_v59  ;;  %vm1901_vm10 = vcmp.gt.f32.partialorder %v1869_v13, 0.0  ;;  %vm1903_vm11 = vcmp.gt.f32.partialorder %v1871_v31, 0.0 }
 0x334   :  { %v1961_v26 = vsel %vm1897_vm8, %v1865_v41, %v1929_v39  ;;  %v1933_v48 = vmul.f32 0.2, %v1869_v13  ;;  %v1935_v58 = vmul.f32 0.2, %v1871_v31  ;;  %v1831_v33 = vmul.f32 %v8591_v14, %v1787_v7 }
 0x335   :  { %v1963_v16 = vsel %vm1899_vm9, %v1867_v59, %v1931_v46  ;;  %v1873_v38 = vadd.f32 %v8598_v43, %v1829_v37  ;;  %vm1906_vm12 = vcmp.gt.f32.partialorder %v1874_v17, 0.0  ;;  %v1936_v56 = vmul.f32 0.2, %v8607_v45 }
 0x336   :  { %v8658_v36 = vpack.c.bf16 %v1963_v16, %v1961_v26  ;;  %v1965_v47 = vsel %vm1901_vm10, %v1869_v13, %v1933_v48  ;;  %v1967_v54 = vsel %vm1903_vm11, %v1871_v31, %v1935_v58  ;;  %v1875_v30 = vadd.f32 %v8598_v43, %v1831_v33 }
 0x337   :  { %v8661_v28 = vpack.c.bf16 %v1967_v54, %v1965_v47  ;;  %vm1905_vm13 = vcmp.gt.f32.partialorder %v1873_v38, 0.0  ;;  %v1937_v35 = vmul.f32 0.2, %v1873_v38  ;;  %v1938_v9 = vmul.f32 0.2, %v1874_v17 }
 0x338   :  { %2040 = vmatprep.subr.bf16.mxu1 %v8658_v36  ;;  %2655 = vmatprep.subr.bf16.mxu0 %v8658_v36  ;;  %vm1907_vm14 = vcmp.gt.f32.partialorder %v1875_v30, 0.0  ;;  %v1939_v44 = vmul.f32 0.2, %v1875_v30  ;;  %v1968_v15 = vsel %vm1904_vm7, %v8607_v45, %v1936_v56  ;;  %v1789_v11 = vmul.f32 %v8610_v63, %v8465_v57 }
 0x339   :  { %v8671_v32 = vmul.f32 0.2, %v8604_v55  ;;  %2041 = vmatpush1.bf16.msra.mxu1 %v8633_v51  ;;  %2656 = vmatpush1.bf16.msra.mxu0 %v8633_v51  ;;  %v1969_v5 = vsel %vm1905_vm13, %v1873_v38, %v1937_v35  ;;  %v1970_v53 = vsel %vm1906_vm12, %v1874_v17, %v1938_v9  ;;  %v1791_v21 = vmul.f32 %v8610_v63, %v8468_v3 }
 0x33a   :  { %v8679_v49 = vmul.f32 0.2, %v8652_v34  ;;  %2042 = vmatprep.subr.bf16.mxu1 %v8661_v28  ;;  %2657 = vmatprep.subr.bf16.mxu0 %v8661_v28  ;;  %v1971_v57 = vsel %vm1907_vm14, %v1875_v30, %v1939_v44  ;;  %v8683_v45 = vpack.c.bf16 %v1970_v53, %v1968_v15  ;;  %v1833_v8 = vmul.f32 %v8591_v14, %v1789_v11 }
 0x33b   :  { %v8686_v6 = vpack.c.bf16 %v1971_v57, %v1969_v5  ;;  %v1835_v41 = vmul.f32 %v8591_v14, %v1791_v21  ;;  %v1832_v50 = vmul.f32 %v8553_v22, %v8585_v27  ;;  %v1834_v3 = vmul.f32 %v8553_v22, %v8596_v20 }
 0x33c   :  { %v1877_v17 = vadd.f32 %v8598_v43, %v1833_v8  ;;  %v1793_v59 = vmul.f32 %v8610_v63, %v8471_v4  ;;  %v1795_v13 = vmul.f32 %v8610_v63, %v8474_v12  ;;  %v1792_v31 = vmul.f32 %v8555_v52, %v8422_v10 }
 0x33d   :  { %2043 = vmatpush1.bf16.msra.mxu1 %v8641_v25  ;;  %2658 = vmatpush1.bf16.msra.mxu0 %v8641_v25  ;;  %v1879_v27 = vadd.f32 %v8598_v43, %v1835_v41  ;;  %v1876_v7 = vadd.f32 %v8557_v62, %v1832_v50  ;;  %v1878_v20 = vadd.f32 %v8557_v62, %v1834_v3  ;;  %vm1927_vm7 = vcmp.gt.f32.partialorder %v8652_v34, 0.0 }
 0x33e   :  { %2044 = vmatprep.subr.bf16.mxu1 %v8686_v6  ;;  %2659 = vmatprep.subr.bf16.mxu0 %v8686_v6  ;;  %vm1909_vm15 = vcmp.gt.f32.partialorder %v1877_v17, 0.0  ;;  %v1941_v4 = vmul.f32 0.2, %v1877_v17  ;;  %v1837_v12 = vmul.f32 %v8591_v14, %v1793_v59  ;;  %v1839_v10 = vmul.f32 %v8591_v14, %v1795_v13 }
 0x33f   :  { %vm1911_vm0 = vcmp.gt.f32.partialorder %v1879_v27, 0.0  ;;  %v1943_v39 = vmul.f32 0.2, %v1879_v27  ;;  %vm1908_vm1 = vcmp.gt.f32.partialorder %v1876_v7, 0.0  ;;  %vm1910_vm2 = vcmp.gt.f32.partialorder %v1878_v20, 0.0 }
 0x340   :  { %v1973_v37 = vsel %vm1909_vm15, %v1877_v17, %v1941_v4  ;;  %v1940_v46 = vmul.f32 0.2, %v1876_v7  ;;  %v1942_v26 = vmul.f32 0.2, %v1878_v20  ;;  %v1881_v48 = vadd.f32 %v8598_v43, %v1837_v12 }
 0x341   :  { %2045 = vmatpush1.bf16.msra.mxu1 %v8683_v45  ;;  %2660 = vmatpush1.bf16.msra.mxu0 %v8683_v45  ;;  %v1975_v58 = vsel %vm1911_vm0, %v1879_v27, %v1943_v39  ;;  %v1883_v33 = vadd.f32 %v8598_v43, %v1839_v10  ;;  %v1794_v16 = vmul.f32 %v8555_v52, %v8424_v61  ;;  %vm1926_vm10 = vcmp.gt.f32.partialorder %v8604_v55, 0.0 }
 0x342   :  { %v8715_v38 = vpack.c.bf16 %v1975_v58, %v1973_v37  ;;  %v1972_v56 = vsel %vm1908_vm1, %v1876_v7, %v1940_v46  ;;  %v1974_v47 = vsel %vm1910_vm2, %v1878_v20, %v1942_v26  ;;  %vm1913_vm3 = vcmp.gt.f32.partialorder %v1881_v48, 0.0 }
 0x343   :  { %v8717_v54 = vpack.c.bf16 %v1974_v47, %v1972_v56  ;;  %vm1915_vm4 = vcmp.gt.f32.partialorder %v1883_v33, 0.0  ;;  %v1945_v30 = vmul.f32 0.2, %v1881_v48  ;;  %v1947_v35 = vmul.f32 0.2, %v1883_v33 }
 0x344   :  { %2046 = vmatprep.subr.bf16.mxu1 %v8715_v38  ;;  %2661 = vmatprep.subr.bf16.mxu0 %v8715_v38  ;;  %v1836_v9 = vmul.f32 %v8553_v22, %v1792_v31  ;;  %v1838_v44 = vmul.f32 %v8553_v22, %v1794_v16  ;;  %v1797_v61 = vmul.f32 %v8610_v63, %v8477_v23 }
 0x345   :  { %2047 = vmatpush1.bf16.msra.mxu1 %v8717_v54  ;;  %2662 = vmatpush1.bf16.msra.mxu0 %v8717_v54  ;;  %v1977_v15 = vsel %vm1913_vm3, %v1881_v48, %v1945_v30  ;;  %v1979_v11 = vsel %vm1915_vm4, %v1883_v33, %v1947_v35  ;;  %v1799_v5 = vmul.f32 %v8610_v63, %v8480_v24  ;;  %vm3381_vm3 = vcmask 523264  }
 0x346   :  { %v8729_v53 = vpack.c.bf16 %v1979_v11, %v1977_v15  ;;  %v1880_v21 = vadd.f32 %v8557_v62, %v1836_v9  ;;  %v1882_v57 = vadd.f32 %v8557_v62, %v1838_v44  ;;  %v1841_v8 = vmul.f32 %v8591_v14, %v1797_v61 }
 0x347   :  { %v1843_v41 = vmul.f32 %v8591_v14, %v1799_v5  ;;  %v1796_v23 = vmul.f32 %v8555_v52, %v8426_v40  ;;  %v1798_v50 = vmul.f32 %v8555_v52, %v8428_v42  ;;  %v1801_v3 = vmul.f32 %v8610_v63, %v8483_v60 }
 0x348   :  { %2048 = vmatprep.subr.bf16.mxu1 %v8729_v53  ;;  %2663 = vmatprep.subr.bf16.mxu0 %v8729_v53  ;;  %vm1912_vm5 = vcmp.gt.f32.partialorder %v1880_v21, 0.0  ;;  %vm1914_vm6 = vcmp.gt.f32.partialorder %v1882_v57, 0.0  ;;  %v1944_v24 = vmul.f32 0.2, %v1880_v21  ;;  %v1946_v17 = vmul.f32 0.2, %v1882_v57 }
 0x349   :  { %v1885_v59 = vadd.f32 %v8598_v43, %v1841_v8  ;;  %v1887_v13 = vadd.f32 %v8598_v43, %v1843_v41  ;;  %v1840_v40 = vmul.f32 %v8553_v22, %v1796_v23  ;;  %v1842_v31 = vmul.f32 %v8553_v22, %v1798_v50 }
 0x34a   :  { %v1976_v42 = vsel %vm1912_vm5, %v1880_v21, %v1944_v24  ;;  %v1978_v60 = vsel %vm1914_vm6, %v1882_v57, %v1946_v17  ;;  %v1845_v63 = vmul.f32 %v8591_v14, %v1801_v3  ;;  %v1847_v27 = vmul.f32 %v8591_v14, %v8614_v1  ;;  %v7403_v17 = vld [vmem:[%s9792_s4 + $0x40] sm:$0xff]  }
 0x34b   :  { %v8751_v7 = vpack.c.bf16 %v1978_v60, %v1976_v42  ;;  %vm1917_vm8 = vcmp.gt.f32.partialorder %v1885_v59, 0.0  ;;  %vm1919_vm9 = vcmp.gt.f32.partialorder %v1887_v13, 0.0  ;;  %v1949_v20 = vmul.f32 0.2, %v1885_v59  ;;  %v7416_v42 = vld [vmem:[%s9792_s4 + $0x70] sm:$0xff]   ;;  %v7410_v60 = vld [vmem:[%s9792_s4 + $0x38] sm:$0xff]  }
 0x34c   :  { %v1951_v4 = vmul.f32 0.2, %v1887_v13  ;;  %v1884_v12 = vadd.f32 %v8557_v62, %v1840_v40  ;;  %v1886_v10 = vadd.f32 %v8557_v62, %v1842_v31  ;;  %v1889_v39 = vadd.f32 %v8598_v43, %v1845_v63  ;;  %v7415_v40 = vld [vmem:[%s9792_s4 + $0x68] sm:$0xff]   ;;  %v7409_v31 = vld [vmem:[%s9792_s4 + $0x30] sm:$0xff]   ;;  %v7417_v63 = vld [vmem:[%s9792_s4 + $0x78] sm:$0xff]  }
 0x34d   :  { %2049 = vmatpush1.bf16.msra.mxu1 %v8751_v7  ;;  %2664 = vmatpush1.bf16.msra.mxu0 %v8751_v7  ;;  %v1981_v37 = vsel %vm1917_vm8, %v1885_v59, %v1949_v20  ;;  %v1891_v1 = vadd.f32 %v8598_v43, %v1847_v27  ;;  %v1800_v46 = vmul.f32 %v8555_v52, %v8430_v18  ;;  %v7421_v59 = vld [vmem:[%s9793_s29 + $0x88] sm:$0xff]   ;;  %v7422_v27 = vld [vmem:[%s9793_s29 + $0xd0] sm:$0xff]   ;;  %v7425_v20 = vld [vmem:[%s9793_s29 + $0x98] sm:$0xff]  }
 0x34e   :  { %v1983_v26 = vsel %vm1919_vm9, %v1887_v13, %v1951_v4  ;;  %vm1916_vm11 = vcmp.gt.f32.partialorder %v1884_v12, 0.0  ;;  %vm1918_vm12 = vcmp.gt.f32.partialorder %v1886_v10, 0.0  ;;  %v1948_v48 = vmul.f32 0.2, %v1884_v12  ;;  %v7408_v13 = vld [vmem:[%s9792_s4 + $0x28] sm:$0xff]   ;;  %v7426_v4 = vld [vmem:[%s9793_s29 + $0xe0] sm:$0xff]  }
 0x34f   :  { %v8762_v58 = vpack.c.bf16 %v1983_v26, %v1981_v37  ;;  %v1950_v33 = vmul.f32 0.2, %v1886_v10  ;;  %vm1921_vm13 = vcmp.gt.f32.partialorder %v1889_v39, 0.0  ;;  %vm1923_vm14 = vcmp.gt.f32.partialorder %v1891_v1, 0.0  ;;  %v7430_v37 = vld [vmem:[%s9793_s29 + $0xf0] sm:$0xff]   ;;  %v7433_v26 = vld [vmem:[%s9793_s29 + $0xb8] sm:$0xff]  }
 0x350   :  { %v1980_v16 = vsel %vm1916_vm11, %v1884_v12, %v1948_v48  ;;  %v1953_v56 = vmul.f32 0.2, %v1889_v39  ;;  %v1955_v47 = vmul.f32 0.2, %v1891_v1  ;;  %v1844_v30 = vmul.f32 %v8553_v22, %v1800_v46  ;;  %v7427_v12 = vld [vmem:[%s9793_s29 + $0xa0] sm:$0xff]   ;;  %v7432_v46 = vld [vmem:[%s9793_s29 + $0xf8] sm:$0xff]  }
 0x351   :  { %2050 = vmatprep.subr.bf16.mxu1 %v8762_v58  ;;  %2665 = vmatprep.subr.bf16.mxu0 %v8762_v58  ;;  %v1982_v35 = vsel %vm1918_vm12, %v1886_v10, %v1950_v33  ;;  %v1846_v18 = vmul.f32 %v8553_v22, %v8561_v29  ;;  %v1849_v52 = vmul.f32 %v8591_v14, %v8618_v0  ;;  %v7428_v10 = vld [vmem:[%s9793_s29 + $0xe8] sm:$0xff]   ;;  %v7434_v48 = vld [vmem:[%s9793_s29 + $0x40] sm:$0xff]   ;;  %vm7577_vm12 = vmmov 0  }
 0x352   :  { %v8771_v9 = vpack.c.bf16 %v1982_v35, %v1980_v16  ;;  %v1985_v44 = vsel %vm1921_vm13, %v1889_v39, %v1953_v56  ;;  %v1987_v61 = vsel %vm1923_vm14, %v1891_v1, %v1955_v47  ;;  %v1888_v15 = vadd.f32 %v8557_v62, %v1844_v30  ;;  %v7429_v39 = vld [vmem:[%s9793_s29 + $0xa8] sm:$0xff]   ;;  %v7431_v1 = vld [vmem:[%s9793_s29 + $0xb0] sm:$0xff]  }
 0x353   :  { %v8774_v11 = vpack.c.bf16 %v1987_v61, %v1985_v44  ;;  %v1890_v5 = vadd.f32 %v8557_v62, %v1846_v18  ;;  %v1893_v21 = vadd.f32 %v8598_v43, %v1849_v52  ;;  %v1991_v14 = vsel %vm1927_vm7, %v8652_v34, %v8679_v49 }
 0x354   :  { %2051 = vmatpush1.bf16.msra.mxu1 %v8771_v9  ;;  %2666 = vmatpush1.bf16.msra.mxu0 %v8771_v9  ;;  %vm1920_vm15 = vcmp.gt.f32.partialorder %v1888_v15, 0.0  ;;  %v1952_v29 = vmul.f32 0.2, %v1888_v15  ;;  %v1848_v0 = vmul.f32 %v8553_v22, %v8565_v2  ;;  %v1990_v34 = vsel %vm1926_vm10, %v8604_v55, %v8671_v32  ;;  %v7404_v55 = vld [vmem:[%s9792_s4 + $0x8] sm:$0xff]   ;;  %v7413_v32 = vld [vmem:[%s9792_s4 + $0x58] sm:$0xff]  }
 0x355   :  { %2052 = vmatprep.subr.bf16.mxu1 %v8774_v11  ;;  %2667 = vmatprep.subr.bf16.mxu0 %v8774_v11  ;;  %vm1922_vm0 = vcmp.gt.f32.partialorder %v1890_v5, 0.0  ;;  %v1954_v43 = vmul.f32 0.2, %v1890_v5  ;;  %vm1925_vm1 = vcmp.gt.f32.partialorder %v1893_v21, 0.0  ;;  %v1957_v57 = vmul.f32 0.2, %v1893_v21 }
 0x356   :  { %v1984_v8 = vsel %vm1920_vm15, %v1888_v15, %v1952_v29  ;;  %v1892_v41 = vadd.f32 %v8557_v62, %v1848_v0  ;;  %v7402_v62 = vld [vmem:[%s9792_s4] sm:$0xff]  }
 0x357   :  { %v1986_v23 = vsel %vm1922_vm0, %v1890_v5, %v1954_v43  ;;  %v1989_v50 = vsel %vm1925_vm1, %v1893_v21, %v1957_v57  ;;  %vm4204_vm1 = vcmask 261120  }
 0x358   :  { %v2004_v49 = vpack.c.bf16 %v1986_v23, %v1984_v8  ;;  %v2007_v22 = vpack.c.bf16 %v1991_v14, %v1989_v50  ;;  %vm1924_vm2 = vcmp.gt.f32.partialorder %v1892_v41, 0.0  ;;  %v1956_v2 = vmul.f32 0.2, %v1892_v41 }
 0x35a   :  { %2053 = vmatpush1.bf16.msra.mxu1 %v2004_v49  ;;  %2668 = vmatpush1.bf16.msra.mxu0 %v2004_v49  ;;  %v1988_v3 = vsel %vm1924_vm2, %v1892_v41, %v1956_v2 }
 0x35b   :  { %2054 = vmatprep.subr.bf16.mxu1 %v2007_v22  ;;  %2669 = vmatprep.subr.bf16.mxu0 %v2007_v22  ;;  %v2006_v24 = vpack.c.bf16 %v1990_v34, %v1988_v3 }
 0x35e   :  { %2055 = vmatpush1.bf16.msra.mxu1 %v2006_v24  ;;  %2670 = vmatpush1.bf16.msra.mxu0 %v2006_v24 }
 0x35f   :  { %2186 = vmatprep.subr.bf16.mxu1 %v8658_v36  ;;  %2971 = vmatprep.subr.bf16.mxu0 %v8658_v36  ;;  %v7411_v36 = vld [vmem:[%s9792_s4 + $0x48] sm:$0xff]  }
 0x361   :  { %2073 = vmatmul.mubr.bf16.vlgmr.msra.gmra.mrb[96].mxu1 %v7402_v62  ;;  %2688 = vmatmul.mubr.bf16.vlgmr.msra.gmra.mrb[64].mxu0 %v7403_v17 }
 0x362   :  { %2187 = vmatpush1.bf16.msra.mxu1 %v8633_v51  ;;  %2972 = vmatpush1.bf16.msra.mxu0 %v8633_v51  ;;  %v7405_v51 = vld [vmem:[%s9792_s4 + $0x10] sm:$0xff]  }
 0x363   :  { %2188 = vmatprep.subr.bf16.mxu1 %v8661_v28  ;;  %2973 = vmatprep.subr.bf16.mxu0 %v8661_v28  ;;  %v7406_v28 = vld [vmem:[%s9792_s4 + $0x18] sm:$0xff]  }
 0x364   :  { %2082 = vmatprep.mubr.bf16.mxu1 %v7575_v19  ;;  %2697 = vmatprep.mubr.bf16.mxu0 %v7575_v19 }
 0x366   :  { %2189 = vmatpush1.bf16.msra.mxu1 %v8641_v25  ;;  %2974 = vmatpush1.bf16.msra.mxu0 %v8641_v25  ;;  %v7412_v25 = vld [vmem:[%s9792_s4 + $0x50] sm:$0xff]  }
 0x367   :  { %2190 = vmatprep.subr.bf16.mxu1 %v8686_v6  ;;  %2975 = vmatprep.subr.bf16.mxu0 %v8686_v6  ;;  %v7407_v6 = vld [vmem:[%s9792_s4 + $0x20] sm:$0xff]  }
 0x369   :  { %2083 = vmatmul.mubr.bf16.gmra.mrb[100].mxu1 %v7404_v55  ;;  %2698 = vmatmul.mubr.bf16.gmra.mrb[68].mxu0 %v7411_v36 }
 0x36a   :  { %2191 = vmatpush1.bf16.msra.mxu1 %v8683_v45  ;;  %2976 = vmatpush1.bf16.msra.mxu0 %v8683_v45  ;;  %v7418_v45 = vld [vmem:[%s9793_s29 + $0xc0] sm:$0xff]  }
 0x36b   :  { %2192 = vmatprep.subr.bf16.mxu1 %v8715_v38  ;;  %2977 = vmatprep.subr.bf16.mxu0 %v8715_v38  ;;  %v7414_v38 = vld [vmem:[%s9792_s4 + $0x60] sm:$0xff]  }
 0x36c   :  { %2092 = vmatprep.mubr.bf16.mxu1 %v7575_v19  ;;  %2707 = vmatprep.mubr.bf16.mxu0 %v7575_v19 }
 0x36e   :  { %2193 = vmatpush1.bf16.msra.mxu1 %v8717_v54  ;;  %2978 = vmatpush1.bf16.msra.mxu0 %v8717_v54  ;;  %v7419_v54 = vld [vmem:[%s9793_s29 + $0x80] sm:$0xff]  }
 0x36f   :  { %2194 = vmatprep.subr.bf16.mxu1 %v8729_v53  ;;  %2979 = vmatprep.subr.bf16.mxu0 %v8729_v53  ;;  %v7420_v53 = vld [vmem:[%s9793_s29 + $0xc8] sm:$0xff]  }
 0x371   :  { %2093 = vmatmul.mubr.bf16.gmra.mrb[104].mxu1 %v7405_v51  ;;  %2708 = vmatmul.mubr.bf16.gmra.mrb[72].mxu0 %v7412_v25 }
 0x372   :  { %2195 = vmatpush1.bf16.msra.mxu1 %v8751_v7  ;;  %2980 = vmatpush1.bf16.msra.mxu0 %v8751_v7  ;;  %v7423_v7 = vld [vmem:[%s9793_s29 + $0x90] sm:$0xff]  }
 0x373   :  { %2196 = vmatprep.subr.bf16.mxu1 %v8762_v58  ;;  %2981 = vmatprep.subr.bf16.mxu0 %v8762_v58 }
 0x374   :  { %2102 = vmatprep.mubr.bf16.mxu1 %v7575_v19  ;;  %2717 = vmatprep.mubr.bf16.mxu0 %v7575_v19 }
 0x376   :  { %2197 = vmatpush1.bf16.msra.mxu1 %v8771_v9  ;;  %2982 = vmatpush1.bf16.msra.mxu0 %v8771_v9 }
 0x377   :  { %2198 = vmatprep.subr.bf16.mxu1 %v8774_v11  ;;  %2983 = vmatprep.subr.bf16.mxu0 %v8774_v11 }
 0x379   :  { %2103 = vmatmul.mubr.bf16.gmra.mrb[108].mxu1 %v7406_v28  ;;  %2718 = vmatmul.mubr.bf16.gmra.mrb[76].mxu0 %v7413_v32 }
 0x37a   :  { %2199 = vmatpush1.bf16.msra.mxu1 %v2004_v49  ;;  %2984 = vmatpush1.bf16.msra.mxu0 %v2004_v49 }
 0x37b   :  { %2200 = vmatprep.subr.bf16.mxu1 %v2007_v22  ;;  %2985 = vmatprep.subr.bf16.mxu0 %v2007_v22 }
 0x37c   :  { %2218 = vmatprep.mubr.bf16.mxu1 %v7575_v19  ;;  %3003 = vmatprep.mubr.bf16.mxu0 %v7575_v19 }
 0x37e   :  { %2201 = vmatpush1.bf16.msra.mxu1 %v2006_v24  ;;  %2986 = vmatpush1.bf16.msra.mxu0 %v2006_v24 }
 0x37f   :  { %6542 = vmatprep.subr.bf16.mxu1 %v7418_v45 }
 0x381   :  { %2219 = vmatmul.mubr.bf16.vlgmr.msra.gmra.mrb[112].mxu1 %v7407_v6  ;;  %3004 = vmatmul.mubr.bf16.vlgmr.msra.gmra.mrb[80].mxu0 %v7414_v38 }
 0x382   :  { %2228 = vmatprep.mubr.bf16.mxu1 %v7575_v19  ;;  %3013 = vmatprep.mubr.bf16.mxu0 %v7575_v19 }
 0x383   :  { %6543 = vmatpush3.bf16.msra.mxu1 %v7419_v54 }
 0x384   :  { %6544 = vmatprep.subr.bf16.mxu1 %v7420_v53 }
 0x387   :  { %6545 = vmatpush3.bf16.msra.mxu1 %v7421_v59 }
 0x388   :  { %6546 = vmatprep.subr.bf16.mxu1 %v7422_v27 }
 0x389   :  { %2229 = vmatmul.mubr.bf16.gmra.mrb[116].mxu1 %v7408_v13  ;;  %3014 = vmatmul.mubr.bf16.gmra.mrb[84].mxu0 %v7415_v40 }
 0x38a   :  { %2238 = vmatprep.mubr.bf16.mxu1 %v7575_v19  ;;  %3023 = vmatprep.mubr.bf16.mxu0 %v7575_v19 }
 0x38b   :  { %6547 = vmatpush3.bf16.msra.mxu1 %v7423_v7 }
 0x391   :  { %2239 = vmatmul.mubr.bf16.gmra.mrb[120].mxu1 %v7409_v31  ;;  %3024 = vmatmul.mubr.bf16.gmra.mrb[88].mxu0 %v7416_v42 }
 0x392   :  { %2248 = vmatprep.mubr.bf16.mxu1 %v7575_v19  ;;  %3033 = vmatprep.mubr.bf16.mxu0 %v7575_v19  ;;  %v7424_v19 = vld [vmem:[%s9793_s29 + $0xd8] sm:$0xff]  }
 0x393   :  { %6548 = vmatprep.subr.bf16.mxu1 %v7424_v19 }
 0x394   :  { %6549 = vmatpush3.bf16.msra.mxu1 %v7425_v20 }
 0x395   :  { %6550 = vmatprep.subr.bf16.mxu1 %v7426_v4 }
 0x398   :  { %6551 = vmatpush3.bf16.msra.mxu1 %v7427_v12 }
 0x399   :  { %2249 = vmatmul.mubr.bf16.gmra.mrb[124].mxu1 %v7410_v60  ;;  %3034 = vmatmul.mubr.bf16.gmra.mrb[92].mxu0 %v7417_v63 }
 0x39a   :  { %6552 = vmatprep.subr.bf16.mxu1 %v7428_v10 }
 0x39c   :  { %6553 = vmatpush3.bf16.msra.mxu1 %v7429_v39 }
 0x39d   :  { %6554 = vmatprep.subr.bf16.mxu1 %v7430_v37  ;;  %v7435_v37 = vld [vmem:[%s9793_s29] sm:$0xff]  }
 0x3a0   :  { %6555 = vmatpush3.bf16.msra.mxu1 %v7431_v1 }
 0x3a1   :  { %6556 = vmatprep.subr.bf16.mxu1 %v7432_v46  ;;  %v7436_v46 = vld [vmem:[%s9793_s29 + $0x48] sm:$0xff]  }
 0x3a4   :  { %6557 = vmatpush3.bf16.msra.mxu1 %v7433_v26 }
 0x3a5   :  { %6582 = vmatprep.subr.bf16.mxu1 %v7434_v48  ;;  %v7437_v48 = vld [vmem:[%s9793_s29 + $0x8] sm:$0xff]  }
 0x434   :  { %v8932_v58 = vpop.f32.mrb[96].mxu1  ;;  %v8934_v33 = vpop.f32.mrb[64].mxu0 }
 0x435   :  { %v8936_v16 = vpop.f32.mrb[97].mxu1  ;;  %v8938_v56 = vpop.f32.mrb[65].mxu0 }
 0x436   :  { %v8940_v47 = vpop.f32.mrb[98].mxu1  ;;  %v8942_v30 = vpop.f32.mrb[66].mxu0 }
 0x437   :  { %v2113_v35 = vpack.c.bf16 %v8940_v47, %v8932_v58  ;;  %v8946_v18 = vpop.f32.mrb[99].mxu1  ;;  %v8950_v9 = vpop.f32.mrb[67].mxu0  ;;  %v7455_v58 = vld [vmem:[%s9793_s29 + $0x110] sm:$0xff]   ;;  %v7456_v47 = vld [vmem:[%s9793_s29 + $0x158] sm:$0xff]  }
 0x438   :  { %v2114_v44 = vpack.c.bf16 %v8946_v18, %v8936_v16  ;;  %v7452_v16 = vld [vmem:[%s9793_s29 + $0x148] sm:$0xff]  }
 0x439   :  { %v7453_v18 = vld [vmem:[%s9793_s29 + $0x108] sm:$0xff]  }
 0x43c   :  { %v8956_v15 = vpop.f32.mrb[100].mxu1  ;;  %v8958_v11 = vpop.f32.mrb[68].mxu0 }
 0x43d   :  { %v8960_v5 = vpop.f32.mrb[101].mxu1  ;;  %v8962_v21 = vpop.f32.mrb[69].mxu0 }
 0x43e   :  { %v8964_v29 = vpop.f32.mrb[102].mxu1  ;;  %v8966_v14 = vpop.f32.mrb[70].mxu0 }
 0x43f   :  { %v2115_v0 = vpack.c.bf16 %v8964_v29, %v8956_v15  ;;  %v8970_v43 = vpop.f32.mrb[103].mxu1  ;;  %v8974_v8 = vpop.f32.mrb[71].mxu0  ;;  %v7459_v15 = vld [vmem:[%s9793_s29 + $0x120] sm:$0xff]   ;;  %v7460_v29 = vld [vmem:[%s9793_s29 + $0x168] sm:$0xff]  }
 0x440   :  { %v2116_v41 = vpack.c.bf16 %v8970_v43, %v8960_v5  ;;  %v7458_v5 = vld [vmem:[%s9793_s29 + $0x160] sm:$0xff]  }
 0x444   :  { %v8980_v50 = vpop.f32.mrb[104].mxu1  ;;  %v8982_v34 = vpop.f32.mrb[72].mxu0 }
 0x445   :  { %v8984_v49 = vpop.f32.mrb[105].mxu1  ;;  %v8986_v22 = vpop.f32.mrb[73].mxu0 }
 0x446   :  { %v8988_v2 = vpop.f32.mrb[106].mxu1  ;;  %v8990_v3 = vpop.f32.mrb[74].mxu0 }
 0x447   :  { %v8994_v62 = vpop.f32.mrb[107].mxu1  ;;  %v8998_v55 = vpop.f32.mrb[75].mxu0 }
 0x448   :  { %v2118_v36 = vpack.c.bf16 %v8994_v62, %v8984_v49  ;;  %v7462_v49 = vld [vmem:[%s9793_s29 + $0x170] sm:$0xff]  }
 0x44c   :  { %v9004_v25 = vpop.f32.mrb[108].mxu1  ;;  %v9006_v28 = vpop.f32.mrb[76].mxu0 }
 0x44d   :  { %v9008_v32 = vpop.f32.mrb[109].mxu1  ;;  %v9010_v45 = vpop.f32.mrb[77].mxu0 }
 0x44e   :  { %v9012_v6 = vpop.f32.mrb[110].mxu1  ;;  %v9014_v38 = vpop.f32.mrb[78].mxu0 }
 0x44f   :  { %v9018_v53 = vpop.f32.mrb[111].mxu1  ;;  %v9022_v13 = vpop.f32.mrb[79].mxu0  ;;  %v9796_v62 = vpack.c.bf16 %v9012_v6, %v9004_v25  ;;  %v7467_v25 = vld [vmem:[%s9793_s29 + $0x180] sm:$0xff]   ;;  %v7468_v6 = vld [vmem:[%s9793_s29 + $0x1c8] sm:$0xff]  }
 0x450   :  { %v9795_v43 = vpack.c.bf16 %v9018_v53, %v9008_v32  ;;  %v9797_v32 = vpack.c.bf16 %v8950_v9, %v8938_v56  ;;  %v7466_v53 = vld [vmem:[%s9793_s29 + $0x1c0] sm:$0xff]   ;;  %v7469_v56 = vld [vmem:[%s9793_s29 + $0x188] sm:$0xff]   ;;  %v9799_v9 = vpack.c.bf16 %v8974_v8, %v8962_v21  ;;  %v7473_v21 = vld [vmem:[%s9793_s29 + $0x198] sm:$0xff]   ;;  %v9801_v8 = vpack.c.bf16 %v8998_v55, %v8986_v22 }
 0x451   :  { %v7477_v22 = vld [vmem:[%s9793_s29 + $0x1a8] sm:$0xff]   ;;  %v9803_v55 = vpack.c.bf16 %v9022_v13, %v9010_v45  ;;  %v7481_v45 = vld [vmem:[%s9793_s29 + $0x1b8] sm:$0xff]  }
 0x454   :  { %v2220_v42 = vpop.f32.mrb[112].mxu1  ;;  %v9028_v60 = vpop.f32.mrb[80].mxu0 }
 0x455   :  { %v2222_v63 = vpop.f32.mrb[113].mxu1  ;;  %v9030_v27 = vpop.f32.mrb[81].mxu0 }
 0x456   :  { %v2224_v7 = vpop.f32.mrb[114].mxu1  ;;  %v9032_v19 = vpop.f32.mrb[82].mxu0 }
 0x457   :  { %v2259_v20 = vpack.c.bf16 %v2224_v7, %v2220_v42  ;;  %v2226_v4 = vpop.f32.mrb[115].mxu1  ;;  %v9036_v10 = vpop.f32.mrb[83].mxu0  ;;  %v7438_v7 = vld [vmem:[%s9793_s29 + $0x50] sm:$0xff]  }
 0x458   :  { %v2260_v39 = vpack.c.bf16 %v2226_v4, %v2222_v63  ;;  %v9805_v13 = vpack.c.bf16 %v9036_v10, %v9030_v27 }
 0x45a   :  { %2428 = vmatprep.mubr.bf16.mxu1 %v2260_v39 }
 0x45b   :  { %2429 = vmatmul.mubr.bf16.vlgmr.msra.gmra.mrb[128].mxu1 %v2259_v20 }
 0x45c   :  { %v2230_v26 = vpop.f32.mrb[116].mxu1  ;;  %6583 = vmatpush3.bf16.msra.mxu1 %v7435_v37  ;;  %v9049_v42 = vpop.f32.mrb[84].mxu0 }
 0x45d   :  { %v2232_v63 = vpop.f32.mrb[117].mxu1  ;;  %6584 = vmatprep.subr.bf16.mxu1 %v7436_v46  ;;  %v9054_v4 = vpop.f32.mrb[85].mxu0  ;;  %v7439_v46 = vld [vmem:[%s9793_s29 + $0x10] sm:$0xff]  }
 0x45e   :  { %v2234_v12 = vpop.f32.mrb[118].mxu1  ;;  %v9056_v1 = vpop.f32.mrb[86].mxu0 }
 0x45f   :  { %v2261_v20 = vpack.c.bf16 %v2234_v12, %v2230_v26  ;;  %v2236_v39 = vpop.f32.mrb[119].mxu1  ;;  %v9060_v59 = vpop.f32.mrb[87].mxu0  ;;  %v7440_v12 = vld [vmem:[%s9793_s29 + $0x58] sm:$0xff]  }
 0x460   :  { %v2262_v31 = vpack.c.bf16 %v2236_v39, %v2232_v63  ;;  %6585 = vmatpush3.bf16.msra.mxu1 %v7437_v48  ;;  %v7441_v48 = vld [vmem:[%s9793_s29 + $0x18] sm:$0xff]  }
 0x461   :  { %6586 = vmatprep.subr.bf16.mxu1 %v7438_v7  ;;  %v7442_v7 = vld [vmem:[%s9793_s29 + $0x60] sm:$0xff]  }
 0x462   :  { %2436 = vmatprep.mubr.bf16.mxu1 %v2262_v31 }
 0x463   :  { %2437 = vmatmul.mubr.bf16.gmra.mrb[132].mxu1 %v2261_v20 }
 0x464   :  { %v2240_v26 = vpop.f32.mrb[120].mxu1  ;;  %6587 = vmatpush3.bf16.msra.mxu1 %v7439_v46  ;;  %v9073_v63 = vpop.f32.mrb[88].mxu0 }
 0x465   :  { %v2242_v39 = vpop.f32.mrb[121].mxu1  ;;  %6588 = vmatprep.subr.bf16.mxu1 %v7440_v12  ;;  %v9078_v37 = vpop.f32.mrb[89].mxu0  ;;  %v7443_v12 = vld [vmem:[%s9793_s29 + $0x20] sm:$0xff]  }
 0x466   :  { %v2244_v17 = vpop.f32.mrb[122].mxu1  ;;  %v9080_v51 = vpop.f32.mrb[90].mxu0 }
 0x467   :  { %v2263_v31 = vpack.c.bf16 %v2244_v17, %v2240_v26  ;;  %v2246_v20 = vpop.f32.mrb[123].mxu1  ;;  %v9084_v57 = vpop.f32.mrb[91].mxu0  ;;  %v7444_v17 = vld [vmem:[%s9793_s29 + $0x68] sm:$0xff]   ;;  %v9810_v27 = vpack.c.bf16 %v9080_v51, %v9073_v63 }
 0x468   :  { %v2264_v23 = vpack.c.bf16 %v2246_v20, %v2242_v39  ;;  %6589 = vmatpush3.bf16.msra.mxu1 %v7441_v48  ;;  %v7445_v48 = vld [vmem:[%s9793_s29 + $0x28] sm:$0xff]  }
 0x469   :  { %6590 = vmatprep.subr.bf16.mxu1 %v7442_v7  ;;  %v7446_v7 = vld [vmem:[%s9793_s29 + $0x70] sm:$0xff]  }
 0x46a   :  { %2444 = vmatprep.mubr.bf16.mxu1 %v2264_v23 }
 0x46b   :  { %2445 = vmatmul.mubr.bf16.gmra.mrb[136].mxu1 %v2263_v31 }
 0x46c   :  { %v2250_v26 = vpop.f32.mrb[124].mxu1  ;;  %6591 = vmatpush3.bf16.msra.mxu1 %v7443_v12  ;;  %v9097_v39 = vpop.f32.mrb[92].mxu0 }
 0x46d   :  { %v2252_v20 = vpop.f32.mrb[125].mxu1  ;;  %6592 = vmatprep.subr.bf16.mxu1 %v7444_v17  ;;  %v9102_v46 = vpop.f32.mrb[93].mxu0  ;;  %v7447_v17 = vld [vmem:[%s9793_s29 + $0x30] sm:$0xff]  }
 0x46e   :  { %v2254_v52 = vpop.f32.mrb[126].mxu1  ;;  %v9104_v61 = vpop.f32.mrb[94].mxu0 }
 0x46f   :  { %v2265_v23 = vpack.c.bf16 %v2254_v52, %v2250_v26  ;;  %v2256_v31 = vpop.f32.mrb[127].mxu1  ;;  %v3050_v12 = vpack.c.bf16 %v9104_v61, %v9097_v39  ;;  %v9108_v54 = vpop.f32.mrb[95].mxu0  ;;  %v7448_v52 = vld [vmem:[%s9793_s29 + $0x78] sm:$0xff]  }
 0x470   :  { %v2266_v40 = vpack.c.bf16 %v2256_v31, %v2252_v20  ;;  %6593 = vmatpush3.bf16.msra.mxu1 %v7445_v48  ;;  %v3051_v24 = vpack.c.bf16 %v9108_v54, %v9102_v46  ;;  %v7449_v26 = vld [vmem:[%s9793_s29 + $0x38] sm:$0xff]   ;;  %v7450_v48 = vld [vmem:[%s9793_s29 + $0x140] sm:$0xff]   ;;  %v9798_v20 = vpack.c.bf16 %v8942_v30, %v8934_v33  ;;  %v7471_v33 = vld [vmem:[%s9793_s29 + $0x190] sm:$0xff]  }
 0x471   :  { %6594 = vmatprep.subr.bf16.mxu1 %v7446_v7  ;;  %v7470_v7 = vld [vmem:[%s9793_s29 + $0x1d0] sm:$0xff]   ;;  %v7472_v30 = vld [vmem:[%s9793_s29 + $0x1d8] sm:$0xff]   ;;  %v7474_v31 = vld [vmem:[%s9793_s29 + $0x1e0] sm:$0xff]  }
 0x472   :  { %2452 = vmatprep.mubr.bf16.mxu1 %v2266_v40  ;;  %v7451_v40 = vld [vmem:[%s9793_s29 + $0x100] sm:$0xff]  }
 0x473   :  { %2453 = vmatmul.mubr.bf16.gmra.mrb[140].mxu1 %v2265_v23  ;;  %v9800_v23 = vpack.c.bf16 %v8966_v14, %v8958_v11  ;;  %v7475_v11 = vld [vmem:[%s9793_s29 + $0x1a0] sm:$0xff]   ;;  %v7476_v14 = vld [vmem:[%s9793_s29 + $0x1e8] sm:$0xff]  }
 0x474   :  { %6595 = vmatpush3.bf16.msra.mxu1 %v7447_v17  ;;  %2589 = vmatprep.mubr.bf16.mxu1 %v2114_v44  ;;  %v7454_v44 = vld [vmem:[%s9793_s29 + $0x150] sm:$0xff]   ;;  %v9802_v17 = vpack.c.bf16 %v8990_v3, %v8982_v34  ;;  %v7480_v3 = vld [vmem:[%s9793_s29 + $0x1f8] sm:$0xff]  }
 0x475   :  { %6596 = vmatprep.subr.bf16.mxu1 %v7448_v52  ;;  %v7478_v52 = vld [vmem:[%s9793_s29 + $0x1f0] sm:$0xff]  }
 0x476   :  { %v7479_v34 = vld [vmem:[%s9793_s29 + $0x1b0] sm:$0xff]  }
 0x478   :  { %6597 = vmatpush3.bf16.msra.mxu1 %v7449_v26  ;;  %v9804_v26 = vpack.c.bf16 %v9014_v38, %v9006_v28  ;;  %v9808_v28 = vpack.c.bf16 %v9056_v1, %v9049_v42  ;;  %v9809_v38 = vpack.c.bf16 %v9084_v57, %v9078_v37 }
 0x479   :  { %6622 = vmatprep.subr.bf16.mxu1 %v7450_v48  ;;  %v9806_v48 = vpack.c.bf16 %v9032_v19, %v9028_v60 }
 0x47b   :  { %2590 = vmatmul.mubr.bf16.vlgmr.msra.gmra.mrb[144].mxu1 %v2113_v35  ;;  %v7457_v35 = vld [vmem:[%s9793_s29 + $0x118] sm:$0xff]  }
 0x47c   :  { %2597 = vmatprep.mubr.bf16.mxu1 %v2116_v41  ;;  %6623 = vmatpush3.bf16.msra.mxu1 %v7451_v40  ;;  %v7461_v41 = vld [vmem:[%s9793_s29 + $0x128] sm:$0xff]   ;;  %v9807_v40 = vpack.c.bf16 %v9060_v59, %v9054_v4 }
 0x47d   :  { %6624 = vmatprep.subr.bf16.mxu1 %v7452_v16 }
 0x480   :  { %6625 = vmatpush3.bf16.msra.mxu1 %v7453_v18 }
 0x481   :  { %6626 = vmatprep.subr.bf16.mxu1 %v7454_v44 }
 0x483   :  { %2598 = vmatmul.mubr.bf16.gmra.mrb[148].mxu1 %v2115_v0  ;;  %v9794_v0 = vpack.c.bf16 %v8988_v2, %v8980_v50  ;;  %v7463_v50 = vld [vmem:[%s9793_s29 + $0x130] sm:$0xff]   ;;  %v7464_v2 = vld [vmem:[%s9793_s29 + $0x178] sm:$0xff]  }
 0x484   :  { %2605 = vmatprep.mubr.bf16.mxu1 %v2118_v36  ;;  %6627 = vmatpush3.bf16.msra.mxu1 %v7455_v58  ;;  %v7465_v36 = vld [vmem:[%s9793_s29 + $0x138] sm:$0xff]  }
 0x485   :  { %6628 = vmatprep.subr.bf16.mxu1 %v7456_v47 }
 0x488   :  { %6629 = vmatpush3.bf16.msra.mxu1 %v7457_v35 }
 0x489   :  { %6630 = vmatprep.subr.bf16.mxu1 %v7458_v5 }
 0x48b   :  { %2606 = vmatmul.mubr.bf16.gmra.mrb[152].mxu1 %v9794_v0 }
 0x48c   :  { %2613 = vmatprep.mubr.bf16.mxu1 %v9795_v43  ;;  %6631 = vmatpush3.bf16.msra.mxu1 %v7459_v15 }
 0x48d   :  { %6632 = vmatprep.subr.bf16.mxu1 %v7460_v29 }
 0x490   :  { %6633 = vmatpush3.bf16.msra.mxu1 %v7461_v41 }
 0x491   :  { %6634 = vmatprep.subr.bf16.mxu1 %v7462_v49 }
 0x493   :  { %2614 = vmatmul.mubr.bf16.gmra.mrb[156].mxu1 %v9796_v62 }
 0x494   :  { %6635 = vmatpush3.bf16.msra.mxu1 %v7463_v50  ;;  %2897 = vmatprep.mubr.bf16.mxu1 %v9797_v32 }
 0x495   :  { %6636 = vmatprep.subr.bf16.mxu1 %v7464_v2 }
 0x498   :  { %6637 = vmatpush3.bf16.msra.mxu1 %v7465_v36 }
 0x499   :  { %6662 = vmatprep.subr.bf16.mxu1 %v7466_v53 }
 0x49b   :  { %2898 = vmatmul.mubr.bf16.vlgmr.msra.gmra.mrb[160].mxu1 %v9798_v20 }
 0x49c   :  { %6663 = vmatpush3.bf16.msra.mxu1 %v7467_v25  ;;  %2905 = vmatprep.mubr.bf16.mxu1 %v9799_v9 }
 0x49d   :  { %6664 = vmatprep.subr.bf16.mxu1 %v7468_v6 }
 0x4a0   :  { %6665 = vmatpush3.bf16.msra.mxu1 %v7469_v56 }
 0x4a1   :  { %6666 = vmatprep.subr.bf16.mxu1 %v7470_v7 }
 0x4a3   :  { %2906 = vmatmul.mubr.bf16.gmra.mrb[164].mxu1 %v9800_v23 }
 0x4a4   :  { %6667 = vmatpush3.bf16.msra.mxu1 %v7471_v33  ;;  %2913 = vmatprep.mubr.bf16.mxu1 %v9801_v8 }
 0x4a5   :  { %6668 = vmatprep.subr.bf16.mxu1 %v7472_v30 }
 0x4a8   :  { %6669 = vmatpush3.bf16.msra.mxu1 %v7473_v21 }
 0x4a9   :  { %6670 = vmatprep.subr.bf16.mxu1 %v7474_v31 }
 0x4ab   :  { %2914 = vmatmul.mubr.bf16.gmra.mrb[168].mxu1 %v9802_v17 }
 0x4ac   :  { %6671 = vmatpush3.bf16.msra.mxu1 %v7475_v11  ;;  %2921 = vmatprep.mubr.bf16.mxu1 %v9803_v55 }
 0x4ad   :  { %6672 = vmatprep.subr.bf16.mxu1 %v7476_v14 }
 0x4b0   :  { %6673 = vmatpush3.bf16.msra.mxu1 %v7477_v22 }
 0x4b1   :  { %6674 = vmatprep.subr.bf16.mxu1 %v7478_v52 }
 0x4b3   :  { %2922 = vmatmul.mubr.bf16.gmra.mrb[172].mxu1 %v9804_v26 }
 0x4b4   :  { %6675 = vmatpush3.bf16.msra.mxu1 %v7479_v34  ;;  %3213 = vmatprep.mubr.bf16.mxu1 %v9805_v13 }
 0x4b5   :  { %6676 = vmatprep.subr.bf16.mxu1 %v7480_v3 }
 0x4b8   :  { %6677 = vmatpush3.bf16.msra.mxu1 %v7481_v45 }
 0x4bb   :  { %3214 = vmatmul.mubr.bf16.vlgmr.msra.gmra.mrb[176].mxu1 %v9806_v48 }
 0x4bc   :  { %3221 = vmatprep.mubr.bf16.mxu1 %v9807_v40 }
 0x4c3   :  { %3222 = vmatmul.mubr.bf16.gmra.mrb[180].mxu1 %v9808_v28 }
 0x4c4   :  { %3229 = vmatprep.mubr.bf16.mxu1 %v9809_v38 }
 0x4cb   :  { %3230 = vmatmul.mubr.bf16.gmra.mrb[184].mxu1 %v9810_v27 }
 0x4cc   :  { %3237 = vmatprep.mubr.bf16.mxu1 %v3051_v24 }
 0x4d3   :  { %3238 = vmatmul.mubr.bf16.gmra.mrb[188].mxu1 %v3050_v12 }
 0x52e   :  { %v6558_v59 = vpop.f32.mrb[128].mxu1 }
 0x52f   :  { %v6559_v60 = vpop.f32.mrb[129].mxu1 }
 0x530   :  { %v6560_v19 = vadd.f32 %v6559_v60, %v6558_v59  ;;  %v6561_v10 = vpop.f32.mrb[130].mxu1 }
 0x531   :  { %v6562_v1 = vpop.f32.mrb[131].mxu1 }
 0x532   :  { %v6563_v42 = vadd.f32 %v6562_v1, %v6561_v10 }
 0x536   :  { %v6564_v57 = vpop.f32.mrb[132].mxu1 }
 0x537   :  { %v6565_v4 = vpop.f32.mrb[133].mxu1 }
 0x538   :  { %v6566_v37 = vadd.f32 %v6565_v4, %v6564_v57  ;;  %v6567_v16 = vpop.f32.mrb[134].mxu1 }
 0x539   :  { %v6568_v51 = vpop.f32.mrb[135].mxu1 }
 0x53a   :  { %v6569_v63 = vadd.f32 %v6568_v51, %v6567_v16 }
 0x53e   :  { %v6570_v18 = vpop.f32.mrb[136].mxu1 }
 0x53f   :  { %v6571_v44 = vpop.f32.mrb[137].mxu1 }
 0x540   :  { %v6572_v54 = vadd.f32 %v6571_v44, %v6570_v18  ;;  %v6573_v24 = vpop.f32.mrb[138].mxu1 }
 0x541   :  { %v6574_v46 = vpop.f32.mrb[139].mxu1 }
 0x542   :  { %v6575_v58 = vadd.f32 %v6574_v46, %v6573_v24 }
 0x546   :  { %v6576_v61 = vpop.f32.mrb[140].mxu1 }
 0x547   :  { %v6577_v39 = vpop.f32.mrb[141].mxu1 }
 0x548   :  { %v6578_v12 = vadd.f32 %v6577_v39, %v6576_v61  ;;  %v6579_v47 = vpop.f32.mrb[142].mxu1 }
 0x549   :  { %v6580_v35 = vpop.f32.mrb[143].mxu1 }
 0x54a   :  { %v6581_v5 = vadd.f32 %v6580_v35, %v6579_v47  ;;  %v7482_v47 = vld [vmem:[%s9811_s5 + $0x10] sm:$0xff]  }
 0x54b   :  { %6858 = vmatprep.mubr.msk.bf16.mxu1 %vm3381_vm3, %v7482_v47 }
 0x54e   :  { %v6598_v15 = vpop.f32.mrb[144].mxu1 }
 0x54f   :  { %v6599_v29 = vpop.f32.mrb[145].mxu1 }
 0x550   :  { %v6600_v0 = vadd.f32 %v6599_v29, %v6598_v15  ;;  %v6601_v43 = vpop.f32.mrb[146].mxu1 }
 0x551   :  { %v6602_v41 = vpop.f32.mrb[147].mxu1 }
 0x552   :  { %v2592_v49 = vadd.f32 %v6600_v0, %v6560_v19  ;;  %v6603_v50 = vadd.f32 %v6602_v41, %v6601_v43 }
 0x554   :  { %v2595_v2 = vadd.f32 %v6603_v50, %v6563_v42 }
 0x556   :  { %v6604_v62 = vpop.f32.mrb[148].mxu1 }
 0x557   :  { %v6605_v36 = vpop.f32.mrb[149].mxu1 }
 0x558   :  { %v6606_v32 = vadd.f32 %v6605_v36, %v6604_v62  ;;  %v6607_v53 = vpop.f32.mrb[150].mxu1 }
 0x559   :  { %v6608_v25 = vpop.f32.mrb[151].mxu1 }
 0x55a   :  { %v2600_v6 = vadd.f32 %v6606_v32, %v6566_v37  ;;  %v6609_v20 = vadd.f32 %v6608_v25, %v6607_v53 }
 0x55c   :  { %v2603_v56 = vadd.f32 %v6609_v20, %v6569_v63 }
 0x55e   :  { %v6610_v9 = vpop.f32.mrb[152].mxu1 }
 0x55f   :  { %v6611_v7 = vpop.f32.mrb[153].mxu1 }
 0x560   :  { %v6612_v33 = vadd.f32 %v6611_v7, %v6610_v9  ;;  %v6613_v30 = vpop.f32.mrb[154].mxu1 }
 0x561   :  { %v6614_v23 = vpop.f32.mrb[155].mxu1 }
 0x562   :  { %v2608_v21 = vadd.f32 %v6612_v33, %v6572_v54  ;;  %v6615_v8 = vadd.f32 %v6614_v23, %v6613_v30 }
 0x564   :  { %v2611_v31 = vadd.f32 %v6615_v8, %v6575_v58 }
 0x566   :  { %v6616_v11 = vpop.f32.mrb[156].mxu1 }
 0x567   :  { %v6617_v14 = vpop.f32.mrb[157].mxu1 }
 0x568   :  { %v6618_v17 = vadd.f32 %v6617_v14, %v6616_v11  ;;  %v6619_v22 = vpop.f32.mrb[158].mxu1 }
 0x569   :  { %v6620_v55 = vpop.f32.mrb[159].mxu1 }
 0x56a   :  { %v2616_v52 = vadd.f32 %v6618_v17, %v6578_v12  ;;  %v6621_v34 = vadd.f32 %v6620_v55, %v6619_v22 }
 0x56c   :  { %v2619_v3 = vadd.f32 %v6621_v34, %v6581_v5 }
 0x56e   :  { %v6638_v26 = vpop.f32.mrb[160].mxu1 }
 0x56f   :  { %v6639_v45 = vpop.f32.mrb[161].mxu1 }
 0x570   :  { %v6640_v13 = vadd.f32 %v6639_v45, %v6638_v26  ;;  %v6641_v48 = vpop.f32.mrb[162].mxu1  ;;  %v7486_v26 = vld [vmem:[%s9811_s5] sm:$0xff]  }
 0x571   :  { %v6642_v40 = vpop.f32.mrb[163].mxu1  ;;  %6846 = vmatprep.mubr.msk.bf16.mxu0 %vm3381_vm3, %v7486_v26 }
 0x572   :  { %v2930_v28 = vadd.f32 %v6640_v13, %v2592_v49  ;;  %v6643_v38 = vadd.f32 %v6642_v40, %v6641_v48 }
 0x574   :  { %v2931_v27 = vadd.f32 %v6643_v38, %v2595_v2 }
 0x576   :  { %v6644_v59 = vpop.f32.mrb[164].mxu1 }
 0x577   :  { %v6645_v60 = vpop.f32.mrb[165].mxu1 }
 0x578   :  { %v6646_v19 = vadd.f32 %v6645_v60, %v6644_v59  ;;  %v6647_v10 = vpop.f32.mrb[166].mxu1 }
 0x579   :  { %v6648_v1 = vpop.f32.mrb[167].mxu1 }
 0x57a   :  { %v2932_v42 = vadd.f32 %v6646_v19, %v2600_v6  ;;  %v6649_v57 = vadd.f32 %v6648_v1, %v6647_v10 }
 0x57c   :  { %v2933_v4 = vadd.f32 %v6649_v57, %v2603_v56 }
 0x57e   :  { %v6650_v37 = vpop.f32.mrb[168].mxu1 }
 0x57f   :  { %v6651_v16 = vpop.f32.mrb[169].mxu1 }
 0x580   :  { %v6652_v51 = vadd.f32 %v6651_v16, %v6650_v37  ;;  %v6653_v63 = vpop.f32.mrb[170].mxu1 }
 0x581   :  { %v6654_v18 = vpop.f32.mrb[171].mxu1 }
 0x582   :  { %v2934_v44 = vadd.f32 %v6652_v51, %v2608_v21  ;;  %v6655_v54 = vadd.f32 %v6654_v18, %v6653_v63 }
 0x584   :  { %v2935_v24 = vadd.f32 %v6655_v54, %v2611_v31 }
 0x586   :  { %v6656_v46 = vpop.f32.mrb[172].mxu1 }
 0x587   :  { %v6657_v58 = vpop.f32.mrb[173].mxu1 }
 0x588   :  { %v6658_v61 = vadd.f32 %v6657_v58, %v6656_v46  ;;  %v6659_v39 = vpop.f32.mrb[174].mxu1 }
 0x589   :  { %v6660_v12 = vpop.f32.mrb[175].mxu1 }
 0x58a   :  { %v2936_v35 = vadd.f32 %v6658_v61, %v2616_v52  ;;  %v6661_v5 = vadd.f32 %v6660_v12, %v6659_v39 }
 0x58c   :  { %v2937_v15 = vadd.f32 %v6661_v5, %v2619_v3 }
 0x58e   :  { %v6678_v29 = vpop.f32.mrb[176].mxu1 }
 0x58f   :  { %v6679_v0 = vpop.f32.mrb[177].mxu1 }
 0x590   :  { %v6680_v43 = vadd.f32 %v6679_v0, %v6678_v29  ;;  %v6681_v41 = vpop.f32.mrb[178].mxu1 }
 0x591   :  { %v6682_v49 = vpop.f32.mrb[179].mxu1 }
 0x592   :  { %v3246_v50 = vadd.f32 %v6680_v43, %v2930_v28  ;;  %v6683_v2 = vadd.f32 %v6682_v49, %v6681_v41 }
 0x594   :  { %v3247_v62 = vadd.f32 %v6683_v2, %v2931_v27 }
 0x596   :  { %v3254_v36 = vadd.f32 %v3247_v62, %v3246_v50  ;;  %v6684_v32 = vpop.f32.mrb[180].mxu1 }
 0x597   :  { %v6685_v53 = vpop.f32.mrb[181].mxu1 }
 0x598   :  { %v6686_v25 = vadd.f32 %v6685_v53, %v6684_v32  ;;  %v6687_v6 = vpop.f32.mrb[182].mxu1 }
 0x599   :  { %v6688_v20 = vpop.f32.mrb[183].mxu1 }
 0x59a   :  { %v3248_v56 = vadd.f32 %v6686_v25, %v2932_v42  ;;  %v6689_v9 = vadd.f32 %v6688_v20, %v6687_v6 }
 0x59c   :  { %v3255_v7 = vadd.f32 %v3254_v36, %v3248_v56  ;;  %v3249_v33 = vadd.f32 %v6689_v9, %v2933_v4  ;;  %v6048_v9 = vld [vmem:[%s9755_s7] ss:$0 sm:$0xff] }
 0x59e   :  { %v3256_v30 = vadd.f32 %v3255_v7, %v3249_v33  ;;  %v6690_v23 = vpop.f32.mrb[184].mxu1 }
 0x59f   :  { %v6691_v21 = vpop.f32.mrb[185].mxu1 }
 0x5a0   :  { %v6692_v8 = vadd.f32 %v6691_v21, %v6690_v23  ;;  %v6693_v31 = vpop.f32.mrb[186].mxu1 }
 0x5a1   :  { %v6694_v11 = vpop.f32.mrb[187].mxu1 }
 0x5a2   :  { %v3250_v14 = vadd.f32 %v6692_v8, %v2934_v44  ;;  %v6695_v17 = vadd.f32 %v6694_v11, %v6693_v31 }
 0x5a4   :  { %v3257_v22 = vadd.f32 %v3256_v30, %v3250_v14  ;;  %v3251_v55 = vadd.f32 %v6695_v17, %v2935_v24 }
 0x5a6   :  { %v3258_v52 = vadd.f32 %v3257_v22, %v3251_v55  ;;  %v6696_v34 = vpop.f32.mrb[188].mxu1 }
 0x5a7   :  { %v6697_v3 = vpop.f32.mrb[189].mxu1 }
 0x5a8   :  { %v6698_v45 = vadd.f32 %v6697_v3, %v6696_v34  ;;  %v6699_v13 = vpop.f32.mrb[190].mxu1 }
 0x5a9   :  { %v6700_v48 = vpop.f32.mrb[191].mxu1 }
 0x5aa   :  { %v3252_v40 = vadd.f32 %v6698_v45, %v2936_v35  ;;  %v6701_v28 = vadd.f32 %v6700_v48, %v6699_v13 }
 0x5ac   :  { %v3259_v38 = vadd.f32 %v3258_v52, %v3252_v40  ;;  %v3253_v27 = vadd.f32 %v6701_v28, %v2937_v15 }
 0x5ae   :  { %v3260_v59 = vadd.f32 %v3259_v38, %v3253_v27 }
 0x5b0   :  { %v3261_v60 = vrot.slane %v3260_v59, 4 }
 0x5b2   :  { %v3262_v19 = vadd.f32 %v3261_v60, %v3260_v59 }
 0x5b4   :  { %v3263_v10 = vrot.slane %v3262_v19, 2 }
 0x5b6   :  { %v3264_v1 = vadd.f32 %v3263_v10, %v3262_v19 }
 0x5b8   :  { %v3265_v42 = vrot.slane %v3264_v1, 1 }
 0x5ba   :  { %v3266_v57 = vadd.f32 %v3265_v42, %v3264_v1 }
 0x5bc   :  { %v3268_v4 = vmul.f32 0.015625, %v3266_v57 }
 0x5be   :  { %v3269_v37 = vsub.f32 %v3246_v50, %v3268_v4  ;;  %v3270_v16 = vsub.f32 %v3247_v62, %v3268_v4  ;;  %v3271_v51 = vsub.f32 %v3248_v56, %v3268_v4  ;;  %v3272_v63 = vsub.f32 %v3249_v33, %v3268_v4 }
 0x5bf   :  { %v3273_v18 = vsub.f32 %v3250_v14, %v3268_v4  ;;  %v3274_v44 = vsub.f32 %v3251_v55, %v3268_v4  ;;  %v3275_v54 = vsub.f32 %v3252_v40, %v3268_v4  ;;  %v3276_v24 = vsub.f32 %v3253_v27, %v3268_v4  ;;  %v6049_v14 = vld [vmem:[%s9756_s8] ss:$0 sm:$0xff] }
 0x5c0   :  { %v3277_v46 = vmul.f32 %v3269_v37, %v3269_v37  ;;  %v3278_v58 = vmul.f32 %v3270_v16, %v3270_v16  ;;  %v3279_v61 = vmul.f32 %v3271_v51, %v3271_v51  ;;  %v3280_v12 = vmul.f32 %v3272_v63, %v3272_v63 }
 0x5c1   :  { %v3281_v35 = vmul.f32 %v3273_v18, %v3273_v18  ;;  %v3282_v15 = vmul.f32 %v3274_v44, %v3274_v44  ;;  %v3283_v0 = vmul.f32 %v3275_v54, %v3275_v54  ;;  %v3284_v41 = vmul.f32 %v3276_v24, %v3276_v24 }
 0x5c2   :  { %v3285_v39 = vadd.f32 %v3278_v58, %v3277_v46 }
 0x5c4   :  { %v3286_v47 = vadd.f32 %v3285_v39, %v3279_v61 }
 0x5c6   :  { %v3287_v5 = vadd.f32 %v3286_v47, %v3280_v12 }
 0x5c8   :  { %v3288_v29 = vadd.f32 %v3287_v5, %v3281_v35  ;;  %v7490_v35 = vld [vmem:[%s9812_s25 + $0x40] sm:$0xff]   ;;  %v7483_v5 = vld [vmem:[%s9811_s5 + $0x18] sm:$0xff]  }
 0x5ca   :  { %v3289_v43 = vadd.f32 %v3288_v29, %v3282_v15  ;;  %v7487_v15 = vld [vmem:[%s9811_s5 + $0x8] sm:$0xff]   ;;  %v7484_v29 = vld [vmem:[%s9811_s5 + $0x20] sm:$0xff]  }
 0x5cc   :  { %v3290_v49 = vadd.f32 %v3289_v43, %v3283_v0  ;;  %v7491_v0 = vld [vmem:[%s9812_s25 + $0x48] sm:$0xff]   ;;  %v7492_v43 = vld [vmem:[%s9812_s25 + $0x50] sm:$0xff]  }
 0x5ce   :  { %v3291_v50 = vadd.f32 %v3290_v49, %v3284_v41  ;;  %v7493_v41 = vld [vmem:[%s9812_s25 + $0x58] sm:$0xff]   ;;  %v7494_v49 = vld [vmem:[%s9812_s25 + $0x60] sm:$0xff]  }
 0x5d0   :  { %v3292_v2 = vrot.slane %v3291_v50, 4 }
 0x5d2   :  { %v3293_v62 = vadd.f32 %v3292_v2, %v3291_v50  ;;  %v7485_v50 = vld [vmem:[%s9811_s5 + $0x28] sm:$0xff]   ;;  %v7488_v2 = vld [vmem:[%s9811_s5 + $0x30] sm:$0xff]  }
 0x5d4   :  { %v3294_v36 = vrot.slane %v3293_v62, 2 }
 0x5d6   :  { %v3295_v32 = vadd.f32 %v3294_v36, %v3293_v62  ;;  %v7495_v62 = vld [vmem:[%s9812_s25 + $0x68] sm:$0xff]   ;;  %v7496_v36 = vld [vmem:[%s9812_s25 + $0x70] sm:$0xff]  }
 0x5d8   :  { %v3296_v53 = vrot.slane %v3295_v32, 1 }
 0x5da   :  { %v3297_v25 = vadd.f32 %v3296_v53, %v3295_v32  ;;  %v7489_v32 = vld [vmem:[%s9811_s5 + $0x38] sm:$0xff]  }
 0x5db   :  { %v7497_v53 = vld [vmem:[%s9812_s25 + $0x78] sm:$0xff]  }
 0x5dc   :  { %v3298_v6 = vmul.f32 0.015625, %v3297_v25  ;;  %v7498_v25 = vld [vmem:[%s9812_s25] sm:$0xff]  }
 0x5de   :  { %v3299_v20 = vadd.f32 1e-05, %v3298_v6 }
 0x5e0   :  { %7562 = vrsqrt.f32 %v3299_v20 }
 0x5ea   :  { %v7563_v56 = vpop.eup %7562 }
 0x5eb   :  { %v3301_v7 = vmul.f32 %v7563_v56, %v3269_v37  ;;  %v3302_v33 = vmul.f32 %v7563_v56, %v3270_v16  ;;  %v3303_v30 = vmul.f32 %v7563_v56, %v3271_v51  ;;  %v3304_v23 = vmul.f32 %v7563_v56, %v3272_v63 }
 0x5ec   :  { %v3305_v21 = vmul.f32 %v7563_v56, %v3273_v18  ;;  %v3306_v8 = vmul.f32 %v7563_v56, %v3274_v44  ;;  %v3307_v31 = vmul.f32 %v7563_v56, %v3275_v54  ;;  %v3308_v11 = vmul.f32 %v7563_v56, %v3276_v24 }
 0x5ed   :  { %v3316_v17 = vmul.f32 %v6048_v9, %v3301_v7  ;;  %v3317_v22 = vmul.f32 %v6048_v9, %v3302_v33  ;;  %v3318_v55 = vmul.f32 %v6048_v9, %v3303_v30  ;;  %v3319_v52 = vmul.f32 %v6048_v9, %v3304_v23 }
 0x5ee   :  { %v3320_v34 = vmul.f32 %v6048_v9, %v3305_v21  ;;  %v3321_v3 = vmul.f32 %v6048_v9, %v3306_v8  ;;  %v3322_v26 = vmul.f32 %v6048_v9, %v3307_v31  ;;  %v3323_v45 = vmul.f32 %v6048_v9, %v3308_v11 }
 0x5ef   :  { %v3331_v13 = vadd.f32 %v6049_v14, %v3316_v17  ;;  %v3332_v48 = vadd.f32 %v6049_v14, %v3317_v22  ;;  %v3333_v40 = vadd.f32 %v6049_v14, %v3318_v55  ;;  %v3334_v28 = vadd.f32 %v6049_v14, %v3319_v52  ;;  %v7500_v17 = vld [vmem:[%s9812_s25 + $0x10] sm:$0xff]   ;;  %v7501_v22 = vld [vmem:[%s9812_s25 + $0x18] sm:$0xff]   ;;  %v7502_v52 = vld [vmem:[%s9812_s25 + $0x20] sm:$0xff]  }
 0x5f0   :  { %v3335_v38 = vadd.f32 %v6049_v14, %v3320_v34  ;;  %v3336_v27 = vadd.f32 %v6049_v14, %v3321_v3  ;;  %v3337_v59 = vadd.f32 %v6049_v14, %v3322_v26  ;;  %v3338_v60 = vadd.f32 %v6049_v14, %v3323_v45  ;;  %v7499_v14 = vld [vmem:[%s9812_s25 + $0x8] sm:$0xff]  }
 0x5f1   :  { %vm3341_vm4 = vcmp.gt.f32.partialorder %v3333_v40, 0.0  ;;  %vm3342_vm5 = vcmp.gt.f32.partialorder %v3334_v28, 0.0  ;;  %v3347_v19 = vmul.f32 0.2, %v3331_v13  ;;  %v3348_v10 = vmul.f32 0.2, %v3332_v48 }
 0x5f2   :  { %vm3343_vm6 = vcmp.gt.f32.partialorder %v3335_v38, 0.0  ;;  %vm3344_vm7 = vcmp.gt.f32.partialorder %v3336_v27, 0.0  ;;  %vm3345_vm8 = vcmp.gt.f32.partialorder %v3337_v59, 0.0  ;;  %vm3346_vm9 = vcmp.gt.f32.partialorder %v3338_v60, 0.0 }
 0x5f3   :  { %v3349_v1 = vmul.f32 0.2, %v3333_v40  ;;  %v3350_v42 = vmul.f32 0.2, %v3334_v28  ;;  %v3351_v57 = vmul.f32 0.2, %v3335_v38 }
 0x5f4   :  { %v3352_v4 = vmul.f32 0.2, %v3336_v27  ;;  %v3353_v37 = vmul.f32 0.2, %v3337_v59  ;;  %v3354_v16 = vmul.f32 0.2, %v3338_v60 }
 0x5f5   :  { %v3358_v51 = vsel %vm3342_vm5, %v3334_v28, %v3350_v42  ;;  %v3359_v63 = vsel %vm3343_vm6, %v3335_v38, %v3351_v57  ;;  %vm3339_vm10 = vcmp.gt.f32.partialorder %v3331_v13, 0.0  ;;  %vm3340_vm11 = vcmp.gt.f32.partialorder %v3332_v48, 0.0  ;;  %v7505_v28 = vld [vmem:[%s9812_s25 + $0x38] sm:$0xff]   ;;  %v7507_v42 = vld [vmem:[%s9812_s25 + $0x88] sm:$0xff]   ;;  %v7508_v57 = vld [vmem:[%s9812_s25 + $0x90] sm:$0xff]  }
 0x5f6   :  { %v3360_v18 = vsel %vm3344_vm7, %v3336_v27, %v3352_v4  ;;  %v3361_v44 = vsel %vm3345_vm8, %v3337_v59, %v3353_v37  ;;  %v3362_v54 = vsel %vm3346_vm9, %v3338_v60, %v3354_v16  ;;  %v3355_v24 = vsel %vm3339_vm10, %v3331_v13, %v3347_v19  ;;  %v7506_v27 = vld [vmem:[%s9812_s25 + $0x80] sm:$0xff]   ;;  %v7509_v4 = vld [vmem:[%s9812_s25 + $0x98] sm:$0xff]   ;;  %v7511_v16 = vld [vmem:[%s9812_s25 + $0xa8] sm:$0xff]  }
 0x5f7   :  { %v9303_v46 = vpack.c.bf16 %v3360_v18, %v3359_v63  ;;  %v9305_v58 = vpack.c.bf16 %v3362_v54, %v3361_v44  ;;  %v3356_v61 = vsel %vm3340_vm11, %v3332_v48, %v3348_v10  ;;  %v3357_v39 = vsel %vm3341_vm4, %v3333_v40, %v3349_v1  ;;  %v7503_v48 = vld [vmem:[%s9812_s25 + $0x28] sm:$0xff]   ;;  %v7504_v40 = vld [vmem:[%s9812_s25 + $0x30] sm:$0xff]   ;;  %v7510_v37 = vld [vmem:[%s9812_s25 + $0xa0] sm:$0xff]  }
 0x5f8   :  { %v3363_v12 = vpack.c.bf16 %v3356_v61, %v3355_v24  ;;  %v3364_v47 = vpack.c.bf16 %v3358_v51, %v3357_v39  ;;  %v7512_v51 = vld [vmem:[%s9812_s25 + $0xb0] sm:$0xff]   ;;  %v7513_v63 = vld [vmem:[%s9812_s25 + $0xb8] sm:$0xff]   ;;  %v7514_v18 = vld [vmem:[%s9812_s25 + $0xc0] sm:$0xff]   ;;  %vm4775_vm4 = vcmask 130048   ;;  %vm5246_vm6 = vcmask 1043456  }
 0x5f9   :  { %v7515_v44 = vld [vmem:[%s9812_s25 + $0xc8] sm:$0xff]   ;;  %v7516_v54 = vld [vmem:[%s9812_s25 + $0xd0] sm:$0xff]   ;;  %v7517_v24 = vld [vmem:[%s9812_s25 + $0xd8] sm:$0xff]   ;;  %vm5242_vm7 = vcmask 64512   ;;  %vm5684_vm8 = vcmask 3072  }
 0x5fa   :  { %6838 = vmatprep.subr.bf16.mxu0 %v3363_v12  ;;  %6850 = vmatprep.subr.bf16.mxu1 %v3363_v12  ;;  %v7520_v61 = vld [vmem:[%s9812_s25 + $0xf0] sm:$0xff]   ;;  %v7521_v39 = vld [vmem:[%s9812_s25 + $0xf8] sm:$0xff]  }
 0x5fb   :  { %6839 = vmatpush3.bf16.msra.mxu0 %v3363_v12  ;;  %6851 = vmatpush3.bf16.msra.mxu1 %v3363_v12 }
 0x5fc   :  { %6840 = vmatprep.subr.bf16.mxu0 %v3364_v47  ;;  %6852 = vmatprep.subr.bf16.mxu1 %v3364_v47 }
 0x5ff   :  { %6841 = vmatpush3.bf16.msra.mxu0 %v3364_v47  ;;  %6853 = vmatpush3.bf16.msra.mxu1 %v3364_v47 }
 0x600   :  { %6842 = vmatprep.subr.bf16.mxu0 %v9303_v46  ;;  %6854 = vmatprep.subr.bf16.mxu1 %v9303_v46 }
 0x603   :  { %6843 = vmatpush3.bf16.msra.mxu0 %v9303_v46  ;;  %6855 = vmatpush3.bf16.msra.mxu1 %v9303_v46 }
 0x604   :  { %6844 = vmatprep.subr.bf16.mxu0 %v9305_v58  ;;  %6856 = vmatprep.subr.bf16.mxu1 %v9305_v58 }
 0x607   :  { %6845 = vmatpush3.bf16.msra.mxu0 %v9305_v58  ;;  %6857 = vmatpush3.bf16.msra.mxu1 %v9305_v58 }
 0x608   :  { %6902 = vmatprep.subr.bf16.mxu1 %v3363_v12  ;;  %6862 = vmatprep.subr.bf16.mxu0 %v7490_v35 }
 0x60a   :  { %6859 = vmatmul.mubr.msk.bf16.vlgmr.msra.gmra.mrb[192].mxu1 %vm3381_vm3, %v7483_v5  ;;  %6847 = vmatmul.mubr.msk.bf16.vlgmr.msra.gmra.mrb[96].mxu0 %vm3381_vm3, %v7487_v15 }
 0x60b   :  { %6903 = vmatpush3.bf16.msra.mxu1 %v3363_v12  ;;  %6910 = vmatprep.mubr.msk.bf16.mxu1 %vm3381_vm3, %v7484_v29 }
 0x60c   :  { %6904 = vmatprep.subr.bf16.mxu1 %v3364_v47  ;;  %6863 = vmatpush3.bf16.msra.mxu0 %v7490_v35 }
 0x60d   :  { %6864 = vmatprep.subr.bf16.mxu0 %v7491_v0 }
 0x60f   :  { %6905 = vmatpush3.bf16.msra.mxu1 %v3364_v47 }
 0x610   :  { %6906 = vmatprep.subr.bf16.mxu1 %v9303_v46  ;;  %6865 = vmatpush3.bf16.msra.mxu0 %v7491_v0 }
 0x611   :  { %6866 = vmatprep.subr.bf16.mxu0 %v7492_v43 }
 0x613   :  { %6907 = vmatpush3.bf16.msra.mxu1 %v9303_v46 }
 0x614   :  { %6908 = vmatprep.subr.bf16.mxu1 %v9305_v58  ;;  %6867 = vmatpush3.bf16.msra.mxu0 %v7492_v43 }
 0x615   :  { %6868 = vmatprep.subr.bf16.mxu0 %v7493_v41 }
 0x617   :  { %6909 = vmatpush3.bf16.msra.mxu1 %v9305_v58 }
 0x618   :  { %6934 = vmatprep.subr.bf16.mxu1 %v3363_v12  ;;  %6869 = vmatpush3.bf16.msra.mxu0 %v7493_v41 }
 0x619   :  { %6870 = vmatprep.subr.bf16.mxu0 %v7494_v49 }
 0x61a   :  { %6911 = vmatmul.mubr.msk.bf16.vlgmr.msra.gmra.mrb[196].mxu1 %vm3381_vm3, %v7485_v50 }
 0x61b   :  { %6935 = vmatpush3.bf16.msra.mxu1 %v3363_v12  ;;  %6942 = vmatprep.mubr.msk.bf16.mxu1 %vm3381_vm3, %v7488_v2  ;;  %v7576_v12 = vmov 0.0  }
 0x61c   :  { %6936 = vmatprep.subr.bf16.mxu1 %v3364_v47  ;;  %6871 = vmatpush3.bf16.msra.mxu0 %v7494_v49 }
 0x61d   :  { %6872 = vmatprep.subr.bf16.mxu0 %v7495_v62 }
 0x61f   :  { %6937 = vmatpush3.bf16.msra.mxu1 %v3364_v47 }
 0x620   :  { %6938 = vmatprep.subr.bf16.mxu1 %v9303_v46  ;;  %6873 = vmatpush3.bf16.msra.mxu0 %v7495_v62 }
 0x621   :  { %6874 = vmatprep.subr.bf16.mxu0 %v7496_v36 }
 0x623   :  { %6939 = vmatpush3.bf16.msra.mxu1 %v9303_v46  ;;  %v7518_v46 = vld [vmem:[%s9812_s25 + $0xe0] sm:$0xff]  }
 0x624   :  { %6940 = vmatprep.subr.bf16.mxu1 %v9305_v58  ;;  %6875 = vmatpush3.bf16.msra.mxu0 %v7496_v36 }
 0x625   :  { %6876 = vmatprep.subr.bf16.mxu0 %v7497_v53 }
 0x627   :  { %6941 = vmatpush3.bf16.msra.mxu1 %v9305_v58  ;;  %v7519_v58 = vld [vmem:[%s9812_s25 + $0xe8] sm:$0xff]  }
 0x628   :  { %6877 = vmatpush3.bf16.msra.mxu0 %v7497_v53  ;;  %6966 = vmatprep.subr.bf16.mxu1 %v7576_v12 }
 0x629   :  { %6882 = vmatprep.subr.bf16.mxu0 %v7498_v25 }
 0x62a   :  { %6943 = vmatmul.mubr.msk.bf16.vlgmr.msra.gmra.mrb[200].mxu1 %vm3381_vm3, %v7489_v32 }
 0x62b   :  { %6970 = vmatprep.mubr.msk.bf16.mxu1 %vm7577_vm12, %v7576_v12 }
 0x6dd   :  { %v6860_v6 = vpop.f32.mrb[192].mxu1  ;;  %v6848_v20 = vpop.f32.mrb[96].mxu0 }
 0x6de   :  { %v3510_v56 = vpop.f32.mrb[193].mxu1  ;;  %v3422_v9 = vpop.f32.mrb[97].mxu0 }
 0x6df   :  { %v6861_v7 = vpop.f32.mrb[194].mxu1  ;;  %v6849_v33 = vpop.f32.mrb[98].mxu0 }
 0x6e0   :  { %v3526_v30 = vpack.c.bf16 %v6861_v7, %v6860_v6  ;;  %v3513_v23 = vpop.f32.mrb[195].mxu1  ;;  %v3438_v21 = vpack.c.bf16 %v6849_v33, %v6848_v20  ;;  %v3425_v8 = vpop.f32.mrb[99].mxu0 }
 0x6e1   :  { %v3525_v31 = vpack.c.bf16 %v3513_v23, %v3510_v56  ;;  %v3437_v11 = vpack.c.bf16 %v3425_v8, %v3422_v9 }
 0x6e3   :  { %6878 = vmatprep.mubr.bf16.mxu0 %v3525_v31 }
 0x6e4   :  { %6879 = vmatmul.mubr.bf16.vlgmr.msra.gmra.mrb[100].mxu0 %v3526_v30 }
 0x6e5   :  { %6883 = vmatpush3.bf16.msra.mxu0 %v7498_v25  ;;  %6898 = vmatprep.mubr.bf16.mxu0 %v3437_v11 }
 0x6e6   :  { %6884 = vmatprep.subr.bf16.mxu0 %v7499_v14 }
 0x6e9   :  { %6885 = vmatpush3.bf16.msra.mxu0 %v7499_v14 }
 0x6ea   :  { %6886 = vmatprep.subr.bf16.mxu0 %v7500_v17 }
 0x6ed   :  { %6887 = vmatpush3.bf16.msra.mxu0 %v7500_v17  ;;  %v6912_v55 = vpop.f32.mrb[196].mxu1 }
 0x6ee   :  { %6888 = vmatprep.subr.bf16.mxu0 %v7501_v22  ;;  %v3793_v34 = vpop.f32.mrb[197].mxu1 }
 0x6ef   :  { %v6913_v3 = vpop.f32.mrb[198].mxu1 }
 0x6f0   :  { %v3809_v26 = vpack.c.bf16 %v6913_v3, %v6912_v55  ;;  %v3796_v45 = vpop.f32.mrb[199].mxu1 }
 0x6f1   :  { %6889 = vmatpush3.bf16.msra.mxu0 %v7501_v22  ;;  %v3808_v13 = vpack.c.bf16 %v3796_v45, %v3793_v34 }
 0x6f2   :  { %6890 = vmatprep.subr.bf16.mxu0 %v7502_v52 }
 0x6f5   :  { %6891 = vmatpush3.bf16.msra.mxu0 %v7502_v52 }
 0x6f6   :  { %6892 = vmatprep.subr.bf16.mxu0 %v7503_v48 }
 0x6f9   :  { %6893 = vmatpush3.bf16.msra.mxu0 %v7503_v48 }
 0x6fa   :  { %6894 = vmatprep.subr.bf16.mxu0 %v7504_v40 }
 0x6fd   :  { %6895 = vmatpush3.bf16.msra.mxu0 %v7504_v40  ;;  %v6944_v38 = vpop.f32.mrb[200].mxu1 }
 0x6fe   :  { %6896 = vmatprep.subr.bf16.mxu0 %v7505_v28  ;;  %v3983_v59 = vpop.f32.mrb[201].mxu1 }
 0x6ff   :  { %v6945_v60 = vpop.f32.mrb[202].mxu1 }
 0x700   :  { %v3999_v19 = vpack.c.bf16 %v6945_v60, %v6944_v38  ;;  %v3986_v10 = vpop.f32.mrb[203].mxu1 }
 0x701   :  { %6897 = vmatpush3.bf16.msra.mxu0 %v7505_v28  ;;  %v3998_v1 = vpack.c.bf16 %v3986_v10, %v3983_v59 }
 0x702   :  { %6914 = vmatprep.subr.bf16.mxu0 %v7506_v27 }
 0x704   :  { %6899 = vmatmul.mubr.bf16.vlgmr.msra.gmra.mrb[100].mxu0 %v3438_v21 }
 0x705   :  { %6915 = vmatpush3.bf16.msra.mxu0 %v7506_v27  ;;  %6930 = vmatprep.mubr.bf16.mxu0 %v3808_v13  ;;  %v6158_v27 = vld [vmem:[%s9759_s11] ss:$0 sm:$0xff] }
 0x706   :  { %6916 = vmatprep.subr.bf16.mxu0 %v7507_v42 }
 0x709   :  { %6917 = vmatpush3.bf16.msra.mxu0 %v7507_v42 }
 0x70a   :  { %6918 = vmatprep.subr.bf16.mxu0 %v7508_v57 }
 0x70d   :  { %6919 = vmatpush3.bf16.msra.mxu0 %v7508_v57 }
 0x70e   :  { %6920 = vmatprep.subr.bf16.mxu0 %v7509_v4 }
 0x711   :  { %6921 = vmatpush3.bf16.msra.mxu0 %v7509_v4 }
 0x712   :  { %6922 = vmatprep.subr.bf16.mxu0 %v7510_v37 }
 0x715   :  { %6923 = vmatpush3.bf16.msra.mxu0 %v7510_v37 }
 0x716   :  { %6924 = vmatprep.subr.bf16.mxu0 %v7511_v16 }
 0x719   :  { %6925 = vmatpush3.bf16.msra.mxu0 %v7511_v16 }
 0x71a   :  { %6926 = vmatprep.subr.bf16.mxu0 %v7512_v51 }
 0x71d   :  { %6927 = vmatpush3.bf16.msra.mxu0 %v7512_v51 }
 0x71e   :  { %6928 = vmatprep.subr.bf16.mxu0 %v7513_v63 }
 0x721   :  { %6929 = vmatpush3.bf16.msra.mxu0 %v7513_v63 }
 0x722   :  { %6946 = vmatprep.subr.bf16.mxu0 %v7514_v18 }
 0x724   :  { %6931 = vmatmul.mubr.bf16.vlgmr.msra.gmra.mrb[100].mxu0 %v3809_v26 }
 0x725   :  { %6947 = vmatpush3.bf16.msra.mxu0 %v7514_v18  ;;  %6962 = vmatprep.mubr.bf16.mxu0 %v3998_v1  ;;  %v6159_v1 = vld [vmem:[%s9760_s12] ss:$0 sm:$0xff] }
 0x726   :  { %6948 = vmatprep.subr.bf16.mxu0 %v7515_v44 }
 0x729   :  { %6949 = vmatpush3.bf16.msra.mxu0 %v7515_v44 }
 0x72a   :  { %6950 = vmatprep.subr.bf16.mxu0 %v7516_v54 }
 0x72d   :  { %6951 = vmatpush3.bf16.msra.mxu0 %v7516_v54 }
 0x72e   :  { %6952 = vmatprep.subr.bf16.mxu0 %v7517_v24 }
 0x731   :  { %6953 = vmatpush3.bf16.msra.mxu0 %v7517_v24 }
 0x732   :  { %6954 = vmatprep.subr.bf16.mxu0 %v7518_v46 }
 0x735   :  { %6955 = vmatpush3.bf16.msra.mxu0 %v7518_v46 }
 0x736   :  { %6956 = vmatprep.subr.bf16.mxu0 %v7519_v58 }
 0x739   :  { %6957 = vmatpush3.bf16.msra.mxu0 %v7519_v58 }
 0x73a   :  { %6958 = vmatprep.subr.bf16.mxu0 %v7520_v61 }
 0x73d   :  { %6959 = vmatpush3.bf16.msra.mxu0 %v7520_v61 }
 0x73e   :  { %6960 = vmatprep.subr.bf16.mxu0 %v7521_v39 }
 0x741   :  { %6961 = vmatpush3.bf16.msra.mxu0 %v7521_v39 }
 0x742   :  { %7046 = vmatprep.subr.bf16.mxu0 %v7576_v12 }
 0x744   :  { %6963 = vmatmul.mubr.bf16.vlgmr.msra.gmra.mrb[100].mxu0 %v3999_v19 }
 0x745   :  { %7048 = vmatprep.mubr.msk.bf16.mxu0 %vm7577_vm12, %v7576_v12 }
 0x817   :  { %v6964_v47 = vpop.f32.mrb[100].mxu0 }
 0x818   :  { %v4099_v35 = vpop.f32.mrb[101].mxu0  ;;  %v4121_v41 = vsel %vm3381_vm3, %v6964_v47, 0.0 }
 0x819   :  { %v6965_v5 = vpop.f32.mrb[102].mxu0  ;;  %v4118_v29 = vsel %vm3381_vm3, %v4099_v35, 0.0 }
 0x81a   :  { %v4102_v15 = vpop.f32.mrb[103].mxu0  ;;  %v4123_v50 = vsel %vm3381_vm3, %v6965_v5, 0.0 }
 0x81b   :  { %v4119_v0 = vsel %vm3381_vm3, %v4102_v15, 0.0 }
 0x81c   :  { %v4120_v43 = vadd.f32 %v4119_v0, %v4118_v29  ;;  %v7523_v29 = vld [vmem:[%s9757_s13 + $0x8] sm:$0xff]   ;;  %v7524_v0 = vld [vmem:[%s9758_s14 + $0x20] sm:$0xff]  }
 0x81e   :  { %v4122_v49 = vadd.f32 %v4121_v41, %v4120_v43  ;;  %v7525_v43 = vld [vmem:[%s9758_s14 + $0x28] sm:$0xff]   ;;  %v7526_v41 = vld [vmem:[%s9758_s14 + $0x30] sm:$0xff]  }
 0x820   :  { %v4124_v2 = vadd.f32 %v4123_v50, %v4122_v49  ;;  %v7527_v49 = vld [vmem:[%s9758_s14 + $0x38] sm:$0xff]  }
 0x822   :  { %v4125_v62 = vrot.slane %v4124_v2, 4 }
 0x824   :  { %v4126_v36 = vadd.f32 %v4125_v62, %v4124_v2 }
 0x826   :  { %v4127_v32 = vrot.slane %v4126_v36, 2 }
 0x828   :  { %v4128_v53 = vadd.f32 %v4127_v32, %v4126_v36 }
 0x82a   :  { %v4129_v25 = vrot.slane %v4128_v53, 1 }
 0x82c   :  { %v4130_v6 = vadd.f32 %v4129_v25, %v4128_v53 }
 0x82e   :  { %v4132_v20 = vmul.f32 0.03125, %v4130_v6 }
 0x830   :  { %v4133_v56 = vsub.f32 %v4099_v35, %v4132_v20  ;;  %v4134_v9 = vsub.f32 %v4102_v15, %v4132_v20  ;;  %v4135_v7 = vsub.f32 %v6964_v47, %v4132_v20  ;;  %v4136_v33 = vsub.f32 %v6965_v5, %v4132_v20  ;;  %v7522_v15 = vld [vmem:[%s9757_s13] sm:$0xff]  }
 0x831   :  { %v7528_v20 = vld [vmem:[%s9758_s14] sm:$0xff]  }
 0x832   :  { %v4137_v30 = vmul.f32 %v4133_v56, %v4133_v56  ;;  %v4138_v23 = vmul.f32 %v4134_v9, %v4134_v9  ;;  %v4139_v21 = vmul.f32 %v4135_v7, %v4135_v7  ;;  %v4140_v8 = vmul.f32 %v4136_v33, %v4136_v33 }
 0x834   :  { %v4141_v31 = vsel %vm3381_vm3, %v4137_v30, 0.0  ;;  %v4142_v11 = vsel %vm3381_vm3, %v4138_v23, 0.0  ;;  %v4144_v17 = vsel %vm3381_vm3, %v4139_v21, 0.0  ;;  %v4146_v55 = vsel %vm3381_vm3, %v4140_v8, 0.0  ;;  %v7531_v30 = vld [vmem:[%s9758_s14 + $0x18] sm:$0xff]   ;;  %v7532_v23 = vld [vmem:[%s9757_s13 + $0x10] sm:$0xff]  }
 0x835   :  { %v4143_v14 = vadd.f32 %v4142_v11, %v4141_v31  ;;  %v7533_v21 = vld [vmem:[%s9758_s14 + $0x40] sm:$0xff]   ;;  %v7534_v8 = vld [vmem:[%s9758_s14 + $0x48] sm:$0xff]   ;;  %v7535_v31 = vld [vmem:[%s9758_s14 + $0x50] sm:$0xff]  }
 0x836   :  { %v7536_v11 = vld [vmem:[%s9758_s14 + $0x58] sm:$0xff]  }
 0x837   :  { %v4145_v22 = vadd.f32 %v4144_v17, %v4143_v14 }
 0x839   :  { %v4147_v52 = vadd.f32 %v4146_v55, %v4145_v22 }
 0x83b   :  { %v4148_v34 = vrot.slane %v4147_v52, 4 }
 0x83d   :  { %v4149_v3 = vadd.f32 %v4148_v34, %v4147_v52  ;;  %v7537_v34 = vld [vmem:[%s9757_s13 + $0x18] sm:$0xff]  }
 0x83f   :  { %v4150_v26 = vrot.slane %v4149_v3, 2 }
 0x841   :  { %v4151_v45 = vadd.f32 %v4150_v26, %v4149_v3  ;;  %v7538_v3 = vld [vmem:[%s9758_s14 + $0x60] sm:$0xff]   ;;  %v7539_v26 = vld [vmem:[%s9758_s14 + $0x68] sm:$0xff]  }
 0x843   :  { %v4152_v13 = vrot.slane %v4151_v45, 1 }
 0x845   :  { %v4153_v48 = vadd.f32 %v4152_v13, %v4151_v45  ;;  %v7540_v45 = vld [vmem:[%s9758_s14 + $0x70] sm:$0xff]   ;;  %v7541_v13 = vld [vmem:[%s9758_s14 + $0x78] sm:$0xff]  }
 0x847   :  { %v4154_v40 = vmul.f32 0.03125, %v4153_v48 }
 0x849   :  { %v4155_v28 = vadd.f32 1e-05, %v4154_v40 }
 0x84b   :  { %7564 = vrsqrt.f32 %v4155_v28 }
 0x855   :  { %v7565_v38 = vpop.eup %7564 }
 0x856   :  { %v4157_v59 = vmul.f32 %v7565_v38, %v4133_v56  ;;  %v4158_v60 = vmul.f32 %v7565_v38, %v4134_v9  ;;  %v4159_v19 = vmul.f32 %v7565_v38, %v4135_v7  ;;  %v4160_v10 = vmul.f32 %v7565_v38, %v4136_v33  ;;  %v7529_v7 = vld [vmem:[%s9758_s14 + $0x8] sm:$0xff]   ;;  %v7530_v33 = vld [vmem:[%s9758_s14 + $0x10] sm:$0xff]  }
 0x858   :  { %v4168_v42 = vmul.f32 %v6158_v27, %v4157_v59  ;;  %v4169_v57 = vmul.f32 %v6158_v27, %v4158_v60  ;;  %v4170_v4 = vmul.f32 %v6158_v27, %v4159_v19  ;;  %v4171_v37 = vmul.f32 %v6158_v27, %v4160_v10 }
 0x85a   :  { %v4180_v16 = vadd.f32 %v6159_v1, %v4169_v57  ;;  %v4179_v51 = vadd.f32 %v6159_v1, %v4168_v42  ;;  %v4181_v63 = vadd.f32 %v6159_v1, %v4170_v4  ;;  %v4182_v18 = vadd.f32 %v6159_v1, %v4171_v37 }
 0x85c   :  { %v4188_v44 = vmul.f32 0.2, %v4180_v16  ;;  %vm4183_vm13 = vcmp.gt.f32.partialorder %v4179_v51, 0.0  ;;  %vm4184_vm14 = vcmp.gt.f32.partialorder %v4180_v16, 0.0  ;;  %v4187_v54 = vmul.f32 0.2, %v4179_v51 }
 0x85d   :  { %vm4185_vm15 = vcmp.gt.f32.partialorder %v4181_v63, 0.0  ;;  %vm4186_vm0 = vcmp.gt.f32.partialorder %v4182_v18, 0.0  ;;  %v4189_v24 = vmul.f32 0.2, %v4181_v63  ;;  %v4190_v46 = vmul.f32 0.2, %v4182_v18 }
 0x85e   :  { %v4191_v58 = vsel %vm4183_vm13, %v4179_v51, %v4187_v54  ;;  %v4192_v61 = vsel %vm4184_vm14, %v4180_v16, %v4188_v44 }
 0x85f   :  { %v9464_v39 = vpack.c.bf16 %v4192_v61, %v4191_v58  ;;  %v4193_v47 = vsel %vm4185_vm15, %v4181_v63, %v4189_v24  ;;  %v4194_v35 = vsel %vm4186_vm0, %v4182_v18, %v4190_v46 }
 0x860   :  { %v9466_v5 = vpack.c.bf16 %v4194_v35, %v4193_v47 }
 0x861   :  { %6967 = vmatpush3.bf16.msra.mxu1 %v9464_v39 }
 0x862   :  { %6968 = vmatprep.subr.bf16.mxu1 %v7576_v12 }
 0x865   :  { %6969 = vmatpush3.bf16.msra.mxu1 %v9466_v5 }
 0x866   :  { %6974 = vmatprep.subr.bf16.mxu1 %v7576_v12 }
 0x868   :  { %6971 = vmatmul.mubr.msk.bf16.vlgmr.msra.gmra.mrb[204].mxu1 %vm4204_vm1, %v7522_v15 }
 0x869   :  { %6975 = vmatpush3.bf16.msra.mxu1 %v9464_v39  ;;  %6978 = vmatprep.mubr.msk.bf16.mxu1 %vm7577_vm12, %v7576_v12 }
 0x86a   :  { %6976 = vmatprep.subr.bf16.mxu1 %v7576_v12 }
 0x86d   :  { %6977 = vmatpush3.bf16.msra.mxu1 %v9466_v5 }
 0x86e   :  { %6982 = vmatprep.subr.bf16.mxu1 %v7576_v12 }
 0x870   :  { %6979 = vmatmul.mubr.msk.bf16.vlgmr.msra.gmra.mrb[208].mxu1 %vm4204_vm1, %v7523_v29 }
 0x871   :  { %6983 = vmatpush3.bf16.msra.mxu1 %v7524_v0  ;;  %6990 = vmatprep.mubr.msk.bf16.mxu1 %vm7577_vm12, %v7576_v12 }
 0x872   :  { %6984 = vmatprep.subr.bf16.mxu1 %v7576_v12 }
 0x875   :  { %6985 = vmatpush3.bf16.msra.mxu1 %v7525_v43 }
 0x876   :  { %6986 = vmatprep.subr.bf16.mxu1 %v7576_v12 }
 0x879   :  { %6987 = vmatpush3.bf16.msra.mxu1 %v7526_v41 }
 0x87a   :  { %6988 = vmatprep.subr.bf16.mxu1 %v7576_v12 }
 0x87d   :  { %6989 = vmatpush3.bf16.msra.mxu1 %v7527_v49 }
 0x87e   :  { %6994 = vmatprep.subr.bf16.mxu1 %v7576_v12 }
 0x93b   :  { %v4242_v50 = vpop.f32.mrb[204].mxu1 }
 0x93c   :  { %v6972_v2 = vpop.f32.mrb[205].mxu1 }
 0x93d   :  { %v4245_v62 = vpop.f32.mrb[206].mxu1  ;;  %v6218_v2 = vld [vmem:[%s9762_s15] ss:$0 sm:$0xff] }
 0x93e   :  { %v4249_v36 = vpack.c.bf16 %v4245_v62, %v4242_v50  ;;  %v6973_v32 = vpop.f32.mrb[207].mxu1 }
 0x93f   :  { %v6219_v32 = vld [vmem:[%s9763_s16] ss:$0 sm:$0xff] }
 0x943   :  { %v4303_v53 = vpop.f32.mrb[208].mxu1 }
 0x944   :  { %v6980_v25 = vpop.f32.mrb[209].mxu1 }
 0x945   :  { %v4306_v6 = vpop.f32.mrb[210].mxu1 }
 0x946   :  { %v4310_v56 = vpack.c.bf16 %v4306_v6, %v4303_v53  ;;  %v6981_v9 = vpop.f32.mrb[211].mxu1 }
 0x948   :  { %6991 = vmatmul.mubr.msk.bf16.vlgmr.msra.gmra.mrb[212].mxu1 %vm3381_vm3, %v4310_v56 }
 0x949   :  { %6995 = vmatpush3.bf16.msra.mxu1 %v7528_v20  ;;  %7002 = vmatprep.mubr.msk.bf16.mxu1 %vm7577_vm12, %v7576_v12 }
 0x94a   :  { %6996 = vmatprep.subr.bf16.mxu1 %v7576_v12 }
 0x94d   :  { %6997 = vmatpush3.bf16.msra.mxu1 %v7529_v7 }
 0x94e   :  { %6998 = vmatprep.subr.bf16.mxu1 %v7576_v12 }
 0x951   :  { %6999 = vmatpush3.bf16.msra.mxu1 %v7530_v33 }
 0x952   :  { %7000 = vmatprep.subr.bf16.mxu1 %v7576_v12 }
 0x955   :  { %7001 = vmatpush3.bf16.msra.mxu1 %v7531_v30 }
 0x956   :  { %7006 = vmatprep.subr.bf16.mxu1 %v7576_v12 }
 0x958   :  { %7003 = vmatmul.mubr.msk.bf16.vlgmr.msra.gmra.mrb[212].mxu1 %vm3381_vm3, %v4249_v36 }
 0x959   :  { %7007 = vmatpush3.bf16.msra.mxu1 %v9464_v39  ;;  %7010 = vmatprep.mubr.msk.bf16.mxu1 %vm7577_vm12, %v7576_v12 }
 0x95a   :  { %7008 = vmatprep.subr.bf16.mxu1 %v7576_v12 }
 0x95d   :  { %7009 = vmatpush3.bf16.msra.mxu1 %v9466_v5 }
 0x95e   :  { %7014 = vmatprep.subr.bf16.mxu1 %v7576_v12 }
 0x960   :  { %7011 = vmatmul.mubr.msk.bf16.vlgmr.msra.gmra.mrb[216].mxu1 %vm4204_vm1, %v7532_v23  ;;  %v6221_v23 = vld [vmem:[%s9764_s17 + $0x4] sm:$0xf] }
 0x961   :  { %7015 = vmatpush3.bf16.msra.mxu1 %v7533_v21  ;;  %7022 = vmatprep.mubr.msk.bf16.mxu1 %vm7577_vm12, %v7576_v12  ;;  %v4774_v21 = vld [vmem:[%s9764_s17] sm:$0xf] }
 0x962   :  { %7016 = vmatprep.subr.bf16.mxu1 %v7576_v12 }
 0x965   :  { %7017 = vmatpush3.bf16.msra.mxu1 %v7534_v8  ;;  %v7542_v8 = vld [vmem:[%s9761_s18 + $0x10] sm:$0xff]  }
 0x966   :  { %7018 = vmatprep.subr.bf16.mxu1 %v7576_v12 }
 0x969   :  { %7019 = vmatpush3.bf16.msra.mxu1 %v7535_v31  ;;  %v6233_v31 = vld [vmem:[%s9764_s17 + $0x8] sm:$0xf] }
 0x96a   :  { %7020 = vmatprep.subr.bf16.mxu1 %v7576_v12 }
 0x96d   :  { %7021 = vmatpush3.bf16.msra.mxu1 %v7536_v11  ;;  %v6242_v11 = vld [vmem:[%s9764_s17 + $0xc] sm:$0xf] }
 0x96e   :  { %7026 = vmatprep.subr.bf16.mxu1 %v7576_v12 }
 0xa33   :  { %v4501_v14 = vpop.f32.mrb[216].mxu1 }
 0xa34   :  { %v7012_v17 = vpop.f32.mrb[217].mxu1 }
 0xa35   :  { %v4504_v22 = vpop.f32.mrb[218].mxu1 }
 0xa36   :  { %v4508_v55 = vpack.c.bf16 %v4504_v22, %v4501_v14  ;;  %v7013_v52 = vpop.f32.mrb[219].mxu1  ;;  %v7543_v14 = vld [vmem:[%s9761_s18 + $0x18] sm:$0xff]   ;;  %v7544_v22 = vld [vmem:[%s9761_s18] sm:$0xff]  }
 0xa38   :  { %7023 = vmatmul.mubr.msk.bf16.vlgmr.msra.gmra.mrb[212].mxu1 %vm3381_vm3, %v4508_v55 }
 0xa39   :  { %7027 = vmatpush3.bf16.msra.mxu1 %v9464_v39  ;;  %7030 = vmatprep.mubr.msk.bf16.mxu1 %vm7577_vm12, %v7576_v12 }
 0xa3a   :  { %7028 = vmatprep.subr.bf16.mxu1 %v7576_v12 }
 0xa3d   :  { %7029 = vmatpush3.bf16.msra.mxu1 %v9466_v5 }
 0xa3e   :  { %7034 = vmatprep.subr.bf16.mxu1 %v7576_v12 }
 0xa40   :  { %7031 = vmatmul.mubr.msk.bf16.vlgmr.msra.gmra.mrb[220].mxu1 %vm4204_vm1, %v7537_v34 }
 0xa41   :  { %7035 = vmatpush3.bf16.msra.mxu1 %v7538_v3  ;;  %7042 = vmatprep.mubr.msk.bf16.mxu1 %vm7577_vm12, %v7576_v12 }
 0xa42   :  { %7036 = vmatprep.subr.bf16.mxu1 %v7576_v12 }
 0xa45   :  { %7037 = vmatpush3.bf16.msra.mxu1 %v7539_v26 }
 0xa46   :  { %7038 = vmatprep.subr.bf16.mxu1 %v7576_v12 }
 0xa49   :  { %7039 = vmatpush3.bf16.msra.mxu1 %v7540_v45 }
 0xa4a   :  { %7040 = vmatprep.subr.bf16.mxu1 %v7576_v12 }
 0xa4d   :  { %7041 = vmatpush3.bf16.msra.mxu1 %v7541_v13 }
 0xa4e   :  { %7052 = vmatprep.subr.bf16.mxu1 %v7576_v12 }
 0xb13   :  { %v4633_v48 = vpop.f32.mrb[220].mxu1 }
 0xb14   :  { %v7032_v40 = vpop.f32.mrb[221].mxu1 }
 0xb15   :  { %v4636_v28 = vpop.f32.mrb[222].mxu1  ;;  %v7545_v40 = vld [vmem:[%s9761_s18 + $0x8] sm:$0xff]  }
 0xb16   :  { %v4640_v38 = vpack.c.bf16 %v4636_v28, %v4633_v48  ;;  %v7033_v27 = vpop.f32.mrb[223].mxu1 }
 0xb18   :  { %7043 = vmatmul.mubr.msk.bf16.vlgmr.msra.gmra.mrb[212].mxu1 %vm3381_vm3, %v4640_v38 }
 0xb19   :  { %7054 = vmatprep.mubr.msk.bf16.mxu1 %vm7577_vm12, %v7576_v12 }
 0xbeb   :  { %v4711_v59 = vpop.f32.mrb[212].mxu1 }
 0xbec   :  { %v7044_v60 = vpop.f32.mrb[213].mxu1  ;;  %v4720_v10 = vsel %vm4204_vm1, %v4711_v59, 0.0 }
 0xbed   :  { %v4714_v19 = vpop.f32.mrb[214].mxu1 }
 0xbee   :  { %v4721_v1 = vsel %vm4204_vm1, %v4714_v19, 0.0  ;;  %v7045_v42 = vpop.f32.mrb[215].mxu1 }
 0xbef   :  { %v4722_v57 = vadd.f32 %v4721_v1, %v4720_v10  ;;  %v7547_v10 = vld [vmem:[%s9761_s18 + $0x28] sm:$0xff]  }
 0xbf1   :  { %v4723_v4 = vrot.slane %v4722_v57, 4 }
 0xbf3   :  { %v4724_v37 = vadd.f32 %v4723_v4, %v4722_v57 }
 0xbf5   :  { %v4725_v16 = vrot.slane %v4724_v37, 2 }
 0xbf7   :  { %v4726_v51 = vadd.f32 %v4725_v16, %v4724_v37  ;;  %v7548_v16 = vld [vmem:[%s9761_s18 + $0x30] sm:$0xff]  }
 0xbf9   :  { %v4727_v63 = vrot.slane %v4726_v51, 1 }
 0xbfb   :  { %v4728_v18 = vadd.f32 %v4727_v63, %v4726_v51  ;;  %v7549_v51 = vld [vmem:[%s9761_s18 + $0x38] sm:$0xff]  }
 0xbfd   :  { %v4730_v44 = vmul.f32 0.0625, %v4728_v18  ;;  %v7550_v18 = vld [vmem:[%s9765_s22 + $0x10] sm:$0xff]  }
 0xbff   :  { %v4731_v54 = vsub.f32 %v4711_v59, %v4730_v44  ;;  %v4732_v24 = vsub.f32 %v4714_v19, %v4730_v44  ;;  %v7546_v19 = vld [vmem:[%s9761_s18 + $0x20] sm:$0xff]  }
 0xc01   :  { %v4733_v46 = vmul.f32 %v4731_v54, %v4731_v54  ;;  %v4734_v58 = vmul.f32 %v4732_v24, %v4732_v24 }
 0xc03   :  { %v4735_v61 = vsel %vm4204_vm1, %v4733_v46, 0.0  ;;  %v4736_v39 = vsel %vm4204_vm1, %v4734_v58, 0.0 }
 0xc04   :  { %v4737_v47 = vadd.f32 %v4736_v39, %v4735_v61 }
 0xc06   :  { %v4738_v35 = vrot.slane %v4737_v47, 4 }
 0xc08   :  { %v4739_v5 = vadd.f32 %v4738_v35, %v4737_v47 }
 0xc0a   :  { %v4740_v15 = vrot.slane %v4739_v5, 2 }
 0xc0c   :  { %v4741_v29 = vadd.f32 %v4740_v15, %v4739_v5 }
 0xc0e   :  { %v4742_v0 = vrot.slane %v4741_v29, 1 }
 0xc10   :  { %v4743_v43 = vadd.f32 %v4742_v0, %v4741_v29 }
 0xc12   :  { %v4744_v41 = vmul.f32 0.0625, %v4743_v43 }
 0xc14   :  { %v4745_v49 = vadd.f32 1e-05, %v4744_v41 }
 0xc16   :  { %7566 = vrsqrt.f32 %v4745_v49 }
 0xc20   :  { %v7567_v50 = vpop.eup %7566 }
 0xc21   :  { %v4747_v62 = vmul.f32 %v7567_v50, %v4731_v54  ;;  %v4748_v36 = vmul.f32 %v7567_v50, %v4732_v24 }
 0xc23   :  { %v4756_v53 = vmul.f32 %v6218_v2, %v4747_v62  ;;  %v4757_v25 = vmul.f32 %v6218_v2, %v4748_v36 }
 0xc25   :  { %v4765_v6 = vadd.f32 %v6219_v32, %v4756_v53  ;;  %v4766_v20 = vadd.f32 %v6219_v32, %v4757_v25 }
 0xc27   :  { %v4770_v56 = vmul.f32 0.2, %v4766_v20  ;;  %vm4767_vm2 = vcmp.gt.f32.partialorder %v4765_v6, 0.0  ;;  %vm4768_vm3 = vcmp.gt.f32.partialorder %v4766_v20, 0.0  ;;  %v4769_v9 = vmul.f32 0.2, %v4765_v6 }
 0xc29   :  { %v4771_v7 = vsel %vm4767_vm2, %v4765_v6, %v4769_v9  ;;  %v4772_v33 = vsel %vm4768_vm3, %v4766_v20, %v4770_v56  ;;  %v6251_v20 = vld [vmem:[%s9766_s19] ss:$0 sm:$0xff] }
 0xc2a   :  { %v4773_v30 = vpack.c.bf16 %v4772_v33, %v4771_v7  ;;  %v6252_v9 = vld [vmem:[%s9767_s20] ss:$0 sm:$0xff] }
 0xc2c   :  { %7047 = vmatpush3.bf16.msra.mxu0 %v4773_v30  ;;  %7053 = vmatpush3.bf16.msra.mxu1 %v4773_v30 }
 0xc2d   :  { %7074 = vmatprep.subr.bf16.mxu1 %v7576_v12  ;;  %7058 = vmatprep.subr.bf16.mxu0 %v7576_v12 }
 0xc2f   :  { %7055 = vmatmul.mubr.msk.bf16.vlgmr.msra.gmra.mrb[224].mxu1 %vm4775_vm4, %v6221_v23  ;;  %7049 = vmatmul.mubr.msk.bf16.vlgmr.msra.gmra.mrb[104].mxu0 %vm4775_vm4, %v4774_v21 }
 0xc30   :  { %7075 = vmatpush3.bf16.msra.mxu1 %v4773_v30  ;;  %7076 = vmatprep.mubr.msk.bf16.mxu1 %vm7577_vm12, %v7576_v12 }
 0xc31   :  { %7088 = vmatprep.subr.bf16.mxu1 %v7576_v12  ;;  %7059 = vmatpush3.bf16.msra.mxu0 %v7542_v8 }
 0xc32   :  { %7060 = vmatprep.subr.bf16.mxu0 %v7576_v12  ;;  %7062 = vmatprep.mubr.msk.bf16.mxu0 %vm7577_vm12, %v7576_v12 }
 0xc35   :  { %7061 = vmatpush3.bf16.msra.mxu0 %v7543_v14  ;;  %v7551_v14 = vld [vmem:[%s9765_s22 + $0x18] sm:$0xff]  }
 0xc36   :  { %7066 = vmatprep.subr.bf16.mxu0 %v7576_v12 }
 0xc37   :  { %7077 = vmatmul.mubr.msk.bf16.vlgmr.msra.gmra.mrb[228].mxu1 %vm4775_vm4, %v6233_v31  ;;  %v5241_v31 = vld [vmem:[%s9768_s21] sm:$0x3] }
 0xc38   :  { %7089 = vmatpush3.bf16.msra.mxu1 %v4773_v30  ;;  %7090 = vmatprep.mubr.msk.bf16.mxu1 %vm7577_vm12, %v7576_v12 }
 0xc39   :  { %7102 = vmatprep.subr.bf16.mxu1 %v7576_v12 }
 0xc3f   :  { %7091 = vmatmul.mubr.msk.bf16.vlgmr.msra.gmra.mrb[232].mxu1 %vm4775_vm4, %v6242_v11  ;;  %v6254_v11 = vld [vmem:[%s9768_s21 + $0x2] sm:$0x3] }
 0xc40   :  { %7104 = vmatprep.mubr.msk.bf16.mxu1 %vm7577_vm12, %v7576_v12 }
 0xd02   :  { %v4863_v17 = vpop.f32.mrb[224].mxu1  ;;  %v4813_v55 = vpop.f32.mrb[104].mxu0 }
 0xd03   :  { %v4869_v52 = vpack.c.bf16 %v4863_v17, %v4863_v17  ;;  %v7056_v34 = vpop.f32.mrb[225].mxu1  ;;  %v7050_v3 = vpop.f32.mrb[105].mxu0  ;;  %v4819_v59 = vpack.c.bf16 %v4813_v55, %v4813_v55  ;;  %v7552_v17 = vld [vmem:[%s9765_s22] sm:$0xff]  }
 0xd04   :  { %v4866_v26 = vpop.f32.mrb[226].mxu1  ;;  %v4816_v45 = vpop.f32.mrb[106].mxu0 }
 0xd05   :  { %7063 = vmatmul.mubr.msk.bf16.vlgmr.msra.gmra.mrb[108].mxu0 %vm4204_vm1, %v4869_v52  ;;  %v7057_v13 = vpop.f32.mrb[227].mxu1  ;;  %v7051_v48 = vpop.f32.mrb[107].mxu0 }
 0xd06   :  { %7067 = vmatpush3.bf16.msra.mxu0 %v7544_v22  ;;  %7070 = vmatprep.mubr.msk.bf16.mxu0 %vm7577_vm12, %v7576_v12  ;;  %v7553_v22 = vld [vmem:[%s9765_s22 + $0x8] sm:$0xff]  }
 0xd07   :  { %7068 = vmatprep.subr.bf16.mxu0 %v7576_v12 }
 0xd0a   :  { %7069 = vmatpush3.bf16.msra.mxu0 %v7545_v40  ;;  %v5024_v28 = vpop.f32.mrb[228].mxu1 }
 0xd0b   :  { %7080 = vmatprep.subr.bf16.mxu0 %v7576_v12  ;;  %v7078_v38 = vpop.f32.mrb[229].mxu1  ;;  %v5030_v37 = vpack.c.bf16 %v5024_v28, %v5024_v28 }
 0xd0c   :  { %v5027_v27 = vpop.f32.mrb[230].mxu1  ;;  %v6266_v38 = vld [vmem:[%s9768_s21 + $0x4] sm:$0x3] }
 0xd0d   :  { %v7079_v60 = vpop.f32.mrb[231].mxu1  ;;  %v6275_v27 = vld [vmem:[%s9768_s21 + $0x6] sm:$0x3] }
 0xd0e   :  { %v7555_v60 = vld [vmem:[%s9765_s22 + $0x28] sm:$0xff]  }
 0xd11   :  { %7071 = vmatmul.mubr.msk.bf16.vlgmr.msra.gmra.mrb[108].mxu0 %vm4204_vm1, %v4819_v59  ;;  %v7554_v59 = vld [vmem:[%s9765_s22 + $0x20] sm:$0xff]  }
 0xd12   :  { %7081 = vmatpush3.bf16.msra.mxu0 %v7546_v19  ;;  %7084 = vmatprep.mubr.msk.bf16.mxu0 %vm7577_vm12, %v7576_v12  ;;  %v5131_v1 = vpop.f32.mrb[232].mxu1 }
 0xd13   :  { %7082 = vmatprep.subr.bf16.mxu0 %v7576_v12  ;;  %v7092_v42 = vpop.f32.mrb[233].mxu1  ;;  %v5137_v63 = vpack.c.bf16 %v5131_v1, %v5131_v1 }
 0xd14   :  { %v5134_v57 = vpop.f32.mrb[234].mxu1 }
 0xd15   :  { %v7093_v4 = vpop.f32.mrb[235].mxu1 }
 0xd16   :  { %7083 = vmatpush3.bf16.msra.mxu0 %v7547_v10 }
 0xd17   :  { %7094 = vmatprep.subr.bf16.mxu0 %v7576_v12 }
 0xd1d   :  { %7085 = vmatmul.mubr.msk.bf16.vlgmr.msra.gmra.mrb[108].mxu0 %vm4204_vm1, %v5030_v37 }
 0xd1e   :  { %7095 = vmatpush3.bf16.msra.mxu0 %v7548_v16  ;;  %7098 = vmatprep.mubr.msk.bf16.mxu0 %vm7577_vm12, %v7576_v12 }
 0xd1f   :  { %7096 = vmatprep.subr.bf16.mxu0 %v7576_v12 }
 0xd22   :  { %7097 = vmatpush3.bf16.msra.mxu0 %v7549_v51 }
 0xd23   :  { %7114 = vmatprep.subr.bf16.mxu0 %v7576_v12 }
 0xd29   :  { %7099 = vmatmul.mubr.msk.bf16.vlgmr.msra.gmra.mrb[108].mxu0 %vm4204_vm1, %v5137_v63 }
 0xd2a   :  { %7118 = vmatprep.mubr.msk.bf16.mxu0 %vm7577_vm12, %v7576_v12  ;;  %7115 = vmatpush3.bf16.msra.mxu0 %v7550_v18  ;;  %v7556_v18 = vld [vmem:[%s9765_s22 + $0x30] sm:$0xff]  }
 0xd2b   :  { %7116 = vmatprep.subr.bf16.mxu0 %v7576_v12 }
 0xd2e   :  { %7117 = vmatpush3.bf16.msra.mxu0 %v7551_v14 }
 0xd2f   :  { %7130 = vmatprep.subr.bf16.mxu0 %v7576_v12 }
 0xdfc   :  { %v5192_v44 = vpop.f32.mrb[108].mxu0 }
 0xdfd   :  { %v5199_v54 = vsel %vm4204_vm1, %v5192_v44, 0.0  ;;  %v7100_v24 = vpop.f32.mrb[109].mxu0 }
 0xdfe   :  { %v5200_v46 = vrot.slane %v5199_v54, 4  ;;  %v5195_v58 = vpop.f32.mrb[110].mxu0 }
 0xdff   :  { %v7101_v61 = vpop.f32.mrb[111].mxu0  ;;  %v7557_v58 = vld [vmem:[%s9765_s22 + $0x38] sm:$0xff]  }
 0xe00   :  { %v5201_v39 = vadd.f32 %v5200_v46, %v5199_v54 }
 0xe02   :  { %v5202_v47 = vrot.slane %v5201_v39, 2 }
 0xe04   :  { %v5203_v35 = vadd.f32 %v5202_v47, %v5201_v39 }
 0xe06   :  { %v5204_v5 = vrot.slane %v5203_v35, 1 }
 0xe08   :  { %v5205_v15 = vadd.f32 %v5204_v5, %v5203_v35 }
 0xe0a   :  { %v5207_v29 = vmul.f32 0.125, %v5205_v15  ;;  %v29_v15 = vstv %s9769_s23 }
 0xe0b   :  { %30 = vst [vmem:[#allocation2] sm:$0x1] %v29_v15 }
 0xe0c   :  { %v5208_v0 = vsub.f32 %v5192_v44, %v5207_v29 }
 0xe0e   :  { %v5209_v43 = vmul.f32 %v5208_v0, %v5208_v0 }
 0xe10   :  { %v5210_v41 = vsel %vm4204_vm1, %v5209_v43, 0.0 }
 0xe11   :  { %v5211_v49 = vrot.slane %v5210_v41, 4 }
 0xe13   :  { %v5212_v50 = vadd.f32 %v5211_v49, %v5210_v41 }
 0xe15   :  { %v5213_v2 = vrot.slane %v5212_v50, 2 }
 0xe17   :  { %v5214_v62 = vadd.f32 %v5213_v2, %v5212_v50 }
 0xe19   :  { %v5215_v36 = vrot.slane %v5214_v62, 1 }
 0xe1b   :  { %v5216_v32 = vadd.f32 %v5215_v36, %v5214_v62 }
 0xe1d   :  { %v5217_v53 = vmul.f32 0.125, %v5216_v32 }
 0xe1f   :  { %v5218_v25 = vadd.f32 1e-05, %v5217_v53 }
 0xe21   :  { %7568 = vrsqrt.f32 %v5218_v25 }
 0xe2b   :  { %v7569_v6 = vpop.eup %7568 }
 0xe2c   :  { %v5220_v56 = vmul.f32 %v7569_v6, %v5208_v0 }
 0xe2e   :  { %v5228_v7 = vmul.f32 %v6251_v20, %v5220_v56 }
 0xe30   :  { %v5236_v33 = vadd.f32 %v6252_v9, %v5228_v7 }
 0xe32   :  { %vm5237_vm5 = vcmp.gt.f32.partialorder %v5236_v33, 0.0  ;;  %v5238_v30 = vmul.f32 0.2, %v5236_v33 }
 0xe34   :  { %v5239_v23 = vsel %vm5237_vm5, %v5236_v33, %v5238_v30 }
 0xe35   :  { %v5240_v21 = vpack.c.bf16 %v5239_v23, %v5239_v23 }
 0xe37   :  { %v5248_v8 = vsel %vm5246_vm6, %v5240_v21, 0 }
 0xe38   :  { %7103 = vmatpush3.bf16.msra.mxu1 %v5248_v8 }
 0xe39   :  { %7108 = vmatprep.subr.bf16.mxu1 %v7576_v12 }
 0xe3b   :  { %7105 = vmatmul.mubr.msk.bf16.vlgmr.msra.gmra.mrb[236].mxu1 %vm5242_vm7, %v5241_v31 }
 0xe3c   :  { %7109 = vmatpush3.bf16.msra.mxu1 %v5248_v8  ;;  %7110 = vmatprep.mubr.msk.bf16.mxu1 %vm7577_vm12, %v7576_v12 }
 0xe3d   :  { %7122 = vmatprep.subr.bf16.mxu1 %v7576_v12 }
 0xe43   :  { %7111 = vmatmul.mubr.msk.bf16.vlgmr.msra.gmra.mrb[240].mxu1 %vm5242_vm7, %v6254_v11 }
 0xe44   :  { %7126 = vmatprep.mubr.msk.bf16.mxu1 %vm7577_vm12, %v7576_v12  ;;  %7123 = vmatpush3.bf16.msra.mxu1 %v7552_v17 }
 0xe45   :  { %7124 = vmatprep.subr.bf16.mxu1 %v7576_v12 }
 0xe48   :  { %7125 = vmatpush3.bf16.msra.mxu1 %v7553_v22 }
 0xe49   :  { %7136 = vmatprep.subr.bf16.mxu1 %v7576_v12 }
 0xf0e   :  { %v5284_v55 = vpop.f32.mrb[236].mxu1 }
 0xf0f   :  { %v5290_v52 = vpack.c.bf16 %v5284_v55, %v5284_v55  ;;  %v7106_v34 = vpop.f32.mrb[237].mxu1 }
 0xf10   :  { %v5287_v3 = vpop.f32.mrb[238].mxu1 }
 0xf11   :  { %v7107_v26 = vpop.f32.mrb[239].mxu1  ;;  %7127 = vmatmul.mubr.msk.bf16.vlgmr.msra.gmra.mrb[244].mxu1 %vm4204_vm1, %v5290_v52 }
 0xf12   :  { %7140 = vmatprep.mubr.msk.bf16.mxu1 %vm7577_vm12, %v7576_v12  ;;  %7137 = vmatpush3.bf16.msra.mxu1 %v7554_v59 }
 0xf13   :  { %7138 = vmatprep.subr.bf16.mxu1 %v7576_v12 }
 0xf16   :  { %v5334_v45 = vpop.f32.mrb[240].mxu1  ;;  %7139 = vmatpush3.bf16.msra.mxu1 %v7555_v60 }
 0xf17   :  { %v5340_v13 = vpack.c.bf16 %v5334_v45, %v5334_v45  ;;  %v7112_v48 = vpop.f32.mrb[241].mxu1  ;;  %7150 = vmatprep.subr.bf16.mxu1 %v7576_v12 }
 0xf18   :  { %v5337_v40 = vpop.f32.mrb[242].mxu1 }
 0xf19   :  { %7119 = vmatmul.mubr.msk.bf16.vlgmr.msra.gmra.mrb[112].mxu0 %vm4204_vm1, %v5340_v13  ;;  %v7113_v28 = vpop.f32.mrb[243].mxu1 }
 0xf1a   :  { %7131 = vmatpush3.bf16.msra.mxu0 %v5248_v8  ;;  %7132 = vmatprep.mubr.msk.bf16.mxu0 %vm7577_vm12, %v7576_v12 }
 0xf1b   :  { %7144 = vmatprep.subr.bf16.mxu0 %v7576_v12 }
 0xf21   :  { %7133 = vmatmul.mubr.msk.bf16.vlgmr.msra.gmra.mrb[116].mxu0 %vm5242_vm7, %v6266_v38 }
 0xf22   :  { %7145 = vmatpush3.bf16.msra.mxu0 %v5248_v8  ;;  %7146 = vmatprep.mubr.msk.bf16.mxu0 %vm7577_vm12, %v7576_v12 }
 0xf29   :  { %7147 = vmatmul.mubr.msk.bf16.vlgmr.msra.gmra.mrb[120].mxu0 %vm5242_vm7, %v6275_v27 }
 0xfe4   :  { %v5450_v19 = vpop.f32.mrb[244].mxu1 }
 0xfe5   :  { %v7128_v10 = vpop.f32.mrb[245].mxu1 }
 0xfe6   :  { %v5453_v1 = vpop.f32.mrb[246].mxu1 }
 0xfe7   :  { %v7129_v42 = vpop.f32.mrb[247].mxu1 }
 0xfec   :  { %v5395_v57 = vpop.f32.mrb[112].mxu0 }
 0xfed   :  { %v7120_v4 = vpop.f32.mrb[113].mxu0  ;;  %v5451_v37 = vadd.f32 %v5450_v19, %v5395_v57 }
 0xfee   :  { %v5398_v16 = vpop.f32.mrb[114].mxu0 }
 0xfef   :  { %v7121_v51 = vpop.f32.mrb[115].mxu0 }
 0xff4   :  { %v5495_v63 = vpop.f32.mrb[116].mxu0 }
 0xff5   :  { %v5501_v44 = vpack.c.bf16 %v5495_v63, %v5495_v63  ;;  %v7134_v54 = vpop.f32.mrb[117].mxu0 }
 0xff6   :  { %v5498_v24 = vpop.f32.mrb[118].mxu0 }
 0xff7   :  { %7141 = vmatmul.mubr.msk.bf16.vlgmr.msra.gmra.mrb[248].mxu1 %vm4204_vm1, %v5501_v44  ;;  %v7135_v46 = vpop.f32.mrb[119].mxu0 }
 0xff8   :  { %7151 = vmatpush3.bf16.msra.mxu1 %v7556_v18  ;;  %7154 = vmatprep.mubr.msk.bf16.mxu1 %vm7577_vm12, %v7576_v12 }
 0xff9   :  { %7152 = vmatprep.subr.bf16.mxu1 %v7576_v12  ;;  %v6284_v12 = vld [vmem:[#allocation2] ss:$0 sm:$0xff] }
 0xffc   :  { %v5602_v61 = vpop.f32.mrb[120].mxu0  ;;  %7153 = vmatpush3.bf16.msra.mxu1 %v7557_v58 }
 0xffd   :  { %v5608_v39 = vpack.c.bf16 %v5602_v61, %v5602_v61  ;;  %v7148_v47 = vpop.f32.mrb[121].mxu0 }
 0xffe   :  { %v5605_v35 = vpop.f32.mrb[122].mxu0 }
 0xfff   :  { %7155 = vmatmul.mubr.msk.bf16.vlgmr.msra.gmra.mrb[252].mxu1 %vm4204_vm1, %v5608_v39  ;;  %v7149_v5 = vpop.f32.mrb[123].mxu0 }
0x10ca   :  { %v5556_v29 = vpop.f32.mrb[248].mxu1 }
0x10cb   :  { %v5562_v0 = vadd.f32 %v5556_v29, %v5451_v37  ;;  %v7142_v43 = vpop.f32.mrb[249].mxu1 }
0x10cc   :  { %v5559_v41 = vpop.f32.mrb[250].mxu1 }
0x10cd   :  { %v7143_v49 = vpop.f32.mrb[251].mxu1 }
0x10d2   :  { %v5663_v50 = vpop.f32.mrb[252].mxu1 }
0x10d3   :  { %v5669_v2 = vadd.f32 %v5663_v50, %v5562_v0  ;;  %v7156_v62 = vpop.f32.mrb[253].mxu1 }
0x10d4   :  { %v5666_v36 = vpop.f32.mrb[254].mxu1 }
0x10d5   :  { %v5677_v32 = vadd.f32 %v6284_v12, %v5669_v2  ;;  %v7157_v53 = vpop.f32.mrb[255].mxu1 }
0x10d7   :  { %v6285_v25 = vmul.f32 -1.442695, %v5677_v32 }
0x10d9   :  { %7570 = vpow2.f32 %v6285_v25 }
0x10e3   :  { %v7571_v6 = vpop.eup %7570 }
0x10e4   :  { %v5681_v20 = vadd.f32 1.0, %v7571_v6 }
0x10e6   :  { %7572 = vrcp.f32 %v5681_v20 }
0x10f0   :  { %v7573_v56 = vpop.eup %7572 }
0x10f1   :  { %5685 = vst.msk [vmem:[%s9770_s24] sm:$0xf] %vm5684_vm8, %v7573_v56 }

</bundles_post_ra>
